<compile_context>
chip_gen: v7x
topology: tpu7x:2x2x1
jax: 0.10.0
libtpu: 0.0.40
codegen_flags: <defaults>
</compile_context>

<pallas_src>
import functools

import jax
import jax.numpy as jnp
from jax.experimental import pallas as pl
from jax.experimental.pallas import tpu as pltpu

# ----------------------------- static geometry ------------------------------
H1 = W1 = 16                                # stage-A spatial size
WP1 = 24                                    # padded row stride, stage A
ROWS1 = H1 * WP1                            # 384 flat rows
H2 = W2 = 8                                 # stage-B spatial size (after pool1)
WP2 = 16                                    # padded row stride, stage B
ROWS2 = H2 * WP2                            # 128 flat rows
H3 = W3 = 4                                 # final spatial size (after pool2)
S_TOP = 8                                   # extra zero rows above/below the map
A1_ROWS = S_TOP + (H1 + 2) * WP1 + S_TOP    # 448
A2_ROWS = S_TOP + (H2 + 2) * WP2 + S_TOP    # 176
K1 = 32                                     # layer-1 im2col width (27 taps + bias ind. + pad)


# ------------------------------ kernel helpers -------------------------------

def _conv3x3(src_ref, w_ref, cin, wp, nrows):
    """3x3 / pad-1 conv as 9 contiguous flat tap slices.

    bf16 MXU operands, f32 accumulation held in a register-resident value
    (single store by the caller instead of 9 VMEM read-modify-writes).

    src_ref : padded flat activation scratch, data row (y,x) at S_TOP+(1+y)*wp+x
    w_ref   : (9*cin, cout) bf16 weights, rows ordered (ky, kx, cin)
    returns : (nrows, cout) f32 value; row r = y*wp + x
    """
    acc = None
    for t in range(9):
        ky, kx = divmod(t, 3)
        start = S_TOP + ky * wp + kx - 1                       # static offset
        tap = src_ref[pl.ds(start, nrows), :].astype(jnp.bfloat16)
        wk = w_ref[pl.ds(t * cin, cin), :]
        d = jnp.dot(tap, wk, preferred_element_type=jnp.float32)
        acc = d if acc is None else acc + d
    return acc


def _pool_row(acc_ref, b, wp_in, w_out, y2):
    """One output row of a 2x2/2 max-pool on the raw conv accumulator, then
    bias+ReLU (valid: x -> relu(x + b) is monotone per channel, so it commutes
    with the max)."""
    q = 2 * y2 * wp_in
    m = jnp.maximum(
        jnp.maximum(acc_ref[pl.ds(q, w_out, stride=2), :],
                    acc_ref[pl.ds(q + 1, w_out, stride=2), :]),
        jnp.maximum(acc_ref[pl.ds(q + wp_in, w_out, stride=2), :],
                    acc_ref[pl.ds(q + wp_in + 1, w_out, stride=2), :]))
    return jnp.maximum(m + b, 0.0)


def convnet_kernel(p1_ref, w1_ref, w2_ref, b2_ref, w3_ref, b3_ref, w4_ref, b4_ref,
                   out_ref, a1_ref, acc_a_ref, a2_ref, a3_ref, acc_b_ref, *, bt):
    # Hoisted loads / constants (reused across the whole batch tile).
    b2 = b2_ref[...]                                           # (1, 64)
    b3 = b3_ref[...]                                           # (1, 128)
    b4 = b4_ref[...]                                           # (1, 128)
    col = jax.lax.broadcasted_iota(jnp.int32, (ROWS2, 1), 0)
    mask_b = ((col & (WP2 - 1)) < W2).astype(jnp.float32)      # stage-B pad-column mask

    # Zero ONLY the rows that the per-image stores never rewrite (done once per
    # grid step, i.e. once per batch tile — every step, so megacore-safe).
    a1_ref[pl.ds(0, S_TOP + WP1), :] = jnp.zeros((S_TOP + WP1, 64), jnp.float32)
    a1_ref[pl.ds(S_TOP + WP1 + ROWS1, S_TOP + WP1), :] = (
        jnp.zeros((S_TOP + WP1, 64), jnp.float32))
    a2_ref[...] = jnp.zeros_like(a2_ref)                       # tiny; pad cols stay zero
    a3_ref[pl.ds(0, S_TOP + WP2), :] = jnp.zeros((S_TOP + WP2, 128), jnp.float32)
    a3_ref[pl.ds(S_TOP + WP2 + ROWS2, S_TOP + WP2), :] = (
        jnp.zeros((S_TOP + WP2, 128), jnp.float32))

    # Per-image fused pipeline; all VMEM buffers are reused across images.
    for img in range(bt):
        # ---- conv1 (3->64): im2col matmul (K=32).  Bias is folded in as an
        # extra "indicator" column, so zero (padding) im2col rows stay exactly
        # zero after ReLU and keep the padded activation's pad columns clean.
        y1 = jnp.dot(p1_ref[img], w1_ref[...], preferred_element_type=jnp.float32)
        a1_ref[pl.ds(S_TOP + WP1, ROWS1), :] = jnp.maximum(y1, 0.0)

        # ---- conv2 (64->64): taps accumulated in registers, single store
        acc_a_ref[...] = _conv3x3(a1_ref, w2_ref, 64, WP1, ROWS1)

        # ---- maxpool1 fused with conv2 bias+ReLU -> stage-B padded activation
        for y2 in range(H2):
            a2_ref[pl.ds(S_TOP + (1 + y2) * WP2, W2), :] = _pool_row(
                acc_a_ref, b2, WP1, W2, y2)

        # ---- conv3 (64->128): registers -> bias+ReLU -> pad-column mask
        acc3 = _conv3x3(a2_ref, w3_ref, 64, WP2, ROWS2)
        a3_ref[pl.ds(S_TOP + WP2, ROWS2), :] = (
            jnp.maximum(acc3 + b3, 0.0) * mask_b)

        # ---- conv4 (128->128): registers, single store into the accumulator
        acc_b_ref[...] = _conv3x3(a3_ref, w4_ref, 128, WP2, ROWS2)

        # ---- maxpool2 fused with conv4 bias+ReLU; lane-dense (16, 128) output
        for y2 in range(H3):
            out_ref[img, pl.ds(W3 * y2, W3), :] = _pool_row(
                acc_b_ref, b4, WP2, W3, y2)


# ------------------------------ JAX wrapper ----------------------------------

def _im2col_stage_a(x_nhwc):
    """Layer-1 im2col in the padded stage-A flat layout (row r = 24*y + x,
    rows with x >= 16 are zero), bf16, with a bias-indicator column."""
    n = x_nhwc.shape[0]
    xp = jnp.pad(x_nhwc, ((0, 0), (1, 1), (1, 1), (0, 0)))
    taps = [xp[:, ky:ky + H1, kx:kx + W1, :]
            for ky in range(3) for kx in range(3)]                 # (ky,kx,cin) order
    taps.append(jnp.ones((n, H1, W1, 1), jnp.float32))             # bias indicator
    taps.append(jnp.zeros((n, H1, W1, K1 - 28), jnp.float32))      # pad K to 32
    pat = jnp.concatenate(taps, axis=-1)                           # (n,16,16,32)
    pat = jnp.pad(pat, ((0, 0), (0, 0), (0, WP1 - W1), (0, 0)))    # (n,16,24,32)
    return pat.reshape(n, ROWS1, K1).astype(jnp.bfloat16)


def _choose_batch_tile(n, max_tile=8):
    """Images per grid step: amortize per-step overhead, keep >= 2 grid steps
    when possible (v7x megacore), and require bt | n."""
    if n <= 1:
        return 1
    bt = max(1, min(max_tile, n // 2))
    while n % bt:
        bt -= 1
    return bt


def convnet_forward(x_nchw, params):
    w1, w2, b2, w3, b3, w4, b4 = params
    n = x_nchw.shape[0]
    bt = _choose_batch_tile(n)

    x = jnp.transpose(x_nchw, (0, 2, 3, 1)).astype(jnp.float32)    # NCHW -> NHWC
    p1 = _im2col_stage_a(x)                                        # (n, 384, 32) bf16

    kernel = functools.partial(convnet_kernel, bt=bt)
    out = pl.pallas_call(
        kernel,
        out_shape=jax.ShapeDtypeStruct((n, H3 * W3, 128), jnp.float32),
        grid=(n // bt,),
        in_specs=[
            pl.BlockSpec((bt, ROWS1, K1), lambda i: (i, 0, 0)),    # im2col (bt images)
            pl.BlockSpec((K1, 64), lambda i: (0, 0)),              # w1 (+ folded bias row)
            pl.BlockSpec((9 * 64, 64), lambda i: (0, 0)),          # w2
            pl.BlockSpec((1, 64), lambda i: (0, 0)),               # b2
            pl.BlockSpec((9 * 64, 128), lambda i: (0, 0)),         # w3
            pl.BlockSpec((1, 128), lambda i: (0, 0)),              # b3
            pl.BlockSpec((9 * 128, 128), lambda i: (0, 0)),        # w4
            pl.BlockSpec((1, 128), lambda i: (0, 0)),              # b4
        ],
        out_specs=pl.BlockSpec((bt, H3 * W3, 128), lambda i: (i, 0, 0)),
        scratch_shapes=[
            pltpu.VMEM((A1_ROWS, 64), jnp.float32),    # padded stage-A activation
            pltpu.VMEM((ROWS1, 64), jnp.float32),      # conv2 accumulator
            pltpu.VMEM((A2_ROWS, 64), jnp.float32),    # padded stage-B activation (64ch)
            pltpu.VMEM((A2_ROWS, 128), jnp.float32),   # padded stage-B activation (128ch)
            pltpu.VMEM((ROWS2, 128), jnp.float32),     # conv4 accumulator
        ],
        compiler_params=pltpu.CompilerParams(
            dimension_semantics=("parallel",)),
    )(p1, w1, w2, b2, w3, b3, w4, b4)

    out = out.reshape(n, H3, W3, 128)
    return jnp.transpose(out, (0, 3, 1, 2))                        # NHWC -> NCHW


# ----------------------- deterministic parameter init ------------------------

def init_params(key):
    """Random He-init conv weights + inference-mode BN, with BN scale folded
    into the weights (mathematically exact for running-stats BN)."""
    eps = 1e-5
    cfg = [(3, 64), (64, 64), (64, 128), (128, 128)]
    folded = []
    for cin, cout in cfg:
        key, kw, kb, kg, kbe = jax.random.split(key, 5)
        w = jax.random.normal(kw, (3, 3, cin, cout), jnp.float32) * jnp.sqrt(2.0 / (9 * cin))
        conv_b = 0.01 * jax.random.normal(kb, (cout,), jnp.float32)
        gamma = 1.0 + 0.1 * jax.random.normal(kg, (cout,), jnp.float32)
        beta = 0.1 * jax.random.normal(kbe, (cout,), jnp.float32)
        running_mean = jnp.zeros((cout,), jnp.float32)
        running_var = jnp.ones((cout,), jnp.float32)
        scale = gamma / jnp.sqrt(running_var + eps)
        w_folded = (w * scale).reshape(9 * cin, cout)              # fold BN scale
        bias = beta + scale * (conv_b - running_mean)
        folded.append((w_folded, bias))

    (w1f, b1), (w2f, b2), (w3f, b3), (w4f, b4) = folded
    # layer 1: pad K from 27 to 32, put the bias into the "indicator" row 27
    w1p = jnp.zeros((K1, 64), jnp.float32).at[:27].set(w1f).at[27].set(b1)
    return (w1p.astype(jnp.bfloat16),
            w2f.astype(jnp.bfloat16), b2.reshape(1, 64),
            w3f.astype(jnp.bfloat16), b3.reshape(1, 128),
            w4f.astype(jnp.bfloat16), b4.reshape(1, 128))


# ---------------------------------- main --------------------------------------

if __name__ == "__main__":
    key = jax.random.PRNGKey(0)
    k_x, k_p = jax.random.split(key)
    x = jax.random.normal(k_x, (2, 3, 16, 16), jnp.float32)        # NCHW, like PyTorch
    params = init_params(k_p)

    fwd = jax.jit(lambda a: convnet_forward(a, params))
    out = jax.block_until_ready(fwd(x))

    assert out.shape == (2, 128, 4, 4), out.shape
    assert out.dtype == jnp.float32
    assert bool(jnp.all(jnp.isfinite(out)))
    print("KERNEL_OK")
</pallas_src>

<mosaic_0001>
module attributes {stable_mosaic.version = 11 : i64} {
  func.func @convnet_kernel(%arg0: i32, %arg1: memref<1x384x32xbf16, #tpu.memory_space<vmem>>, %arg2: memref<32x64xbf16, #tpu.memory_space<vmem>>, %arg3: memref<576x64xbf16, #tpu.memory_space<vmem>>, %arg4: memref<1x64xf32, #tpu.memory_space<vmem>>, %arg5: memref<576x128xbf16, #tpu.memory_space<vmem>>, %arg6: memref<1x128xf32, #tpu.memory_space<vmem>>, %arg7: memref<1152x128xbf16, #tpu.memory_space<vmem>>, %arg8: memref<1x128xf32, #tpu.memory_space<vmem>>, %arg9: memref<1x16x128xf32, #tpu.memory_space<vmem>>, %arg10: memref<448x64xf32, #tpu.memory_space<vmem>>, %arg11: memref<384x64xf32, #tpu.memory_space<vmem>>, %arg12: memref<176x64xf32, #tpu.memory_space<vmem>>, %arg13: memref<176x128xf32, #tpu.memory_space<vmem>>, %arg14: memref<128x128xf32, #tpu.memory_space<vmem>>) attributes {dimension_semantics = [#tpu.dimension_semantics<parallel>], iteration_bounds = array<i64: 2>, scalar_prefetch = 0 : i64, scratch_operands = 5 : i64, tpu.core_type = #tpu.core_type<tc>, window_params = [{transform_indices = @transform_0, window_bounds = array<i64: 1, 384, 32>}, {pipeline_mode = #tpu.pipeline_mode<synchronous>, transform_indices = @transform_1, window_bounds = array<i64: 32, 64>}, {pipeline_mode = #tpu.pipeline_mode<synchronous>, transform_indices = @transform_2, window_bounds = array<i64: 576, 64>}, {pipeline_mode = #tpu.pipeline_mode<synchronous>, transform_indices = @transform_3, window_bounds = array<i64: 1, 64>}, {pipeline_mode = #tpu.pipeline_mode<synchronous>, transform_indices = @transform_4, window_bounds = array<i64: 576, 128>}, {pipeline_mode = #tpu.pipeline_mode<synchronous>, transform_indices = @transform_5, window_bounds = array<i64: 1, 128>}, {pipeline_mode = #tpu.pipeline_mode<synchronous>, transform_indices = @transform_6, window_bounds = array<i64: 1152, 128>}, {pipeline_mode = #tpu.pipeline_mode<synchronous>, transform_indices = @transform_7, window_bounds = array<i64: 1, 128>}, {transform_indices = @transform_8, window_bounds = array<i64: 1, 16, 128>}]} {
    %c0 = arith.constant 0 : index
    %c0_0 = arith.constant 0 : index
    %0 = vector.load %arg4[%c0, %c0_0] : memref<1x64xf32, #tpu.memory_space<vmem>>, vector<1x64xf32>
    %c0_1 = arith.constant 0 : index
    %c0_2 = arith.constant 0 : index
    %1 = vector.load %arg6[%c0_1, %c0_2] : memref<1x128xf32, #tpu.memory_space<vmem>>, vector<1x128xf32>
    %c0_3 = arith.constant 0 : index
    %c0_4 = arith.constant 0 : index
    %2 = vector.load %arg8[%c0_3, %c0_4] : memref<1x128xf32, #tpu.memory_space<vmem>>, vector<1x128xf32>
    %3 = tpu.iota {dimensions = array<i32: 0>} : vector<128x1xi32>
    %c15_i32 = arith.constant 15 : i32
    %4 = vector.broadcast %c15_i32 : i32 to vector<128x1xi32>
    %5 = arith.andi %3, %4 : vector<128x1xi32>
    %c8_i32 = arith.constant 8 : i32
    %6 = vector.broadcast %c8_i32 : i32 to vector<128x1xi32>
    %7 = arith.cmpi slt, %5, %6 : vector<128x1xi32>
    %8 = arith.extui %7 : vector<128x1xi1> to vector<128x1xi32>
    %9 = arith.sitofp %8 : vector<128x1xi32> to vector<128x1xf32>
    %cst = arith.constant 0.000000e+00 : f32
    %10 = vector.broadcast %cst : f32 to vector<32x64xf32>
    %c0_5 = arith.constant 0 : index
    %c0_6 = arith.constant 0 : index
    %11 = vector.load %arg10[%c0_5, %c0_6] : memref<448x64xf32, #tpu.memory_space<vmem>>, vector<32x64xf32>
    tpu.vector_store %arg10[%c0_5, %c0_6], %10 {strides = array<i32>} : memref<448x64xf32, #tpu.memory_space<vmem>>, vector<32x64xf32>,
    %cst_7 = arith.constant 0.000000e+00 : f32
    %12 = vector.broadcast %cst_7 : f32 to vector<32x64xf32>
    %c416 = arith.constant 416 : index
    %c0_8 = arith.constant 0 : index
    %13 = vector.load %arg10[%c416, %c0_8] : memref<448x64xf32, #tpu.memory_space<vmem>>, vector<32x64xf32>
    tpu.vector_store %arg10[%c416, %c0_8], %12 {strides = array<i32>} : memref<448x64xf32, #tpu.memory_space<vmem>>, vector<32x64xf32>,
    %cst_9 = arith.constant 0.000000e+00 : f32
    %14 = vector.broadcast %cst_9 : f32 to vector<176x64xf32>
    %c0_10 = arith.constant 0 : index
    %c0_11 = arith.constant 0 : index
    %15 = vector.load %arg12[%c0_10, %c0_11] : memref<176x64xf32, #tpu.memory_space<vmem>>, vector<176x64xf32>
    tpu.vector_store %arg12[%c0_10, %c0_11], %14 {strides = array<i32>} : memref<176x64xf32, #tpu.memory_space<vmem>>, vector<176x64xf32>,
    %cst_12 = arith.constant 0.000000e+00 : f32
    %16 = vector.broadcast %cst_12 : f32 to vector<24x128xf32>
    %c0_13 = arith.constant 0 : index
    %c0_14 = arith.constant 0 : index
    %17 = vector.load %arg13[%c0_13, %c0_14] : memref<176x128xf32, #tpu.memory_space<vmem>>, vector<24x128xf32>
    tpu.vector_store %arg13[%c0_13, %c0_14], %16 {strides = array<i32>} : memref<176x128xf32, #tpu.memory_space<vmem>>, vector<24x128xf32>,
    %cst_15 = arith.constant 0.000000e+00 : f32
    %18 = vector.broadcast %cst_15 : f32 to vector<24x128xf32>
    %c152 = arith.constant 152 : index
    %c0_16 = arith.constant 0 : index
    %19 = vector.load %arg13[%c152, %c0_16] : memref<176x128xf32, #tpu.memory_space<vmem>>, vector<24x128xf32>
    tpu.vector_store %arg13[%c152, %c0_16], %18 {strides = array<i32>} : memref<176x128xf32, #tpu.memory_space<vmem>>, vector<24x128xf32>,
    %c0_17 = arith.constant 0 : index
    %c0_18 = arith.constant 0 : index
    %c0_19 = arith.constant 0 : index
    %20 = vector.load %arg1[%c0_17, %c0_18, %c0_19] : memref<1x384x32xbf16, #tpu.memory_space<vmem>>, vector<1x384x32xbf16>
    %21 = vector.shape_cast %20 : vector<1x384x32xbf16> to vector<384x32xbf16>
    %c0_20 = arith.constant 0 : index
    %c0_21 = arith.constant 0 : index
    %22 = vector.load %arg2[%c0_20, %c0_21] : memref<32x64xbf16, #tpu.memory_space<vmem>>, vector<32x64xbf16>
    %cst_22 = arith.constant dense<0.000000e+00> : vector<384x64xf32>
    %23 = tpu.matmul %21, %22, %cst_22 {dimension_numbers = #tpu.dot_dimension_numbers<[1], [0], [0], [1], [0, 0, 1, 1], [], []>} : vector<384x32xbf16>, vector<32x64xbf16>, vector<384x64xf32> -> vector<384x64xf32>
    %cst_23 = arith.constant 0.000000e+00 : f32
    %24 = vector.broadcast %cst_23 : f32 to vector<384x64xf32>
    %25 = arith.maximumf %23, %24 : vector<384x64xf32>
    %c32 = arith.constant 32 : index
    %c0_24 = arith.constant 0 : index
    %26 = vector.load %arg10[%c32, %c0_24] : memref<448x64xf32, #tpu.memory_space<vmem>>, vector<384x64xf32>
    tpu.vector_store %arg10[%c32, %c0_24], %25 {strides = array<i32>} : memref<448x64xf32, #tpu.memory_space<vmem>>, vector<384x64xf32>,
    %c7 = arith.constant 7 : index
    %c0_25 = arith.constant 0 : index
    %27 = vector.load %arg10[%c7, %c0_25] : memref<448x64xf32, #tpu.memory_space<vmem>>, vector<384x64xf32>
    %28 = arith.truncf %27 : vector<384x64xf32> to vector<384x64xbf16>
    %c0_26 = arith.constant 0 : index
    %c0_27 = arith.constant 0 : index
    %29 = vector.load %arg3[%c0_26, %c0_27] : memref<576x64xbf16, #tpu.memory_space<vmem>>, vector<64x64xbf16>
    %cst_28 = arith.constant dense<0.000000e+00> : vector<384x64xf32>
    %30 = tpu.matmul %28, %29, %cst_28 {dimension_numbers = #tpu.dot_dimension_numbers<[1], [0], [0], [1], [0, 0, 1, 1], [], []>} : vector<384x64xbf16>, vector<64x64xbf16>, vector<384x64xf32> -> vector<384x64xf32>
    %c8 = arith.constant 8 : index
    %c0_29 = arith.constant 0 : index
    %31 = vector.load %arg10[%c8, %c0_29] : memref<448x64xf32, #tpu.memory_space<vmem>>, vector<384x64xf32>
    %32 = arith.truncf %31 : vector<384x64xf32> to vector<384x64xbf16>
    %c64 = arith.constant 64 : index
    %c0_30 = arith.constant 0 : index
    %33 = vector.load %arg3[%c64, %c0_30] : memref<576x64xbf16, #tpu.memory_space<vmem>>, vector<64x64xbf16>
    %cst_31 = arith.constant dense<0.000000e+00> : vector<384x64xf32>
    %34 = tpu.matmul %32, %33, %cst_31 {dimension_numbers = #tpu.dot_dimension_numbers<[1], [0], [0], [1], [0, 0, 1, 1], [], []>} : vector<384x64xbf16>, vector<64x64xbf16>, vector<384x64xf32> -> vector<384x64xf32>
    %35 = arith.addf %30, %34 : vector<384x64xf32>
    %c9 = arith.constant 9 : index
    %c0_32 = arith.constant 0 : index
    %36 = vector.load %arg10[%c9, %c0_32] : memref<448x64xf32, #tpu.memory_space<vmem>>, vector<384x64xf32>
    %37 = arith.truncf %36 : vector<384x64xf32> to vector<384x64xbf16>
    %c128 = arith.constant 128 : index
    %c0_33 = arith.constant 0 : index
    %38 = vector.load %arg3[%c128, %c0_33] : memref<576x64xbf16, #tpu.memory_space<vmem>>, vector<64x64xbf16>
    %cst_34 = arith.constant dense<0.000000e+00> : vector<384x64xf32>
    %39 = tpu.matmul %37, %38, %cst_34 {dimension_numbers = #tpu.dot_dimension_numbers<[1], [0], [0], [1], [0, 0, 1, 1], [], []>} : vector<384x64xbf16>, vector<64x64xbf16>, vector<384x64xf32> -> vector<384x64xf32>
    %40 = arith.addf %35, %39 : vector<384x64xf32>
    %c31 = arith.constant 31 : index
    %c0_35 = arith.constant 0 : index
    %41 = vector.load %arg10[%c31, %c0_35] : memref<448x64xf32, #tpu.memory_space<vmem>>, vector<384x64xf32>
    %42 = arith.truncf %41 : vector<384x64xf32> to vector<384x64xbf16>
    %c192 = arith.constant 192 : index
    %c0_36 = arith.constant 0 : index
    %43 = vector.load %arg3[%c192, %c0_36] : memref<576x64xbf16, #tpu.memory_space<vmem>>, vector<64x64xbf16>
    %cst_37 = arith.constant dense<0.000000e+00> : vector<384x64xf32>
    %44 = tpu.matmul %42, %43, %cst_37 {dimension_numbers = #tpu.dot_dimension_numbers<[1], [0], [0], [1], [0, 0, 1, 1], [], []>} : vector<384x64xbf16>, vector<64x64xbf16>, vector<384x64xf32> -> vector<384x64xf32>
    %45 = arith.addf %40, %44 : vector<384x64xf32>
    %c32_38 = arith.constant 32 : index
    %c0_39 = arith.constant 0 : index
    %46 = vector.load %arg10[%c32_38, %c0_39] : memref<448x64xf32, #tpu.memory_space<vmem>>, vector<384x64xf32>
    %47 = arith.truncf %46 : vector<384x64xf32> to vector<384x64xbf16>
    %c256 = arith.constant 256 : index
    %c0_40 = arith.constant 0 : index
    %48 = vector.load %arg3[%c256, %c0_40] : memref<576x64xbf16, #tpu.memory_space<vmem>>, vector<64x64xbf16>
    %cst_41 = arith.constant dense<0.000000e+00> : vector<384x64xf32>
    %49 = tpu.matmul %47, %48, %cst_41 {dimension_numbers = #tpu.dot_dimension_numbers<[1], [0], [0], [1], [0, 0, 1, 1], [], []>} : vector<384x64xbf16>, vector<64x64xbf16>, vector<384x64xf32> -> vector<384x64xf32>
    %50 = arith.addf %45, %49 : vector<384x64xf32>
    %c33 = arith.constant 33 : index
    %c0_42 = arith.constant 0 : index
    %51 = vector.load %arg10[%c33, %c0_42] : memref<448x64xf32, #tpu.memory_space<vmem>>, vector<384x64xf32>
    %52 = arith.truncf %51 : vector<384x64xf32> to vector<384x64xbf16>
    %c320 = arith.constant 320 : index
    %c0_43 = arith.constant 0 : index
    %53 = vector.load %arg3[%c320, %c0_43] : memref<576x64xbf16, #tpu.memory_space<vmem>>, vector<64x64xbf16>
    %cst_44 = arith.constant dense<0.000000e+00> : vector<384x64xf32>
    %54 = tpu.matmul %52, %53, %cst_44 {dimension_numbers = #tpu.dot_dimension_numbers<[1], [0], [0], [1], [0, 0, 1, 1], [], []>} : vector<384x64xbf16>, vector<64x64xbf16>, vector<384x64xf32> -> vector<384x64xf32>
    %55 = arith.addf %50, %54 : vector<384x64xf32>
    %c55 = arith.constant 55 : index
    %c0_45 = arith.constant 0 : index
    %56 = vector.load %arg10[%c55, %c0_45] : memref<448x64xf32, #tpu.memory_space<vmem>>, vector<384x64xf32>
    %57 = arith.truncf %56 : vector<384x64xf32> to vector<384x64xbf16>
    %c384 = arith.constant 384 : index
    %c0_46 = arith.constant 0 : index
    %58 = vector.load %arg3[%c384, %c0_46] : memref<576x64xbf16, #tpu.memory_space<vmem>>, vector<64x64xbf16>
    %cst_47 = arith.constant dense<0.000000e+00> : vector<384x64xf32>
    %59 = tpu.matmul %57, %58, %cst_47 {dimension_numbers = #tpu.dot_dimension_numbers<[1], [0], [0], [1], [0, 0, 1, 1], [], []>} : vector<384x64xbf16>, vector<64x64xbf16>, vector<384x64xf32> -> vector<384x64xf32>
    %60 = arith.addf %55, %59 : vector<384x64xf32>
    %c56 = arith.constant 56 : index
    %c0_48 = arith.constant 0 : index
    %61 = vector.load %arg10[%c56, %c0_48] : memref<448x64xf32, #tpu.memory_space<vmem>>, vector<384x64xf32>
    %62 = arith.truncf %61 : vector<384x64xf32> to vector<384x64xbf16>
    %c448 = arith.constant 448 : index
    %c0_49 = arith.constant 0 : index
    %63 = vector.load %arg3[%c448, %c0_49] : memref<576x64xbf16, #tpu.memory_space<vmem>>, vector<64x64xbf16>
    %cst_50 = arith.constant dense<0.000000e+00> : vector<384x64xf32>
    %64 = tpu.matmul %62, %63, %cst_50 {dimension_numbers = #tpu.dot_dimension_numbers<[1], [0], [0], [1], [0, 0, 1, 1], [], []>} : vector<384x64xbf16>, vector<64x64xbf16>, vector<384x64xf32> -> vector<384x64xf32>
    %65 = arith.addf %60, %64 : vector<384x64xf32>
    %c57 = arith.constant 57 : index
    %c0_51 = arith.constant 0 : index
    %66 = vector.load %arg10[%c57, %c0_51] : memref<448x64xf32, #tpu.memory_space<vmem>>, vector<384x64xf32>
    %67 = arith.truncf %66 : vector<384x64xf32> to vector<384x64xbf16>
    %c512 = arith.constant 512 : index
    %c0_52 = arith.constant 0 : index
    %68 = vector.load %arg3[%c512, %c0_52] : memref<576x64xbf16, #tpu.memory_space<vmem>>, vector<64x64xbf16>
    %cst_53 = arith.constant dense<0.000000e+00> : vector<384x64xf32>
    %69 = tpu.matmul %67, %68, %cst_53 {dimension_numbers = #tpu.dot_dimension_numbers<[1], [0], [0], [1], [0, 0, 1, 1], [], []>} : vector<384x64xbf16>, vector<64x64xbf16>, vector<384x64xf32> -> vector<384x64xf32>
    %70 = arith.addf %65, %69 : vector<384x64xf32>
    %c0_54 = arith.constant 0 : index
    %c0_55 = arith.constant 0 : index
    %71 = vector.load %arg11[%c0_54, %c0_55] : memref<384x64xf32, #tpu.memory_space<vmem>>, vector<384x64xf32>
    tpu.vector_store %arg11[%c0_54, %c0_55], %70 {strides = array<i32>} : memref<384x64xf32, #tpu.memory_space<vmem>>, vector<384x64xf32>,
    %c0_56 = arith.constant 0 : index
    %c0_57 = arith.constant 0 : index
    %72 = tpu.strided_load %arg11[%c0_56, %c0_57] {strides = array<i32: 2, 1>} : memref<384x64xf32, #tpu.memory_space<vmem>>, vector<8x64xf32>
    %c1 = arith.constant 1 : index
    %c0_58 = arith.constant 0 : index
    %73 = tpu.strided_load %arg11[%c1, %c0_58] {strides = array<i32: 2, 1>} : memref<384x64xf32, #tpu.memory_space<vmem>>, vector<8x64xf32>
    %74 = arith.maximumf %72, %73 : vector<8x64xf32>
    %c24 = arith.constant 24 : index
    %c0_59 = arith.constant 0 : index
    %75 = tpu.strided_load %arg11[%c24, %c0_59] {strides = array<i32: 2, 1>} : memref<384x64xf32, #tpu.memory_space<vmem>>, vector<8x64xf32>
    %c25 = arith.constant 25 : index
    %c0_60 = arith.constant 0 : index
    %76 = tpu.strided_load %arg11[%c25, %c0_60] {strides = array<i32: 2, 1>} : memref<384x64xf32, #tpu.memory_space<vmem>>, vector<8x64xf32>
    %77 = arith.maximumf %75, %76 : vector<8x64xf32>
    %78 = arith.maximumf %74, %77 : vector<8x64xf32>
    %79 = vector.broadcast %0 : vector<1x64xf32> to vector<8x64xf32>
    %80 = arith.addf %78, %79 : vector<8x64xf32>
    %cst_61 = arith.constant 0.000000e+00 : f32
    %81 = vector.broadcast %cst_61 : f32 to vector<8x64xf32>
    %82 = arith.maximumf %80, %81 : vector<8x64xf32>
    %c24_62 = arith.constant 24 : index
    %c0_63 = arith.constant 0 : index
    %83 = vector.load %arg12[%c24_62, %c0_63] : memref<176x64xf32, #tpu.memory_space<vmem>>, vector<8x64xf32>
    tpu.vector_store %arg12[%c24_62, %c0_63], %82 {strides = array<i32>} : memref<176x64xf32, #tpu.memory_space<vmem>>, vector<8x64xf32>,
    %c48 = arith.constant 48 : index
    %c0_64 = arith.constant 0 : index
    %84 = tpu.strided_load %arg11[%c48, %c0_64] {strides = array<i32: 2, 1>} : memref<384x64xf32, #tpu.memory_space<vmem>>, vector<8x64xf32>
    %c49 = arith.constant 49 : index
    %c0_65 = arith.constant 0 : index
    %85 = tpu.strided_load %arg11[%c49, %c0_65] {strides = array<i32: 2, 1>} : memref<384x64xf32, #tpu.memory_space<vmem>>, vector<8x64xf32>
    %86 = arith.maximumf %84, %85 : vector<8x64xf32>
    %c72 = arith.constant 72 : index
    %c0_66 = arith.constant 0 : index
    %87 = tpu.strided_load %arg11[%c72, %c0_66] {strides = array<i32: 2, 1>} : memref<384x64xf32, #tpu.memory_space<vmem>>, vector<8x64xf32>
    %c73 = arith.constant 73 : index
    %c0_67 = arith.constant 0 : index
    %88 = tpu.strided_load %arg11[%c73, %c0_67] {strides = array<i32: 2, 1>} : memref<384x64xf32, #tpu.memory_space<vmem>>, vector<8x64xf32>
    %89 = arith.maximumf %87, %88 : vector<8x64xf32>
    %90 = arith.maximumf %86, %89 : vector<8x64xf32>
    %91 = vector.broadcast %0 : vector<1x64xf32> to vector<8x64xf32>
    %92 = arith.addf %90, %91 : vector<8x64xf32>
    %cst_68 = arith.constant 0.000000e+00 : f32
    %93 = vector.broadcast %cst_68 : f32 to vector<8x64xf32>
    %94 = arith.maximumf %92, %93 : vector<8x64xf32>
    %c40 = arith.constant 40 : index
    %c0_69 = arith.constant 0 : index
    %95 = vector.load %arg12[%c40, %c0_69] : memref<176x64xf32, #tpu.memory_space<vmem>>, vector<8x64xf32>
    tpu.vector_store %arg12[%c40, %c0_69], %94 {strides = array<i32>} : memref<176x64xf32, #tpu.memory_space<vmem>>, vector<8x64xf32>,
    %c96 = arith.constant 96 : index
    %c0_70 = arith.constant 0 : index
    %96 = tpu.strided_load %arg11[%c96, %c0_70] {strides = array<i32: 2, 1>} : memref<384x64xf32, #tpu.memory_space<vmem>>, vector<8x64xf32>
    %c97 = arith.constant 97 : index
    %c0_71 = arith.constant 0 : index
    %97 = tpu.strided_load %arg11[%c97, %c0_71] {strides = array<i32: 2, 1>} : memref<384x64xf32, #tpu.memory_space<vmem>>, vector<8x64xf32>
    %98 = arith.maximumf %96, %97 : vector<8x64xf32>
    %c120 = arith.constant 120 : index
    %c0_72 = arith.constant 0 : index
    %99 = tpu.strided_load %arg11[%c120, %c0_72] {strides = array<i32: 2, 1>} : memref<384x64xf32, #tpu.memory_space<vmem>>, vector<8x64xf32>
    %c121 = arith.constant 121 : index
    %c0_73 = arith.constant 0 : index
    %100 = tpu.strided_load %arg11[%c121, %c0_73] {strides = array<i32: 2, 1>} : memref<384x64xf32, #tpu.memory_space<vmem>>, vector<8x64xf32>
    %101 = arith.maximumf %99, %100 : vector<8x64xf32>
    %102 = arith.maximumf %98, %101 : vector<8x64xf32>
    %103 = vector.broadcast %0 : vector<1x64xf32> to vector<8x64xf32>
    %104 = arith.addf %102, %103 : vector<8x64xf32>
    %cst_74 = arith.constant 0.000000e+00 : f32
    %105 = vector.broadcast %cst_74 : f32 to vector<8x64xf32>
    %106 = arith.maximumf %104, %105 : vector<8x64xf32>
    %c56_75 = arith.constant 56 : index
    %c0_76 = arith.constant 0 : index
    %107 = vector.load %arg12[%c56_75, %c0_76] : memref<176x64xf32, #tpu.memory_space<vmem>>, vector<8x64xf32>
    tpu.vector_store %arg12[%c56_75, %c0_76], %106 {strides = array<i32>} : memref<176x64xf32, #tpu.memory_space<vmem>>, vector<8x64xf32>,
    %c144 = arith.constant 144 : index
    %c0_77 = arith.constant 0 : index
    %108 = tpu.strided_load %arg11[%c144, %c0_77] {strides = array<i32: 2, 1>} : memref<384x64xf32, #tpu.memory_space<vmem>>, vector<8x64xf32>
    %c145 = arith.constant 145 : index
    %c0_78 = arith.constant 0 : index
    %109 = tpu.strided_load %arg11[%c145, %c0_78] {strides = array<i32: 2, 1>} : memref<384x64xf32, #tpu.memory_space<vmem>>, vector<8x64xf32>
    %110 = arith.maximumf %108, %109 : vector<8x64xf32>
    %c168 = arith.constant 168 : index
    %c0_79 = arith.constant 0 : index
    %111 = tpu.strided_load %arg11[%c168, %c0_79] {strides = array<i32: 2, 1>} : memref<384x64xf32, #tpu.memory_space<vmem>>, vector<8x64xf32>
    %c169 = arith.constant 169 : index
    %c0_80 = arith.constant 0 : index
    %112 = tpu.strided_load %arg11[%c169, %c0_80] {strides = array<i32: 2, 1>} : memref<384x64xf32, #tpu.memory_space<vmem>>, vector<8x64xf32>
    %113 = arith.maximumf %111, %112 : vector<8x64xf32>
    %114 = arith.maximumf %110, %113 : vector<8x64xf32>
    %115 = vector.broadcast %0 : vector<1x64xf32> to vector<8x64xf32>
    %116 = arith.addf %114, %115 : vector<8x64xf32>
    %cst_81 = arith.constant 0.000000e+00 : f32
    %117 = vector.broadcast %cst_81 : f32 to vector<8x64xf32>
    %118 = arith.maximumf %116, %117 : vector<8x64xf32>
    %c72_82 = arith.constant 72 : index
    %c0_83 = arith.constant 0 : index
    %119 = vector.load %arg12[%c72_82, %c0_83] : memref<176x64xf32, #tpu.memory_space<vmem>>, vector<8x64xf32>
    tpu.vector_store %arg12[%c72_82, %c0_83], %118 {strides = array<i32>} : memref<176x64xf32, #tpu.memory_space<vmem>>, vector<8x64xf32>,
    %c192_84 = arith.constant 192 : index
    %c0_85 = arith.constant 0 : index
    %120 = tpu.strided_load %arg11[%c192_84, %c0_85] {strides = array<i32: 2, 1>} : memref<384x64xf32, #tpu.memory_space<vmem>>, vector<8x64xf32>
    %c193 = arith.constant 193 : index
    %c0_86 = arith.constant 0 : index
    %121 = tpu.strided_load %arg11[%c193, %c0_86] {strides = array<i32: 2, 1>} : memref<384x64xf32, #tpu.memory_space<vmem>>, vector<8x64xf32>
    %122 = arith.maximumf %120, %121 : vector<8x64xf32>
    %c216 = arith.constant 216 : index
    %c0_87 = arith.constant 0 : index
    %123 = tpu.strided_load %arg11[%c216, %c0_87] {strides = array<i32: 2, 1>} : memref<384x64xf32, #tpu.memory_space<vmem>>, vector<8x64xf32>
    %c217 = arith.constant 217 : index
    %c0_88 = arith.constant 0 : index
    %124 = tpu.strided_load %arg11[%c217, %c0_88] {strides = array<i32: 2, 1>} : memref<384x64xf32, #tpu.memory_space<vmem>>, vector<8x64xf32>
    %125 = arith.maximumf %123, %124 : vector<8x64xf32>
    %126 = arith.maximumf %122, %125 : vector<8x64xf32>
    %127 = vector.broadcast %0 : vector<1x64xf32> to vector<8x64xf32>
    %128 = arith.addf %126, %127 : vector<8x64xf32>
    %cst_89 = arith.constant 0.000000e+00 : f32
    %129 = vector.broadcast %cst_89 : f32 to vector<8x64xf32>
    %130 = arith.maximumf %128, %129 : vector<8x64xf32>
    %c88 = arith.constant 88 : index
    %c0_90 = arith.constant 0 : index
    %131 = vector.load %arg12[%c88, %c0_90] : memref<176x64xf32, #tpu.memory_space<vmem>>, vector<8x64xf32>
    tpu.vector_store %arg12[%c88, %c0_90], %130 {strides = array<i32>} : memref<176x64xf32, #tpu.memory_space<vmem>>, vector<8x64xf32>,
    %c240 = arith.constant 240 : index
    %c0_91 = arith.constant 0 : index
    %132 = tpu.strided_load %arg11[%c240, %c0_91] {strides = array<i32: 2, 1>} : memref<384x64xf32, #tpu.memory_space<vmem>>, vector<8x64xf32>
    %c241 = arith.constant 241 : index
    %c0_92 = arith.constant 0 : index
    %133 = tpu.strided_load %arg11[%c241, %c0_92] {strides = array<i32: 2, 1>} : memref<384x64xf32, #tpu.memory_space<vmem>>, vector<8x64xf32>
    %134 = arith.maximumf %132, %133 : vector<8x64xf32>
    %c264 = arith.constant 264 : index
    %c0_93 = arith.constant 0 : index
    %135 = tpu.strided_load %arg11[%c264, %c0_93] {strides = array<i32: 2, 1>} : memref<384x64xf32, #tpu.memory_space<vmem>>, vector<8x64xf32>
    %c265 = arith.constant 265 : index
    %c0_94 = arith.constant 0 : index
    %136 = tpu.strided_load %arg11[%c265, %c0_94] {strides = array<i32: 2, 1>} : memref<384x64xf32, #tpu.memory_space<vmem>>, vector<8x64xf32>
    %137 = arith.maximumf %135, %136 : vector<8x64xf32>
    %138 = arith.maximumf %134, %137 : vector<8x64xf32>
    %139 = vector.broadcast %0 : vector<1x64xf32> to vector<8x64xf32>
    %140 = arith.addf %138, %139 : vector<8x64xf32>
    %cst_95 = arith.constant 0.000000e+00 : f32
    %141 = vector.broadcast %cst_95 : f32 to vector<8x64xf32>
    %142 = arith.maximumf %140, %141 : vector<8x64xf32>
    %c104 = arith.constant 104 : index
    %c0_96 = arith.constant 0 : index
    %143 = vector.load %arg12[%c104, %c0_96] : memref<176x64xf32, #tpu.memory_space<vmem>>, vector<8x64xf32>
    tpu.vector_store %arg12[%c104, %c0_96], %142 {strides = array<i32>} : memref<176x64xf32, #tpu.memory_space<vmem>>, vector<8x64xf32>,
    %c288 = arith.constant 288 : index
    %c0_97 = arith.constant 0 : index
    %144 = tpu.strided_load %arg11[%c288, %c0_97] {strides = array<i32: 2, 1>} : memref<384x64xf32, #tpu.memory_space<vmem>>, vector<8x64xf32>
    %c289 = arith.constant 289 : index
    %c0_98 = arith.constant 0 : index
    %145 = tpu.strided_load %arg11[%c289, %c0_98] {strides = array<i32: 2, 1>} : memref<384x64xf32, #tpu.memory_space<vmem>>, vector<8x64xf32>
    %146 = arith.maximumf %144, %145 : vector<8x64xf32>
    %c312 = arith.constant 312 : index
    %c0_99 = arith.constant 0 : index
    %147 = tpu.strided_load %arg11[%c312, %c0_99] {strides = array<i32: 2, 1>} : memref<384x64xf32, #tpu.memory_space<vmem>>, vector<8x64xf32>
    %c313 = arith.constant 313 : index
    %c0_100 = arith.constant 0 : index
    %148 = tpu.strided_load %arg11[%c313, %c0_100] {strides = array<i32: 2, 1>} : memref<384x64xf32, #tpu.memory_space<vmem>>, vector<8x64xf32>
    %149 = arith.maximumf %147, %148 : vector<8x64xf32>
    %150 = arith.maximumf %146, %149 : vector<8x64xf32>
    %151 = vector.broadcast %0 : vector<1x64xf32> to vector<8x64xf32>
    %152 = arith.addf %150, %151 : vector<8x64xf32>
    %cst_101 = arith.constant 0.000000e+00 : f32
    %153 = vector.broadcast %cst_101 : f32 to vector<8x64xf32>
    %154 = arith.maximumf %152, %153 : vector<8x64xf32>
    %c120_102 = arith.constant 120 : index
    %c0_103 = arith.constant 0 : index
    %155 = vector.load %arg12[%c120_102, %c0_103] : memref<176x64xf32, #tpu.memory_space<vmem>>, vector<8x64xf32>
    tpu.vector_store %arg12[%c120_102, %c0_103], %154 {strides = array<i32>} : memref<176x64xf32, #tpu.memory_space<vmem>>, vector<8x64xf32>,
    %c336 = arith.constant 336 : index
    %c0_104 = arith.constant 0 : index
    %156 = tpu.strided_load %arg11[%c336, %c0_104] {strides = array<i32: 2, 1>} : memref<384x64xf32, #tpu.memory_space<vmem>>, vector<8x64xf32>
    %c337 = arith.constant 337 : index
    %c0_105 = arith.constant 0 : index
    %157 = tpu.strided_load %arg11[%c337, %c0_105] {strides = array<i32: 2, 1>} : memref<384x64xf32, #tpu.memory_space<vmem>>, vector<8x64xf32>
    %158 = arith.maximumf %156, %157 : vector<8x64xf32>
    %c360 = arith.constant 360 : index
    %c0_106 = arith.constant 0 : index
    %159 = tpu.strided_load %arg11[%c360, %c0_106] {strides = array<i32: 2, 1>} : memref<384x64xf32, #tpu.memory_space<vmem>>, vector<8x64xf32>
    %c361 = arith.constant 361 : index
    %c0_107 = arith.constant 0 : index
    %160 = tpu.strided_load %arg11[%c361, %c0_107] {strides = array<i32: 2, 1>} : memref<384x64xf32, #tpu.memory_space<vmem>>, vector<8x64xf32>
    %161 = arith.maximumf %159, %160 : vector<8x64xf32>
    %162 = arith.maximumf %158, %161 : vector<8x64xf32>
    %163 = vector.broadcast %0 : vector<1x64xf32> to vector<8x64xf32>
    %164 = arith.addf %162, %163 : vector<8x64xf32>
    %cst_108 = arith.constant 0.000000e+00 : f32
    %165 = vector.broadcast %cst_108 : f32 to vector<8x64xf32>
    %166 = arith.maximumf %164, %165 : vector<8x64xf32>
    %c136 = arith.constant 136 : index
    %c0_109 = arith.constant 0 : index
    %167 = vector.load %arg12[%c136, %c0_109] : memref<176x64xf32, #tpu.memory_space<vmem>>, vector<8x64xf32>
    tpu.vector_store %arg12[%c136, %c0_109], %166 {strides = array<i32>} : memref<176x64xf32, #tpu.memory_space<vmem>>, vector<8x64xf32>,
    %c7_110 = arith.constant 7 : index
    %c0_111 = arith.constant 0 : index
    %168 = vector.load %arg12[%c7_110, %c0_111] : memref<176x64xf32, #tpu.memory_space<vmem>>, vector<128x64xf32>
    %169 = arith.truncf %168 : vector<128x64xf32> to vector<128x64xbf16>
    %c0_112 = arith.constant 0 : index
    %c0_113 = arith.constant 0 : index
    %170 = vector.load %arg5[%c0_112, %c0_113] : memref<576x128xbf16, #tpu.memory_space<vmem>>, vector<64x128xbf16>
    %cst_114 = arith.constant dense<0.000000e+00> : vector<128x128xf32>
    %171 = tpu.matmul %169, %170, %cst_114 {dimension_numbers = #tpu.dot_dimension_numbers<[1], [0], [0], [1], [0, 0, 1, 1], [], []>} : vector<128x64xbf16>, vector<64x128xbf16>, vector<128x128xf32> -> vector<128x128xf32>
    %c8_115 = arith.constant 8 : index
    %c0_116 = arith.constant 0 : index
    %172 = vector.load %arg12[%c8_115, %c0_116] : memref<176x64xf32, #tpu.memory_space<vmem>>, vector<128x64xf32>
    %173 = arith.truncf %172 : vector<128x64xf32> to vector<128x64xbf16>
    %c64_117 = arith.constant 64 : index
    %c0_118 = arith.constant 0 : index
    %174 = vector.load %arg5[%c64_117, %c0_118] : memref<576x128xbf16, #tpu.memory_space<vmem>>, vector<64x128xbf16>
    %cst_119 = arith.constant dense<0.000000e+00> : vector<128x128xf32>
    %175 = tpu.matmul %173, %174, %cst_119 {dimension_numbers = #tpu.dot_dimension_numbers<[1], [0], [0], [1], [0, 0, 1, 1], [], []>} : vector<128x64xbf16>, vector<64x128xbf16>, vector<128x128xf32> -> vector<128x128xf32>
    %176 = arith.addf %171, %175 : vector<128x128xf32>
    %c9_120 = arith.constant 9 : index
    %c0_121 = arith.constant 0 : index
    %177 = vector.load %arg12[%c9_120, %c0_121] : memref<176x64xf32, #tpu.memory_space<vmem>>, vector<128x64xf32>
    %178 = arith.truncf %177 : vector<128x64xf32> to vector<128x64xbf16>
    %c128_122 = arith.constant 128 : index
    %c0_123 = arith.constant 0 : index
    %179 = vector.load %arg5[%c128_122, %c0_123] : memref<576x128xbf16, #tpu.memory_space<vmem>>, vector<64x128xbf16>
    %cst_124 = arith.constant dense<0.000000e+00> : vector<128x128xf32>
    %180 = tpu.matmul %178, %179, %cst_124 {dimension_numbers = #tpu.dot_dimension_numbers<[1], [0], [0], [1], [0, 0, 1, 1], [], []>} : vector<128x64xbf16>, vector<64x128xbf16>, vector<128x128xf32> -> vector<128x128xf32>
    %181 = arith.addf %176, %180 : vector<128x128xf32>
    %c23 = arith.constant 23 : index
    %c0_125 = arith.constant 0 : index
    %182 = vector.load %arg12[%c23, %c0_125] : memref<176x64xf32, #tpu.memory_space<vmem>>, vector<128x64xf32>
    %183 = arith.truncf %182 : vector<128x64xf32> to vector<128x64xbf16>
    %c192_126 = arith.constant 192 : index
    %c0_127 = arith.constant 0 : index
    %184 = vector.load %arg5[%c192_126, %c0_127] : memref<576x128xbf16, #tpu.memory_space<vmem>>, vector<64x128xbf16>
    %cst_128 = arith.constant dense<0.000000e+00> : vector<128x128xf32>
    %185 = tpu.matmul %183, %184, %cst_128 {dimension_numbers = #tpu.dot_dimension_numbers<[1], [0], [0], [1], [0, 0, 1, 1], [], []>} : vector<128x64xbf16>, vector<64x128xbf16>, vector<128x128xf32> -> vector<128x128xf32>
    %186 = arith.addf %181, %185 : vector<128x128xf32>
    %c24_129 = arith.constant 24 : index
    %c0_130 = arith.constant 0 : index
    %187 = vector.load %arg12[%c24_129, %c0_130] : memref<176x64xf32, #tpu.memory_space<vmem>>, vector<128x64xf32>
    %188 = arith.truncf %187 : vector<128x64xf32> to vector<128x64xbf16>
    %c256_131 = arith.constant 256 : index
    %c0_132 = arith.constant 0 : index
    %189 = vector.load %arg5[%c256_131, %c0_132] : memref<576x128xbf16, #tpu.memory_space<vmem>>, vector<64x128xbf16>
    %cst_133 = arith.constant dense<0.000000e+00> : vector<128x128xf32>
    %190 = tpu.matmul %188, %189, %cst_133 {dimension_numbers = #tpu.dot_dimension_numbers<[1], [0], [0], [1], [0, 0, 1, 1], [], []>} : vector<128x64xbf16>, vector<64x128xbf16>, vector<128x128xf32> -> vector<128x128xf32>
    %191 = arith.addf %186, %190 : vector<128x128xf32>
    %c25_134 = arith.constant 25 : index
    %c0_135 = arith.constant 0 : index
    %192 = vector.load %arg12[%c25_134, %c0_135] : memref<176x64xf32, #tpu.memory_space<vmem>>, vector<128x64xf32>
    %193 = arith.truncf %192 : vector<128x64xf32> to vector<128x64xbf16>
    %c320_136 = arith.constant 320 : index
    %c0_137 = arith.constant 0 : index
    %194 = vector.load %arg5[%c320_136, %c0_137] : memref<576x128xbf16, #tpu.memory_space<vmem>>, vector<64x128xbf16>
    %cst_138 = arith.constant dense<0.000000e+00> : vector<128x128xf32>
    %195 = tpu.matmul %193, %194, %cst_138 {dimension_numbers = #tpu.dot_dimension_numbers<[1], [0], [0], [1], [0, 0, 1, 1], [], []>} : vector<128x64xbf16>, vector<64x128xbf16>, vector<128x128xf32> -> vector<128x128xf32>
    %196 = arith.addf %191, %195 : vector<128x128xf32>
    %c39 = arith.constant 39 : index
    %c0_139 = arith.constant 0 : index
    %197 = vector.load %arg12[%c39, %c0_139] : memref<176x64xf32, #tpu.memory_space<vmem>>, vector<128x64xf32>
    %198 = arith.truncf %197 : vector<128x64xf32> to vector<128x64xbf16>
    %c384_140 = arith.constant 384 : index
    %c0_141 = arith.constant 0 : index
    %199 = vector.load %arg5[%c384_140, %c0_141] : memref<576x128xbf16, #tpu.memory_space<vmem>>, vector<64x128xbf16>
    %cst_142 = arith.constant dense<0.000000e+00> : vector<128x128xf32>
    %200 = tpu.matmul %198, %199, %cst_142 {dimension_numbers = #tpu.dot_dimension_numbers<[1], [0], [0], [1], [0, 0, 1, 1], [], []>} : vector<128x64xbf16>, vector<64x128xbf16>, vector<128x128xf32> -> vector<128x128xf32>
    %201 = arith.addf %196, %200 : vector<128x128xf32>
    %c40_143 = arith.constant 40 : index
    %c0_144 = arith.constant 0 : index
    %202 = vector.load %arg12[%c40_143, %c0_144] : memref<176x64xf32, #tpu.memory_space<vmem>>, vector<128x64xf32>
    %203 = arith.truncf %202 : vector<128x64xf32> to vector<128x64xbf16>
    %c448_145 = arith.constant 448 : index
    %c0_146 = arith.constant 0 : index
    %204 = vector.load %arg5[%c448_145, %c0_146] : memref<576x128xbf16, #tpu.memory_space<vmem>>, vector<64x128xbf16>
    %cst_147 = arith.constant dense<0.000000e+00> : vector<128x128xf32>
    %205 = tpu.matmul %203, %204, %cst_147 {dimension_numbers = #tpu.dot_dimension_numbers<[1], [0], [0], [1], [0, 0, 1, 1], [], []>} : vector<128x64xbf16>, vector<64x128xbf16>, vector<128x128xf32> -> vector<128x128xf32>
    %206 = arith.addf %201, %205 : vector<128x128xf32>
    %c41 = arith.constant 41 : index
    %c0_148 = arith.constant 0 : index
    %207 = vector.load %arg12[%c41, %c0_148] : memref<176x64xf32, #tpu.memory_space<vmem>>, vector<128x64xf32>
    %208 = arith.truncf %207 : vector<128x64xf32> to vector<128x64xbf16>
    %c512_149 = arith.constant 512 : index
    %c0_150 = arith.constant 0 : index
    %209 = vector.load %arg5[%c512_149, %c0_150] : memref<576x128xbf16, #tpu.memory_space<vmem>>, vector<64x128xbf16>
    %cst_151 = arith.constant dense<0.000000e+00> : vector<128x128xf32>
    %210 = tpu.matmul %208, %209, %cst_151 {dimension_numbers = #tpu.dot_dimension_numbers<[1], [0], [0], [1], [0, 0, 1, 1], [], []>} : vector<128x64xbf16>, vector<64x128xbf16>, vector<128x128xf32> -> vector<128x128xf32>
    %211 = arith.addf %206, %210 : vector<128x128xf32>
    %212 = vector.broadcast %1 : vector<1x128xf32> to vector<128x128xf32>
    %213 = arith.addf %211, %212 : vector<128x128xf32>
    %cst_152 = arith.constant 0.000000e+00 : f32
    %214 = vector.broadcast %cst_152 : f32 to vector<128x128xf32>
    %215 = arith.maximumf %213, %214 : vector<128x128xf32>
    %216 = vector.broadcast %9 : vector<128x1xf32> to vector<128x128xf32>
    %217 = arith.mulf %215, %216 : vector<128x128xf32>
    %c24_153 = arith.constant 24 : index
    %c0_154 = arith.constant 0 : index
    %218 = vector.load %arg13[%c24_153, %c0_154] : memref<176x128xf32, #tpu.memory_space<vmem>>, vector<128x128xf32>
    tpu.vector_store %arg13[%c24_153, %c0_154], %217 {strides = array<i32>} : memref<176x128xf32, #tpu.memory_space<vmem>>, vector<128x128xf32>,
    %c7_155 = arith.constant 7 : index
    %c0_156 = arith.constant 0 : index
    %219 = vector.load %arg13[%c7_155, %c0_156] : memref<176x128xf32, #tpu.memory_space<vmem>>, vector<128x128xf32>
    %220 = arith.truncf %219 : vector<128x128xf32> to vector<128x128xbf16>
    %c0_157 = arith.constant 0 : index
    %c0_158 = arith.constant 0 : index
    %221 = vector.load %arg7[%c0_157, %c0_158] : memref<1152x128xbf16, #tpu.memory_space<vmem>>, vector<128x128xbf16>
    %cst_159 = arith.constant dense<0.000000e+00> : vector<128x128xf32>
    %222 = tpu.matmul %220, %221, %cst_159 {dimension_numbers = #tpu.dot_dimension_numbers<[1], [0], [0], [1], [0, 0, 1, 1], [], []>} : vector<128x128xbf16>, vector<128x128xbf16>, vector<128x128xf32> -> vector<128x128xf32>
    %c8_160 = arith.constant 8 : index
    %c0_161 = arith.constant 0 : index
    %223 = vector.load %arg13[%c8_160, %c0_161] : memref<176x128xf32, #tpu.memory_space<vmem>>, vector<128x128xf32>
    %224 = arith.truncf %223 : vector<128x128xf32> to vector<128x128xbf16>
    %c128_162 = arith.constant 128 : index
    %c0_163 = arith.constant 0 : index
    %225 = vector.load %arg7[%c128_162, %c0_163] : memref<1152x128xbf16, #tpu.memory_space<vmem>>, vector<128x128xbf16>
    %cst_164 = arith.constant dense<0.000000e+00> : vector<128x128xf32>
    %226 = tpu.matmul %224, %225, %cst_164 {dimension_numbers = #tpu.dot_dimension_numbers<[1], [0], [0], [1], [0, 0, 1, 1], [], []>} : vector<128x128xbf16>, vector<128x128xbf16>, vector<128x128xf32> -> vector<128x128xf32>
    %227 = arith.addf %222, %226 : vector<128x128xf32>
    %c9_165 = arith.constant 9 : index
    %c0_166 = arith.constant 0 : index
    %228 = vector.load %arg13[%c9_165, %c0_166] : memref<176x128xf32, #tpu.memory_space<vmem>>, vector<128x128xf32>
    %229 = arith.truncf %228 : vector<128x128xf32> to vector<128x128xbf16>
    %c256_167 = arith.constant 256 : index
    %c0_168 = arith.constant 0 : index
    %230 = vector.load %arg7[%c256_167, %c0_168] : memref<1152x128xbf16, #tpu.memory_space<vmem>>, vector<128x128xbf16>
    %cst_169 = arith.constant dense<0.000000e+00> : vector<128x128xf32>
    %231 = tpu.matmul %229, %230, %cst_169 {dimension_numbers = #tpu.dot_dimension_numbers<[1], [0], [0], [1], [0, 0, 1, 1], [], []>} : vector<128x128xbf16>, vector<128x128xbf16>, vector<128x128xf32> -> vector<128x128xf32>
    %232 = arith.addf %227, %231 : vector<128x128xf32>
    %c23_170 = arith.constant 23 : index
    %c0_171 = arith.constant 0 : index
    %233 = vector.load %arg13[%c23_170, %c0_171] : memref<176x128xf32, #tpu.memory_space<vmem>>, vector<128x128xf32>
    %234 = arith.truncf %233 : vector<128x128xf32> to vector<128x128xbf16>
    %c384_172 = arith.constant 384 : index
    %c0_173 = arith.constant 0 : index
    %235 = vector.load %arg7[%c384_172, %c0_173] : memref<1152x128xbf16, #tpu.memory_space<vmem>>, vector<128x128xbf16>
    %cst_174 = arith.constant dense<0.000000e+00> : vector<128x128xf32>
    %236 = tpu.matmul %234, %235, %cst_174 {dimension_numbers = #tpu.dot_dimension_numbers<[1], [0], [0], [1], [0, 0, 1, 1], [], []>} : vector<128x128xbf16>, vector<128x128xbf16>, vector<128x128xf32> -> vector<128x128xf32>
    %237 = arith.addf %232, %236 : vector<128x128xf32>
    %c24_175 = arith.constant 24 : index
    %c0_176 = arith.constant 0 : index
    %238 = vector.load %arg13[%c24_175, %c0_176] : memref<176x128xf32, #tpu.memory_space<vmem>>, vector<128x128xf32>
    %239 = arith.truncf %238 : vector<128x128xf32> to vector<128x128xbf16>
    %c512_177 = arith.constant 512 : index
    %c0_178 = arith.constant 0 : index
    %240 = vector.load %arg7[%c512_177, %c0_178] : memref<1152x128xbf16, #tpu.memory_space<vmem>>, vector<128x128xbf16>
    %cst_179 = arith.constant dense<0.000000e+00> : vector<128x128xf32>
    %241 = tpu.matmul %239, %240, %cst_179 {dimension_numbers = #tpu.dot_dimension_numbers<[1], [0], [0], [1], [0, 0, 1, 1], [], []>} : vector<128x128xbf16>, vector<128x128xbf16>, vector<128x128xf32> -> vector<128x128xf32>
    %242 = arith.addf %237, %241 : vector<128x128xf32>
    %c25_180 = arith.constant 25 : index
    %c0_181 = arith.constant 0 : index
    %243 = vector.load %arg13[%c25_180, %c0_181] : memref<176x128xf32, #tpu.memory_space<vmem>>, vector<128x128xf32>
    %244 = arith.truncf %243 : vector<128x128xf32> to vector<128x128xbf16>
    %c640 = arith.constant 640 : index
    %c0_182 = arith.constant 0 : index
    %245 = vector.load %arg7[%c640, %c0_182] : memref<1152x128xbf16, #tpu.memory_space<vmem>>, vector<128x128xbf16>
    %cst_183 = arith.constant dense<0.000000e+00> : vector<128x128xf32>
    %246 = tpu.matmul %244, %245, %cst_183 {dimension_numbers = #tpu.dot_dimension_numbers<[1], [0], [0], [1], [0, 0, 1, 1], [], []>} : vector<128x128xbf16>, vector<128x128xbf16>, vector<128x128xf32> -> vector<128x128xf32>
    %247 = arith.addf %242, %246 : vector<128x128xf32>
    %c39_184 = arith.constant 39 : index
    %c0_185 = arith.constant 0 : index
    %248 = vector.load %arg13[%c39_184, %c0_185] : memref<176x128xf32, #tpu.memory_space<vmem>>, vector<128x128xf32>
    %249 = arith.truncf %248 : vector<128x128xf32> to vector<128x128xbf16>
    %c768 = arith.constant 768 : index
    %c0_186 = arith.constant 0 : index
    %250 = vector.load %arg7[%c768, %c0_186] : memref<1152x128xbf16, #tpu.memory_space<vmem>>, vector<128x128xbf16>
    %cst_187 = arith.constant dense<0.000000e+00> : vector<128x128xf32>
    %251 = tpu.matmul %249, %250, %cst_187 {dimension_numbers = #tpu.dot_dimension_numbers<[1], [0], [0], [1], [0, 0, 1, 1], [], []>} : vector<128x128xbf16>, vector<128x128xbf16>, vector<128x128xf32> -> vector<128x128xf32>
    %252 = arith.addf %247, %251 : vector<128x128xf32>
    %c40_188 = arith.constant 40 : index
    %c0_189 = arith.constant 0 : index
    %253 = vector.load %arg13[%c40_188, %c0_189] : memref<176x128xf32, #tpu.memory_space<vmem>>, vector<128x128xf32>
    %254 = arith.truncf %253 : vector<128x128xf32> to vector<128x128xbf16>
    %c896 = arith.constant 896 : index
    %c0_190 = arith.constant 0 : index
    %255 = vector.load %arg7[%c896, %c0_190] : memref<1152x128xbf16, #tpu.memory_space<vmem>>, vector<128x128xbf16>
    %cst_191 = arith.constant dense<0.000000e+00> : vector<128x128xf32>
    %256 = tpu.matmul %254, %255, %cst_191 {dimension_numbers = #tpu.dot_dimension_numbers<[1], [0], [0], [1], [0, 0, 1, 1], [], []>} : vector<128x128xbf16>, vector<128x128xbf16>, vector<128x128xf32> -> vector<128x128xf32>
    %257 = arith.addf %252, %256 : vector<128x128xf32>
    %c41_192 = arith.constant 41 : index
    %c0_193 = arith.constant 0 : index
    %258 = vector.load %arg13[%c41_192, %c0_193] : memref<176x128xf32, #tpu.memory_space<vmem>>, vector<128x128xf32>
    %259 = arith.truncf %258 : vector<128x128xf32> to vector<128x128xbf16>
    %c1024 = arith.constant 1024 : index
    %c0_194 = arith.constant 0 : index
    %260 = vector.load %arg7[%c1024, %c0_194] : memref<1152x128xbf16, #tpu.memory_space<vmem>>, vector<128x128xbf16>
    %cst_195 = arith.constant dense<0.000000e+00> : vector<128x128xf32>
    %261 = tpu.matmul %259, %260, %cst_195 {dimension_numbers = #tpu.dot_dimension_numbers<[1], [0], [0], [1], [0, 0, 1, 1], [], []>} : vector<128x128xbf16>, vector<128x128xbf16>, vector<128x128xf32> -> vector<128x128xf32>
    %262 = arith.addf %257, %261 : vector<128x128xf32>
    %c0_196 = arith.constant 0 : index
    %c0_197 = arith.constant 0 : index
    %263 = vector.load %arg14[%c0_196, %c0_197] : memref<128x128xf32, #tpu.memory_space<vmem>>, vector<128x128xf32>
    tpu.vector_store %arg14[%c0_196, %c0_197], %262 {strides = array<i32>} : memref<128x128xf32, #tpu.memory_space<vmem>>, vector<128x128xf32>,
    %c0_198 = arith.constant 0 : index
    %c0_199 = arith.constant 0 : index
    %264 = tpu.strided_load %arg14[%c0_198, %c0_199] {strides = array<i32: 2, 1>} : memref<128x128xf32, #tpu.memory_space<vmem>>, vector<4x128xf32>
    %c1_200 = arith.constant 1 : index
    %c0_201 = arith.constant 0 : index
    %265 = tpu.strided_load %arg14[%c1_200, %c0_201] {strides = array<i32: 2, 1>} : memref<128x128xf32, #tpu.memory_space<vmem>>, vector<4x128xf32>
    %266 = arith.maximumf %264, %265 : vector<4x128xf32>
    %c16 = arith.constant 16 : index
    %c0_202 = arith.constant 0 : index
    %267 = tpu.strided_load %arg14[%c16, %c0_202] {strides = array<i32: 2, 1>} : memref<128x128xf32, #tpu.memory_space<vmem>>, vector<4x128xf32>
    %c17 = arith.constant 17 : index
    %c0_203 = arith.constant 0 : index
    %268 = tpu.strided_load %arg14[%c17, %c0_203] {strides = array<i32: 2, 1>} : memref<128x128xf32, #tpu.memory_space<vmem>>, vector<4x128xf32>
    %269 = arith.maximumf %267, %268 : vector<4x128xf32>
    %270 = arith.maximumf %266, %269 : vector<4x128xf32>
    %271 = vector.broadcast %2 : vector<1x128xf32> to vector<4x128xf32>
    %272 = arith.addf %270, %271 : vector<4x128xf32>
    %cst_204 = arith.constant 0.000000e+00 : f32
    %273 = vector.broadcast %cst_204 : f32 to vector<4x128xf32>
    %274 = arith.maximumf %272, %273 : vector<4x128xf32>
    %c0_205 = arith.constant 0 : index
    %c0_206 = arith.constant 0 : index
    %c0_207 = arith.constant 0 : index
    %275 = vector.load %arg9[%c0_205, %c0_206, %c0_207] : memref<1x16x128xf32, #tpu.memory_space<vmem>>, vector<1x4x128xf32>
    %276 = vector.shape_cast %275 : vector<1x4x128xf32> to vector<4x128xf32>
    %277 = vector.shape_cast %274 : vector<4x128xf32> to vector<1x4x128xf32>
    tpu.vector_store %arg9[%c0_205, %c0_206, %c0_207], %277 {strides = array<i32>} : memref<1x16x128xf32, #tpu.memory_space<vmem>>, vector<1x4x128xf32>,
    %c32_208 = arith.constant 32 : index
    %c0_209 = arith.constant 0 : index
    %278 = tpu.strided_load %arg14[%c32_208, %c0_209] {strides = array<i32: 2, 1>} : memref<128x128xf32, #tpu.memory_space<vmem>>, vector<4x128xf32>
    %c33_210 = arith.constant 33 : index
    %c0_211 = arith.constant 0 : index
    %279 = tpu.strided_load %arg14[%c33_210, %c0_211] {strides = array<i32: 2, 1>} : memref<128x128xf32, #tpu.memory_space<vmem>>, vector<4x128xf32>
    %280 = arith.maximumf %278, %279 : vector<4x128xf32>
    %c48_212 = arith.constant 48 : index
    %c0_213 = arith.constant 0 : index
    %281 = tpu.strided_load %arg14[%c48_212, %c0_213] {strides = array<i32: 2, 1>} : memref<128x128xf32, #tpu.memory_space<vmem>>, vector<4x128xf32>
    %c49_214 = arith.constant 49 : index
    %c0_215 = arith.constant 0 : index
    %282 = tpu.strided_load %arg14[%c49_214, %c0_215] {strides = array<i32: 2, 1>} : memref<128x128xf32, #tpu.memory_space<vmem>>, vector<4x128xf32>
    %283 = arith.maximumf %281, %282 : vector<4x128xf32>
    %284 = arith.maximumf %280, %283 : vector<4x128xf32>
    %285 = vector.broadcast %2 : vector<1x128xf32> to vector<4x128xf32>
    %286 = arith.addf %284, %285 : vector<4x128xf32>
    %cst_216 = arith.constant 0.000000e+00 : f32
    %287 = vector.broadcast %cst_216 : f32 to vector<4x128xf32>
    %288 = arith.maximumf %286, %287 : vector<4x128xf32>
    %c0_217 = arith.constant 0 : index
    %c4 = arith.constant 4 : index
    %c0_218 = arith.constant 0 : index
    %289 = vector.load %arg9[%c0_217, %c4, %c0_218] : memref<1x16x128xf32, #tpu.memory_space<vmem>>, vector<1x4x128xf32>
    %290 = vector.shape_cast %289 : vector<1x4x128xf32> to vector<4x128xf32>
    %291 = vector.shape_cast %288 : vector<4x128xf32> to vector<1x4x128xf32>
    tpu.vector_store %arg9[%c0_217, %c4, %c0_218], %291 {strides = array<i32>} : memref<1x16x128xf32, #tpu.memory_space<vmem>>, vector<1x4x128xf32>,
    %c64_219 = arith.constant 64 : index
    %c0_220 = arith.constant 0 : index
    %292 = tpu.strided_load %arg14[%c64_219, %c0_220] {strides = array<i32: 2, 1>} : memref<128x128xf32, #tpu.memory_space<vmem>>, vector<4x128xf32>
    %c65 = arith.constant 65 : index
    %c0_221 = arith.constant 0 : index
    %293 = tpu.strided_load %arg14[%c65, %c0_221] {strides = array<i32: 2, 1>} : memref<128x128xf32, #tpu.memory_space<vmem>>, vector<4x128xf32>
    %294 = arith.maximumf %292, %293 : vector<4x128xf32>
    %c80 = arith.constant 80 : index
    %c0_222 = arith.constant 0 : index
    %295 = tpu.strided_load %arg14[%c80, %c0_222] {strides = array<i32: 2, 1>} : memref<128x128xf32, #tpu.memory_space<vmem>>, vector<4x128xf32>
    %c81 = arith.constant 81 : index
    %c0_223 = arith.constant 0 : index
    %296 = tpu.strided_load %arg14[%c81, %c0_223] {strides = array<i32: 2, 1>} : memref<128x128xf32, #tpu.memory_space<vmem>>, vector<4x128xf32>
    %297 = arith.maximumf %295, %296 : vector<4x128xf32>
    %298 = arith.maximumf %294, %297 : vector<4x128xf32>
    %299 = vector.broadcast %2 : vector<1x128xf32> to vector<4x128xf32>
    %300 = arith.addf %298, %299 : vector<4x128xf32>
    %cst_224 = arith.constant 0.000000e+00 : f32
    %301 = vector.broadcast %cst_224 : f32 to vector<4x128xf32>
    %302 = arith.maximumf %300, %301 : vector<4x128xf32>
    %c0_225 = arith.constant 0 : index
    %c8_226 = arith.constant 8 : index
    %c0_227 = arith.constant 0 : index
    %303 = vector.load %arg9[%c0_225, %c8_226, %c0_227] : memref<1x16x128xf32, #tpu.memory_space<vmem>>, vector<1x4x128xf32>
    %304 = vector.shape_cast %303 : vector<1x4x128xf32> to vector<4x128xf32>
    %305 = vector.shape_cast %302 : vector<4x128xf32> to vector<1x4x128xf32>
    tpu.vector_store %arg9[%c0_225, %c8_226, %c0_227], %305 {strides = array<i32>} : memref<1x16x128xf32, #tpu.memory_space<vmem>>, vector<1x4x128xf32>,
    %c96_228 = arith.constant 96 : index
    %c0_229 = arith.constant 0 : index
    %306 = tpu.strided_load %arg14[%c96_228, %c0_229] {strides = array<i32: 2, 1>} : memref<128x128xf32, #tpu.memory_space<vmem>>, vector<4x128xf32>
    %c97_230 = arith.constant 97 : index
    %c0_231 = arith.constant 0 : index
    %307 = tpu.strided_load %arg14[%c97_230, %c0_231] {strides = array<i32: 2, 1>} : memref<128x128xf32, #tpu.memory_space<vmem>>, vector<4x128xf32>
    %308 = arith.maximumf %306, %307 : vector<4x128xf32>
    %c112 = arith.constant 112 : index
    %c0_232 = arith.constant 0 : index
    %309 = tpu.strided_load %arg14[%c112, %c0_232] {strides = array<i32: 2, 1>} : memref<128x128xf32, #tpu.memory_space<vmem>>, vector<4x128xf32>
    %c113 = arith.constant 113 : index
    %c0_233 = arith.constant 0 : index
    %310 = tpu.strided_load %arg14[%c113, %c0_233] {strides = array<i32: 2, 1>} : memref<128x128xf32, #tpu.memory_space<vmem>>, vector<4x128xf32>
    %311 = arith.maximumf %309, %310 : vector<4x128xf32>
    %312 = arith.maximumf %308, %311 : vector<4x128xf32>
    %313 = vector.broadcast %2 : vector<1x128xf32> to vector<4x128xf32>
    %314 = arith.addf %312, %313 : vector<4x128xf32>
    %cst_234 = arith.constant 0.000000e+00 : f32
    %315 = vector.broadcast %cst_234 : f32 to vector<4x128xf32>
    %316 = arith.maximumf %314, %315 : vector<4x128xf32>
    %c0_235 = arith.constant 0 : index
    %c12 = arith.constant 12 : index
    %c0_236 = arith.constant 0 : index
    %317 = vector.load %arg9[%c0_235, %c12, %c0_236] : memref<1x16x128xf32, #tpu.memory_space<vmem>>, vector<1x4x128xf32>
    %318 = vector.shape_cast %317 : vector<1x4x128xf32> to vector<4x128xf32>
    %319 = vector.shape_cast %316 : vector<4x128xf32> to vector<1x4x128xf32>
    tpu.vector_store %arg9[%c0_235, %c12, %c0_236], %319 {strides = array<i32>} : memref<1x16x128xf32, #tpu.memory_space<vmem>>, vector<1x4x128xf32>,
    return
  }
  func.func @transform_0(%arg0: i32) -> (i32, i32, i32) {
    %c0_i32 = arith.constant 0 : i32
    %c0_i32_0 = arith.constant 0 : i32
    %c0_i32_1 = arith.constant 0 : i32
    return %arg0, %c0_i32, %c0_i32_0 : i32, i32, i32
  }
  func.func @transform_1(%arg0: i32) -> (i32, i32) {
    %c0_i32 = arith.constant 0 : i32
    %c0_i32_0 = arith.constant 0 : i32
    %c0_i32_1 = arith.constant 0 : i32
    return %c0_i32, %c0_i32_0 : i32, i32
  }
  func.func @transform_2(%arg0: i32) -> (i32, i32) {
    %c0_i32 = arith.constant 0 : i32
    %c0_i32_0 = arith.constant 0 : i32
    %c0_i32_1 = arith.constant 0 : i32
    return %c0_i32, %c0_i32_0 : i32, i32
  }
  func.func @transform_3(%arg0: i32) -> (i32, i32) {
    %c0_i32 = arith.constant 0 : i32
    %c0_i32_0 = arith.constant 0 : i32
    %c0_i32_1 = arith.constant 0 : i32
    return %c0_i32, %c0_i32_0 : i32, i32
  }
  func.func @transform_4(%arg0: i32) -> (i32, i32) {
    %c0_i32 = arith.constant 0 : i32
    %c0_i32_0 = arith.constant 0 : i32
    %c0_i32_1 = arith.constant 0 : i32
    return %c0_i32, %c0_i32_0 : i32, i32
  }
  func.func @transform_5(%arg0: i32) -> (i32, i32) {
    %c0_i32 = arith.constant 0 : i32
    %c0_i32_0 = arith.constant 0 : i32
    %c0_i32_1 = arith.constant 0 : i32
    return %c0_i32, %c0_i32_0 : i32, i32
  }
  func.func @transform_6(%arg0: i32) -> (i32, i32) {
    %c0_i32 = arith.constant 0 : i32
    %c0_i32_0 = arith.constant 0 : i32
    %c0_i32_1 = arith.constant 0 : i32
    return %c0_i32, %c0_i32_0 : i32, i32
  }
  func.func @transform_7(%arg0: i32) -> (i32, i32) {
    %c0_i32 = arith.constant 0 : i32
    %c0_i32_0 = arith.constant 0 : i32
    %c0_i32_1 = arith.constant 0 : i32
    return %c0_i32, %c0_i32_0 : i32, i32
  }
  func.func @transform_8(%arg0: i32) -> (i32, i32, i32) {
    %c0_i32 = arith.constant 0 : i32
    %c0_i32_0 = arith.constant 0 : i32
    %c0_i32_1 = arith.constant 0 : i32
    return %arg0, %c0_i32, %c0_i32_0 : i32, i32, i32
  }
}

</mosaic_0001>

<bundles_post_ra>
// kernel: _lambda_.1
= control target key start
LH: loop header
LB: loop body
LE: loop exit
PB: predicated region body
PF: predicated region fallthrough
CT: control target
= control target key end

     0   :  { %13 = vsyncpa [#allocation8], 0  ;;  %s14024_s0 = inlined_call_operand.vmem [shape: bf16[2,384,32], index: 0, kind: input, shape index: {}]   ;;  %s14025_s1 = inlined_call_operand.vmem [shape: bf16[32,64], index: 1, kind: input, shape index: {}]   ;;  %s14026_s2 = inlined_call_operand.vmem [shape: bf16[576,64], index: 2, kind: input, shape index: {}]   ;;  %s14027_s3 = inlined_call_operand.vmem [shape: f32[1,64], index: 3, kind: input, shape index: {}]   ;;  %s14028_s4 = inlined_call_operand.vmem [shape: bf16[576,128], index: 4, kind: input, shape index: {}]   ;;  %s14029_s5 = inlined_call_operand.vmem [shape: f32[1,128], index: 5, kind: input, shape index: {}]   ;;  %s14030_s6 = inlined_call_operand.vmem [shape: bf16[1152,128], index: 6, kind: input, shape index: {}]   ;;  %s14031_s7 = inlined_call_operand.vmem [shape: f32[1,128], index: 7, kind: input, shape index: {}]   ;;  %s14032_s8 = inlined_call_operand.hbm [shape: f32[2,16,128], index: 8, kind: output, shape index: {}]  }
   0x1   :  { %15 = vsyncpa [#allocation8 + $0x1], 0  ;;  %s11877_s27 = smov 0   ;;  %s11879_s28 = smov 0  }
   0x2   :  { %s11881_s29 = smov 0   ;;  %s11883_s30 = smov 0  }
   0x3 LB: > { %s11898_s9 = sadd.s32 4294967295, %s11826_s30   ;;  %s8819_s10 = sadd.s32 4294967294, %s11826_s30   ;;  %s11826_s30 = sphi %s11883_s30, %s14449_s30   ;;  %s11822_s29 = sphi %s11881_s29, %s14448_s29   ;;  %s11818_s28 = sphi %s11879_s28, %s14447_s28   ;;  %s11814_s27 = sphi %s11877_s27, %s14446_s27  }
   0x4   : > { %s11902_s11 = sadd.s32 1, %s11826_s30   ;;  %s201_s12 = sadd.s32 1, %s11822_s29 }
   0x5   : > { %s198_s13 = ssub.s32 %s11826_s30, %s11902_s11  ;;  %p211_p0 = scmp.ne.s32.totalorder %s11822_s29, %s11818_s28 }
   0x6   : > { %p199_p1 = scmp.eq.s32.totalorder %s198_s13, 0  ;;  %p212_p2 = scmp.eq.s32.totalorder %s11898_s9, 1 }
   0x7   : > { %p217_p3 = scmp.ne.s32.totalorder %s11818_s28, %s11814_s27  ;;  %p218_p4 = scmp.eq.s32.totalorder %s8819_s10, 1 }
   0x8   : > { %s11913_s14 = scalar_select %p199_p1, %s11822_s29, %s201_s12  }
   0x9   : > { %p11915_p5 = por %p212_p2, %p211_p0  ;;  %p11919_p6 = por %p218_p4, %p217_p3 }
   0xa   : > { %p8822_p7 = scmp.ge.s32.totalorder %s11826_s30, 1  ;;  %p265_p8 = scmp.lt.s32.totalorder %s11826_s30, 3 }
   0xc   : > { %p266_p9 = pnand %p8822_p7, %p265_p8 }
   0xe   : > { %269 = sbr.rel (%p266_p9) target bundleno = 2228 (0x8b4), region = 52 }
  0x15   : > { %v11589_v0 = vld [vmem:[%s14025_s1] sm:$0xff]   ;;  %p299_p10 = scmp.lt.s32.totalorder %s11898_s9, 1  ;;  %v11590_v1 = vld [vmem:[%s14025_s1 + $0x8] sm:$0xff]   ;;  %vm610_vm0 = vcmask 261120   ;;  %vm389_vm1 = vcmask 523264   ;;  %v11828_v30 = vmov 0.0  }
  0x16   : > { %9846 = vmatprep.subr.bf16.mxu0 %v11589_v0  ;;  %v11615_v2 = vld [vmem:[%s14026_s2] sm:$0xff]   ;;  %v11617_v28 = vld [vmem:[%s14026_s2 + $0x8] sm:$0xff]   ;;  %391 = vst.msk [vmem:[#allocation2 + $0x8] sm:$0xff] %vm389_vm1, %v11828_v30  ;;  %392 = vst.msk [vmem:[#allocation2 + $0x10] sm:$0xff] %vm389_vm1, %v11828_v30  ;;  %s296_s19 = sand.u32 1, %s11818_s28  }
  0x17   : > { %s300_s21 = scalar_select %p299_p10, %s11898_s9, 1  ;;  %9847 = vmatpush3.bf16.msra.mxu0 %v11589_v0  ;;  %9954 = vmatprep.subr.bf16.mxu1 %v11615_v2  ;;  %v11616_v3 = vld [vmem:[%s14026_s2 + $0x20] sm:$0xff]   ;;  %v11618_v29 = vld [vmem:[%s14026_s2 + $0x28] sm:$0xff]   ;;  %390 = vst.msk [vmem:[#allocation2] sm:$0xff] %vm389_vm1, %v11828_v30  ;;  %393 = vst.msk [vmem:[#allocation2 + $0x18] sm:$0xff] %vm389_vm1, %v11828_v30 }
  0x18   : > { %9848 = vmatprep.subr.bf16.mxu0 %v11590_v1  ;;  %9955 = vmatpush3.bf16.msra.mxu1 %v11615_v2  ;;  %394 = vst.msk [vmem:[#allocation2 + $0x1a0] sm:$0xff] %vm389_vm1, %v11828_v30  ;;  %395 = vst.msk [vmem:[#allocation2 + $0x1a8] sm:$0xff] %vm389_vm1, %v11828_v30  ;;  %v11619_v31 = vld [vmem:[%s14026_s2 + $0x10] sm:$0xff]   ;;  %v11621_v33 = vld [vmem:[%s14026_s2 + $0x18] sm:$0xff]   ;;  %s8823_s22 = sshll.u32 %s296_s19, 4 }
  0x19   : > { %s11546_s24 = smul.u32 192, %s300_s21  ;;  %9956 = vmatprep.subr.bf16.mxu1 %v11617_v28  ;;  %396 = vst.msk [vmem:[#allocation2 + $0x1b0] sm:$0xff] %vm389_vm1, %v11828_v30  ;;  %397 = vst.msk [vmem:[#allocation2 + $0x1b8] sm:$0xff] %vm389_vm1, %v11828_v30  ;;  %v11620_v32 = vld [vmem:[%s14026_s2 + $0x30] sm:$0xff]   ;;  %v11622_v34 = vld [vmem:[%s14026_s2 + $0x38] sm:$0xff]   ;;  %s13966_s23 = scalar_lea.vmem [#allocation7], %s8823_s22 }
  0x1a   : > { %398 = vst.msk [vmem:[#allocation4] sm:$0xff] %vm389_vm1, %v11828_v30  ;;  %399 = vst.msk [vmem:[#allocation4 + $0x8] sm:$0xff] %vm389_vm1, %v11828_v30  ;;  %v11623_v41 = vld [vmem:[%s14026_s2 + $0x40] sm:$0xff]   ;;  %v11624_v2 = vld [vmem:[%s14026_s2 + $0x48] sm:$0xff]   ;;  %s8757_s25 = sshll.u32 %s13966_s23, 4  ;;  %s13978_s25 = int_to_ptr.vmem [resolvable:$true] %s8757_s25 }
  0x1b   : > { %s11942_s13 = scalar_lea.vmem %s14024_s0, %s11546_s24  ;;  %9849 = vmatpush3.bf16.msra.mxu0 %v11590_v1  ;;  %400 = vst.msk [vmem:[#allocation4 + $0x10] sm:$0xff] %vm389_vm1, %v11828_v30  ;;  %401 = vst.msk [vmem:[#allocation4 + $0x18] sm:$0xff] %vm389_vm1, %v11828_v30  ;;  %s9315_s24 = sshll.u32 %s11898_s9, 8 }
  0x1c   : > { %v11591_v4 = vld [vmem:[%s11942_s13] sm:$0xff]   ;;  %v11592_v5 = vld [vmem:[%s11942_s13 + $0x8] sm:$0xff]   ;;  %9898 = vmatprep.subr.bf16.mxu0 %v11616_v3  ;;  %v11593_v6 = vld [vmem:[%s11942_s13 + $0x10] sm:$0xff]   ;;  %9957 = vmatpush3.bf16.msra.mxu1 %v11617_v28  ;;  %402 = vst.msk [vmem:[#allocation4 + $0x20] sm:$0xff] %vm389_vm1, %v11828_v30  ;;  %s13976_s12 = scalar_lea.hbm %s14032_s8, %s9315_s24  ;;  %s11764_s17 = scalar_lea.vmem %s13978_s25, 256 }
  0x1d   : > { %9850 = vmatprep.mubr.msk.bf16.mxu0 %vm610_vm0, %v11591_v4  ;;  %v11594_v7 = vld [vmem:[%s11942_s13 + $0x18] sm:$0xff]   ;;  %v11595_v8 = vld [vmem:[%s11942_s13 + $0x20] sm:$0xff]   ;;  %v11596_v9 = vld [vmem:[%s11942_s13 + $0x28] sm:$0xff]   ;;  %403 = vst.msk [vmem:[#allocation4 + $0x28] sm:$0xff] %vm389_vm1, %v11828_v30  ;;  %9958 = vmatprep.subr.bf16.mxu1 %v11619_v31  ;;  %p11765_p11 = scmp.ne.s32.totalorder %s13978_s25, %s11764_s17  ;;  %s11829_s9 = smov [#allocation7]  }
  0x1e   : > { %9851 = vmatmul.mubr.msk.bf16.vlgmr.msra.gmra.mrb[0].mxu0 %vm610_vm0, %v11592_v5  ;;  %v11597_v10 = vld [vmem:[%s11942_s13 + $0x30] sm:$0xff]   ;;  %v11598_v11 = vld [vmem:[%s11942_s13 + $0x38] sm:$0xff]   ;;  %v11599_v12 = vld [vmem:[%s11942_s13 + $0x40] sm:$0xff]   ;;  %404 = vst.msk [vmem:[#allocation4 + $0x30] sm:$0xff] %vm389_vm1, %v11828_v30  ;;  %s11768_s18 = sshll.u32 %s11829_s9, 4  ;;  %s11769_s18 = int_to_ptr.vmem [resolvable:$false] %s11768_s18 }
  0x1f   : > { %9854 = vmatprep.mubr.msk.bf16.mxu0 %vm610_vm0, %v11593_v6  ;;  %9899 = vmatpush3.bf16.msra.mxu0 %v11616_v3  ;;  %v11600_v13 = vld [vmem:[%s11942_s13 + $0x48] sm:$0xff]   ;;  %v11601_v14 = vld [vmem:[%s11942_s13 + $0x50] sm:$0xff]   ;;  %v11602_v15 = vld [vmem:[%s11942_s13 + $0x58] sm:$0xff]   ;;  %405 = vst.msk [vmem:[#allocation4 + $0x38] sm:$0xff] %vm389_vm1, %v11828_v30  ;;  %p11766_p12 = pnand %p11765_p11, %p11915_p5  ;;  %s11770_s20 = scalar_lea.vmem %s11769_s18, 512 }
  0x20   : > { %v11603_v16 = vld [vmem:[%s11942_s13 + $0x60] sm:$0xff]   ;;  %v11604_v17 = vld [vmem:[%s11942_s13 + $0x68] sm:$0xff]   ;;  %v11605_v18 = vld [vmem:[%s11942_s13 + $0x70] sm:$0xff]   ;;  %9900 = vmatprep.subr.bf16.mxu0 %v11618_v29  ;;  %406 = vst.msk [vmem:[#allocation4 + $0x40] sm:$0xff] %vm389_vm1, %v11828_v30  ;;  %9959 = vmatpush3.bf16.msra.mxu1 %v11619_v31  ;;  %p11771_p0 = scmp.lt.s32.totalorder %s13978_s25, %s11769_s18  ;;  %p11772_p1 = scmp.lt.s32.totalorder %s11770_s20, %s11764_s17 }
  0x21   : > { %v11606_v19 = vld [vmem:[%s11942_s13 + $0x78] sm:$0xff]   ;;  %v11607_v20 = vld [vmem:[%s11942_s13 + $0x80] sm:$0xff]   ;;  %v11608_v21 = vld [vmem:[%s11942_s13 + $0x88] sm:$0xff]   ;;  %407 = vst.msk [vmem:[#allocation4 + $0x48] sm:$0xff] %vm389_vm1, %v11828_v30  ;;  %9960 = vmatprep.subr.bf16.mxu1 %v11621_v33  ;;  %p11767_p13 = pneg %p11766_p12 }
  0x22   : > { %v11609_v22 = vld [vmem:[%s11942_s13 + $0x90] sm:$0xff]   ;;  %v11610_v23 = vld [vmem:[%s11942_s13 + $0x98] sm:$0xff]   ;;  %v11611_v24 = vld [vmem:[%s11942_s13 + $0xa0] sm:$0xff]   ;;  %408 = vst.msk [vmem:[#allocation4 + $0x50] sm:$0xff] %vm389_vm1, %v11828_v30  ;;  %p11773_p2 = por %p11772_p1, %p11771_p0 }
  0x23   : > { %v11612_v25 = vld [vmem:[%s11942_s13 + $0xa8] sm:$0xff]   ;;  %v11613_v26 = vld [vmem:[%s11942_s13 + $0xb0] sm:$0xff]   ;;  %v11614_v27 = vld [vmem:[%s11942_s13 + $0xb8] sm:$0xff]   ;;  %9901 = vmatpush3.bf16.msra.mxu0 %v11618_v29  ;;  %409 = vst.msk [vmem:[#allocation4 + $0x58] sm:$0xff] %vm389_vm1, %v11828_v30  ;;  %s13983_s13 = scalar_lea.sflag [#allocation8], %s296_s19 }
  0x24   : > { %410 = vst.msk [vmem:[#allocation4 + $0x60] sm:$0xff] %vm389_vm1, %v11828_v30  ;;  %411 = vst.msk [vmem:[#allocation4 + $0x68] sm:$0xff] %vm389_vm1, %v11828_v30  ;;  %9902 = vmatprep.subr.bf16.mxu0 %v11620_v32  ;;  %v1084_v35 = vld [vmem:[#allocation2 + $0x8] sm:$0xff]  ;;  %v1085_v36 = vld [vmem:[#allocation2 + $0x10] sm:$0xff]  ;;  %9961 = vmatpush3.bf16.msra.mxu1 %v11621_v33  ;;  %p11774_p3 = pnand %p11773_p2, %p11767_p13 }
  0x25   : > { %412 = vst.msk [vmem:[#allocation4 + $0x70] sm:$0xff] %vm389_vm1, %v11828_v30  ;;  %413 = vst.msk [vmem:[#allocation4 + $0x78] sm:$0xff] %vm389_vm1, %v11828_v30  ;;  %v1004_v37 = vld [vmem:[#allocation2 + $0x7] sm:$0xff]  ;;  %v1132_v38 = vpack.c.bf16 %v1085_v36, %v1084_v35  ;;  %v1005_v39 = vld [vmem:[#allocation2 + $0xf] sm:$0xff]  ;;  %10010 = vmatprep.subr.bf16.mxu1 %v11623_v41 }
  0x26   : > { %9855 = vmatmul.mubr.msk.bf16.gmra.mrb[4].mxu0 %vm610_vm0, %v11594_v7  ;;  %414 = vst.msk [vmem:[#allocation4 + $0x80] sm:$0xff] %vm389_vm1, %v11828_v30  ;;  %415 = vst.msk [vmem:[#allocation4 + $0x88] sm:$0xff] %vm389_vm1, %v11828_v30  ;;  %v1052_v40 = vpack.c.bf16 %v1005_v39, %v1004_v37  ;;  %v1086_v53 = vld [vmem:[#allocation2 + $0x18] sm:$0xff] }
  0x27   : > { %9858 = vmatprep.mubr.msk.bf16.mxu0 %vm610_vm0, %v11595_v8  ;;  %416 = vst.msk [vmem:[#allocation4 + $0x90] sm:$0xff] %vm389_vm1, %v11828_v30  ;;  %417 = vst.msk [vmem:[#allocation4 + $0x98] sm:$0xff] %vm389_vm1, %v11828_v30  ;;  %9903 = vmatpush3.bf16.msra.mxu0 %v11620_v32  ;;  %v1006_v54 = vld [vmem:[#allocation2 + $0x17] sm:$0xff] }
  0x28   : > { %418 = vst.msk [vmem:[#allocation4 + $0xa0] sm:$0xff] %vm389_vm1, %v11828_v30  ;;  %419 = vst.msk [vmem:[#allocation4 + $0xa8] sm:$0xff] %vm389_vm1, %v11828_v30  ;;  %9904 = vmatprep.subr.bf16.mxu0 %v11622_v34  ;;  %9962 = vmatprep.mubr.msk.bf16.mxu1 %vm389_vm1, %v1052_v40  ;;  %v11626_v31 = vld [vmem:[%s14026_s2 + $0x58] sm:$0xff]  }
  0x29   : > { %420 = vst [vmem:[#allocation5] sm:$0xff] %v11828_v30  ;;  %421 = vst [vmem:[#allocation5 + $0x8] sm:$0xff] %v11828_v30 }
  0x2a   : > { %422 = vst [vmem:[#allocation5 + $0x10] sm:$0xff] %v11828_v30  ;;  %423 = vst [vmem:[#allocation5 + $0x98] sm:$0xff] %v11828_v30 }
  0x2b   : > { %424 = vst [vmem:[#allocation5 + $0xa0] sm:$0xff] %v11828_v30  ;;  %425 = vst [vmem:[#allocation5 + $0xa8] sm:$0xff] %v11828_v30  ;;  %9905 = vmatpush3.bf16.msra.mxu0 %v11622_v34 }
  0x2e   : > { %9859 = vmatmul.mubr.msk.bf16.gmra.mrb[8].mxu0 %vm610_vm0, %v11596_v9 }
  0x2f   : > { %9862 = vmatprep.mubr.msk.bf16.mxu0 %vm610_vm0, %v11597_v10 }
  0x36   : > { %9863 = vmatmul.mubr.msk.bf16.gmra.mrb[12].mxu0 %vm610_vm0, %v11598_v11 }
  0x37   : > { %9866 = vmatprep.mubr.msk.bf16.mxu0 %vm610_vm0, %v11599_v12 }
  0x3e   : > { %9867 = vmatmul.mubr.msk.bf16.gmra.mrb[16].mxu0 %vm610_vm0, %v11600_v13 }
  0x3f   : > { %9870 = vmatprep.mubr.msk.bf16.mxu0 %vm610_vm0, %v11601_v14  ;;  %v11625_v14 = vld [vmem:[%s14026_s2 + $0x50] sm:$0xff]  }
  0x46   : > { %9871 = vmatmul.mubr.msk.bf16.gmra.mrb[20].mxu0 %vm610_vm0, %v11602_v15 }
  0x47   : > { %9874 = vmatprep.mubr.msk.bf16.mxu0 %vm610_vm0, %v11603_v16 }
  0x4e   : > { %9875 = vmatmul.mubr.msk.bf16.gmra.mrb[24].mxu0 %vm610_vm0, %v11604_v17 }
  0x4f   : > { %9878 = vmatprep.mubr.msk.bf16.mxu0 %vm610_vm0, %v11605_v18 }
  0x56   : > { %9879 = vmatmul.mubr.msk.bf16.gmra.mrb[28].mxu0 %vm610_vm0, %v11606_v19 }
  0x57   : > { %9882 = vmatprep.mubr.msk.bf16.mxu0 %vm610_vm0, %v11607_v20 }
  0x5e   : > { %9883 = vmatmul.mubr.msk.bf16.gmra.mrb[32].mxu0 %vm610_vm0, %v11608_v21 }
  0x5f   : > { %9886 = vmatprep.mubr.msk.bf16.mxu0 %vm610_vm0, %v11609_v22 }
  0x66   : > { %9887 = vmatmul.mubr.msk.bf16.gmra.mrb[36].mxu0 %vm610_vm0, %v11610_v23 }
  0x67   : > { %9890 = vmatprep.mubr.msk.bf16.mxu0 %vm610_vm0, %v11611_v24 }
  0x6e   : > { %9891 = vmatmul.mubr.msk.bf16.gmra.mrb[40].mxu0 %vm610_vm0, %v11612_v25 }
  0x6f   : > { %9894 = vmatprep.mubr.msk.bf16.mxu0 %vm610_vm0, %v11613_v26 }
  0x76   : > { %9895 = vmatmul.mubr.msk.bf16.gmra.mrb[44].mxu0 %vm610_vm0, %v11614_v27 }
  0x77   : > { %9906 = vmatprep.mubr.msk.bf16.mxu0 %vm389_vm1, %v1132_v38 }
  0xf1   : > { %v9852_v42 = vpop.f32.mrb[0].mxu0 }
  0xf2   : > { %v910_v43 = vmax.f32 %v9852_v42, 0.0  ;;  %v717_v44 = vpop.f32.mrb[1].mxu0 }
  0xf3   : > { %v908_v45 = vmax.f32 %v717_v44, 0.0  ;;  %v9853_v46 = vpop.f32.mrb[2].mxu0 }
  0xf4   : > { %958 = vst.msk [vmem:[#allocation2 + $0x30] sm:$0xff] %vm389_vm1, %v910_v43  ;;  %v911_v47 = vmax.f32 %v9853_v46, 0.0  ;;  %v720_v48 = vpop.f32.mrb[3].mxu0 }
  0xf5   : > { %956 = vst.msk [vmem:[#allocation2 + $0x20] sm:$0xff] %vm389_vm1, %v908_v45  ;;  %v909_v49 = vmax.f32 %v720_v48, 0.0 }
  0xf6   : > { %959 = vst.msk [vmem:[#allocation2 + $0x38] sm:$0xff] %vm389_vm1, %v911_v47  ;;  %v12132_v47 = vld [vmem:[%s14026_s2 + $0x60] sm:$0xff]  }
  0xf7   : > { %957 = vst.msk [vmem:[#allocation2 + $0x28] sm:$0xff] %vm389_vm1, %v909_v49 }
  0xf9   : > { %v9856_v50 = vpop.f32.mrb[4].mxu0 }
  0xfa   : > { %v914_v51 = vmax.f32 %v9856_v50, 0.0  ;;  %v733_v52 = vpop.f32.mrb[5].mxu0 }
  0xfb   : > { %v912_v55 = vmax.f32 %v733_v52, 0.0  ;;  %v9857_v56 = vpop.f32.mrb[6].mxu0  ;;  %v1089_v0 = vld [vmem:[#allocation2 + $0x30] sm:$0xff] }
  0xfc   : > { %962 = vst.msk [vmem:[#allocation2 + $0x50] sm:$0xff] %vm389_vm1, %v914_v51  ;;  %v915_v57 = vmax.f32 %v9857_v56, 0.0  ;;  %v736_v58 = vpop.f32.mrb[7].mxu0  ;;  %v1087_v59 = vld [vmem:[#allocation2 + $0x20] sm:$0xff] }
  0xfd   : > { %v12050_v60 = vld [vmem:[#allocation2 + $0x1f] sm:$0xff]  ;;  %960 = vst.msk [vmem:[#allocation2 + $0x40] sm:$0xff] %vm389_vm1, %v912_v55  ;;  %v913_v61 = vmax.f32 %v736_v58, 0.0  ;;  %v1133_v62 = vpack.c.bf16 %v1087_v59, %v1086_v53  ;;  %v12054_v1 = vld [vmem:[#allocation2 + $0x37] sm:$0xff] }
  0xfe   : > { %v1053_v63 = vpack.c.bf16 %v12050_v60, %v1006_v54  ;;  %963 = vst.msk [vmem:[#allocation2 + $0x58] sm:$0xff] %vm389_vm1, %v915_v57  ;;  %v1088_v3 = vld [vmem:[#allocation2 + $0x28] sm:$0xff]  ;;  %v1090_v19 = vld [vmem:[#allocation2 + $0x38] sm:$0xff] }
  0xff   : > { %v12060_v4 = vld [vmem:[#allocation2 + $0x27] sm:$0xff]  ;;  %v12062_v5 = vld [vmem:[#allocation2 + $0x2f] sm:$0xff]  ;;  %961 = vst.msk [vmem:[#allocation2 + $0x48] sm:$0xff] %vm389_vm1, %v913_v61  ;;  %9907 = vmatmul.mubr.msk.bf16.vlgmr.msra.gmra.mrb[48].mxu0 %vm389_vm1, %v1133_v62  ;;  %v1134_v6 = vpack.c.bf16 %v1089_v0, %v1088_v3  ;;  %v12121_v43 = vld [vmem:[#allocation2 + $0x38] sm:$0xff] }
 0x100   : > { %9963 = vmatmul.mubr.msk.bf16.vlgmr.msra.gmra.mrb[0].mxu1 %vm389_vm1, %v1053_v63  ;;  %v1054_v7 = vpack.c.bf16 %v12062_v5, %v12060_v4  ;;  %v12069_v8 = vld [vmem:[#allocation2 + $0x21] sm:$0xff]  ;;  %v12071_v9 = vld [vmem:[#allocation2 + $0x29] sm:$0xff]  ;;  %v12084_v20 = vld [vmem:[#allocation2 + $0x31] sm:$0xff]  ;;  %14138 = vst [vmem:[#allocation15_spill] sm:$0xff] %v12121_v43 }
 0x101   : > { %10011 = vmatpush3.bf16.msra.mxu1 %v11623_v41  ;;  %v9860_v13 = vpop.f32.mrb[8].mxu0  ;;  %9910 = vmatprep.mubr.msk.bf16.mxu0 %vm389_vm1, %v1134_v6 }
 0x102   : > { %9966 = vmatprep.mubr.msk.bf16.mxu1 %vm389_vm1, %v1054_v7  ;;  %v918_v15 = vmax.f32 %v9860_v13, 0.0  ;;  %v749_v16 = vpop.f32.mrb[9].mxu0  ;;  %10012 = vmatprep.subr.bf16.mxu1 %v11624_v2 }
 0x103   : > { %v916_v17 = vmax.f32 %v749_v16, 0.0  ;;  %v9861_v18 = vpop.f32.mrb[10].mxu0  ;;  %v1093_v29 = vld [vmem:[#allocation2 + $0x50] sm:$0xff] }
 0x104   : > { %966 = vst.msk [vmem:[#allocation2 + $0x70] sm:$0xff] %vm389_vm1, %v918_v15  ;;  %v919_v21 = vmax.f32 %v9861_v18, 0.0  ;;  %v752_v22 = vpop.f32.mrb[11].mxu0  ;;  %v1091_v23 = vld [vmem:[#allocation2 + $0x40] sm:$0xff]  ;;  %v12134_v48 = vld [vmem:[#allocation2 + $0x50] sm:$0xff] }
 0x105   : > { %v12087_v24 = vld [vmem:[#allocation2 + $0x3f] sm:$0xff]  ;;  %10013 = vmatpush3.bf16.msra.mxu1 %v11624_v2  ;;  %964 = vst.msk [vmem:[#allocation2 + $0x60] sm:$0xff] %vm389_vm1, %v916_v17  ;;  %v917_v26 = vmax.f32 %v752_v22, 0.0  ;;  %v1135_v27 = vpack.c.bf16 %v1091_v23, %v1090_v19  ;;  %v12094_v30 = vld [vmem:[#allocation2 + $0x57] sm:$0xff]  ;;  %14140 = vst [vmem:[#allocation17_spill] sm:$0xff] %v12134_v48 }
 0x106   : > { %14133 = vst [vmem:[#allocation10_spill] sm:$0xff] %v12087_v24  ;;  %v12089_v25 = vld [vmem:[#allocation2 + $0x39] sm:$0xff]  ;;  %v1055_v28 = vpack.c.bf16 %v12087_v24, %v12054_v1  ;;  %14134 = vst [vmem:[#allocation11_spill] sm:$0xff] %v12094_v30  ;;  %10014 = vmatprep.subr.bf16.mxu1 %v11625_v14  ;;  %v1092_v33 = vld [vmem:[#allocation2 + $0x48] sm:$0xff] }
 0x107   : > { %967 = vst.msk [vmem:[#allocation2 + $0x78] sm:$0xff] %vm389_vm1, %v919_v21  ;;  %v12102_v34 = vld [vmem:[#allocation2 + $0x47] sm:$0xff]  ;;  %v12104_v35 = vld [vmem:[#allocation2 + $0x4f] sm:$0xff]  ;;  %965 = vst.msk [vmem:[#allocation2 + $0x68] sm:$0xff] %vm389_vm1, %v917_v26  ;;  %9911 = vmatmul.mubr.msk.bf16.gmra.mrb[52].mxu0 %vm389_vm1, %v1135_v27  ;;  %v1136_v36 = vpack.c.bf16 %v1093_v29, %v1092_v33 }
 0x108   : > { %14135 = vst [vmem:[#allocation12_spill] sm:$0xff] %v12102_v34  ;;  %14136 = vst [vmem:[#allocation13_spill] sm:$0xff] %v12104_v35  ;;  %9967 = vmatmul.mubr.msk.bf16.gmra.mrb[4].mxu1 %vm389_vm1, %v1055_v28  ;;  %v1056_v37 = vpack.c.bf16 %v12104_v35, %v12102_v34  ;;  %v12111_v38 = vld [vmem:[#allocation2 + $0x41] sm:$0xff]  ;;  %v12113_v39 = vld [vmem:[#allocation2 + $0x49] sm:$0xff] }
 0x109   : > { %v12117_v41 = vld [vmem:[#allocation2 + $0x40] sm:$0xff]  ;;  %10015 = vmatpush3.bf16.msra.mxu1 %v11625_v14  ;;  %v12123_v44 = vld [vmem:[#allocation2 + $0x48] sm:$0xff]  ;;  %v9864_v46 = vpop.f32.mrb[12].mxu0  ;;  %9914 = vmatprep.mubr.msk.bf16.mxu0 %vm389_vm1, %v1136_v36  ;;  %v1094_v55 = vld [vmem:[#allocation2 + $0x58] sm:$0xff] }
 0x10a   : > { %14137 = vst [vmem:[#allocation14_spill] sm:$0xff] %v12117_v41  ;;  %14139 = vst [vmem:[#allocation16_spill] sm:$0xff] %v12123_v44  ;;  %9970 = vmatprep.mubr.msk.bf16.mxu1 %vm389_vm1, %v1056_v37  ;;  %v922_v50 = vmax.f32 %v9864_v46, 0.0  ;;  %v765_v51 = vpop.f32.mrb[13].mxu0  ;;  %10016 = vmatprep.subr.bf16.mxu1 %v11626_v31  ;;  %v12140_v56 = vld [vmem:[#allocation2 + $0x51] sm:$0xff] }
 0x10b   : > { %v920_v53 = vmax.f32 %v765_v51, 0.0  ;;  %v9865_v54 = vpop.f32.mrb[14].mxu0  ;;  %v1097_v3 = vld [vmem:[#allocation2 + $0x70] sm:$0xff]  ;;  %v12181_v29 = vld [vmem:[#allocation2 + $0x58] sm:$0xff] }
 0x10c   : > { %970 = vst.msk [vmem:[#allocation2 + $0x90] sm:$0xff] %vm389_vm1, %v922_v50  ;;  %v923_v57 = vmax.f32 %v9865_v54, 0.0  ;;  %v768_v58 = vpop.f32.mrb[15].mxu0  ;;  %v1095_v59 = vld [vmem:[#allocation2 + $0x60] sm:$0xff]  ;;  %14147 = vst [vmem:[#allocation24_spill] sm:$0xff] %v12181_v29 }
 0x10d   : > { %v12143_v61 = vld [vmem:[#allocation2 + $0x5f] sm:$0xff]  ;;  %10017 = vmatpush3.bf16.msra.mxu1 %v11626_v31  ;;  %968 = vst.msk [vmem:[#allocation2 + $0x80] sm:$0xff] %vm389_vm1, %v920_v53  ;;  %v921_v63 = vmax.f32 %v768_v58, 0.0  ;;  %v1137_v0 = vpack.c.bf16 %v1095_v59, %v1094_v55  ;;  %v12183_v31 = vld [vmem:[#allocation2 + $0x70] sm:$0xff] }
 0x10e   : > { %14141 = vst [vmem:[#allocation18_spill] sm:$0xff] %v12143_v61  ;;  %v12145_v62 = vld [vmem:[#allocation2 + $0x59] sm:$0xff]  ;;  %v1057_v2 = vpack.c.bf16 %v12143_v61, %v12094_v30  ;;  %10066 = vmatprep.subr.bf16.mxu1 %v12132_v47  ;;  %971 = vst.msk [vmem:[#allocation2 + $0x98] sm:$0xff] %vm389_vm1, %v923_v57  ;;  %v1096_v13 = vld [vmem:[#allocation2 + $0x68] sm:$0xff] }
 0x10f   : > { %v12150_v6 = vld [vmem:[#allocation2 + $0x77] sm:$0xff]  ;;  %v12156_v14 = vld [vmem:[#allocation2 + $0x67] sm:$0xff]  ;;  %v12158_v15 = vld [vmem:[#allocation2 + $0x6f] sm:$0xff]  ;;  %969 = vst.msk [vmem:[#allocation2 + $0x88] sm:$0xff] %vm389_vm1, %v921_v63  ;;  %9915 = vmatmul.mubr.msk.bf16.gmra.mrb[56].mxu0 %vm389_vm1, %v1137_v0  ;;  %v1138_v16 = vpack.c.bf16 %v1097_v3, %v1096_v13 }
 0x110   : > { %14142 = vst [vmem:[#allocation19_spill] sm:$0xff] %v12150_v6  ;;  %14143 = vst [vmem:[#allocation20_spill] sm:$0xff] %v12156_v14  ;;  %9971 = vmatmul.mubr.msk.bf16.gmra.mrb[8].mxu1 %vm389_vm1, %v1057_v2  ;;  %v1058_v17 = vpack.c.bf16 %v12158_v15, %v12156_v14  ;;  %v12165_v18 = vld [vmem:[#allocation2 + $0x61] sm:$0xff]  ;;  %v12167_v19 = vld [vmem:[#allocation2 + $0x69] sm:$0xff] }
 0x111   : > { %14144 = vst [vmem:[#allocation21_spill] sm:$0xff] %v12158_v15  ;;  %v12171_v22 = vld [vmem:[#allocation2 + $0x60] sm:$0xff]  ;;  %v12175_v26 = vld [vmem:[#allocation2 + $0x68] sm:$0xff]  ;;  %v9868_v28 = vpop.f32.mrb[16].mxu0  ;;  %9918 = vmatprep.mubr.msk.bf16.mxu0 %vm389_vm1, %v1138_v16  ;;  %14148 = vst [vmem:[#allocation25_spill] sm:$0xff] %v12183_v31 }
 0x112   : > { %14145 = vst [vmem:[#allocation22_spill] sm:$0xff] %v12171_v22  ;;  %14146 = vst [vmem:[#allocation23_spill] sm:$0xff] %v12175_v26  ;;  %9974 = vmatprep.mubr.msk.bf16.mxu1 %vm389_vm1, %v1058_v17  ;;  %v926_v33 = vmax.f32 %v9868_v28, 0.0  ;;  %v781_v36 = vpop.f32.mrb[17].mxu0  ;;  %v1098_v53 = vld [vmem:[#allocation2 + $0x78] sm:$0xff] }
 0x113   : > { %v924_v50 = vmax.f32 %v781_v36, 0.0  ;;  %v9869_v51 = vpop.f32.mrb[18].mxu0  ;;  %v12189_v54 = vld [vmem:[#allocation2 + $0x71] sm:$0xff] }
 0x114   : > { %974 = vst.msk [vmem:[#allocation2 + $0xb0] sm:$0xff] %vm389_vm1, %v926_v33  ;;  %v927_v55 = vmax.f32 %v9869_v51, 0.0  ;;  %v784_v57 = vpop.f32.mrb[19].mxu0  ;;  %v1099_v58 = vld [vmem:[#allocation2 + $0x80] sm:$0xff]  ;;  %v1101_v13 = vld [vmem:[#allocation2 + $0x90] sm:$0xff] }
 0x115   : > { %v12192_v59 = vld [vmem:[#allocation2 + $0x7f] sm:$0xff]  ;;  %972 = vst.msk [vmem:[#allocation2 + $0xa0] sm:$0xff] %vm389_vm1, %v924_v50  ;;  %v925_v0 = vmax.f32 %v784_v57, 0.0  ;;  %v1139_v2 = vpack.c.bf16 %v1099_v58, %v1098_v53  ;;  %v12199_v16 = vld [vmem:[#allocation2 + $0x97] sm:$0xff] }
 0x116   : > { %14149 = vst [vmem:[#allocation26_spill] sm:$0xff] %v12192_v59  ;;  %v12194_v63 = vld [vmem:[#allocation2 + $0x79] sm:$0xff]  ;;  %v1059_v3 = vpack.c.bf16 %v12192_v59, %v12150_v6  ;;  %14150 = vst [vmem:[#allocation27_spill] sm:$0xff] %v12199_v16  ;;  %v1100_v28 = vld [vmem:[#allocation2 + $0x88] sm:$0xff] }
 0x117   : > { %975 = vst.msk [vmem:[#allocation2 + $0xb8] sm:$0xff] %vm389_vm1, %v927_v55  ;;  %v12204_v33 = vld [vmem:[#allocation2 + $0x87] sm:$0xff]  ;;  %v12206_v36 = vld [vmem:[#allocation2 + $0x8f] sm:$0xff]  ;;  %973 = vst.msk [vmem:[#allocation2 + $0xa8] sm:$0xff] %vm389_vm1, %v925_v0  ;;  %9919 = vmatmul.mubr.msk.bf16.gmra.mrb[60].mxu0 %vm389_vm1, %v1139_v2  ;;  %v1140_v50 = vpack.c.bf16 %v1101_v13, %v1100_v28 }
 0x118   : > { %14151 = vst [vmem:[#allocation28_spill] sm:$0xff] %v12204_v33  ;;  %14152 = vst [vmem:[#allocation29_spill] sm:$0xff] %v12206_v36  ;;  %9975 = vmatmul.mubr.msk.bf16.gmra.mrb[12].mxu1 %vm389_vm1, %v1059_v3  ;;  %v1060_v51 = vpack.c.bf16 %v12206_v36, %v12204_v33  ;;  %v12213_v53 = vld [vmem:[#allocation2 + $0x81] sm:$0xff]  ;;  %v12215_v57 = vld [vmem:[#allocation2 + $0x89] sm:$0xff] }
 0x119   : > { %v12219_v58 = vld [vmem:[#allocation2 + $0x80] sm:$0xff]  ;;  %v12223_v46 = vld [vmem:[#allocation2 + $0x88] sm:$0xff]  ;;  %v9872_v3 = vpop.f32.mrb[20].mxu0  ;;  %9922 = vmatprep.mubr.msk.bf16.mxu0 %vm389_vm1, %v1140_v50  ;;  %v12229_v13 = vld [vmem:[#allocation2 + $0x78] sm:$0xff] }
 0x11a   : > { %14153 = vst [vmem:[#allocation30_spill] sm:$0xff] %v12219_v58  ;;  %14154 = vst [vmem:[#allocation31_spill] sm:$0xff] %v12223_v46  ;;  %9978 = vmatprep.mubr.msk.bf16.mxu1 %vm389_vm1, %v1060_v51  ;;  %v12231_v28 = vld [vmem:[#allocation2 + $0x90] sm:$0xff]  ;;  %v930_v37 = vmax.f32 %v9872_v3, 0.0  ;;  %v797_v52 = vpop.f32.mrb[21].mxu0  ;;  %v1102_v2 = vld [vmem:[#allocation2 + $0x98] sm:$0xff] }
 0x11b   : > { %14155 = vst [vmem:[#allocation32_spill] sm:$0xff] %v12229_v13  ;;  %14156 = vst [vmem:[#allocation33_spill] sm:$0xff] %v12231_v28  ;;  %v928_v27 = vmax.f32 %v797_v52, 0.0  ;;  %v9873_v7 = vpop.f32.mrb[22].mxu0  ;;  %v12237_v45 = vld [vmem:[#allocation2 + $0x91] sm:$0xff] }
 0x11c   : > { %978 = vst.msk [vmem:[#allocation2 + $0xd0] sm:$0xff] %vm389_vm1, %v930_v37  ;;  %v931_v50 = vmax.f32 %v9873_v7, 0.0  ;;  %v800_v51 = vpop.f32.mrb[23].mxu0  ;;  %v1103_v32 = vld [vmem:[#allocation2 + $0xa0] sm:$0xff]  ;;  %v1105_v17 = vld [vmem:[#allocation2 + $0xb0] sm:$0xff]  ;;  %v12271_v42 = vld [vmem:[#allocation2 + $0x98] sm:$0xff] }
 0x11d   : > { %v12240_v12 = vld [vmem:[#allocation2 + $0x9f] sm:$0xff]  ;;  %976 = vst.msk [vmem:[#allocation2 + $0xc0] sm:$0xff] %vm389_vm1, %v928_v27  ;;  %v929_v49 = vmax.f32 %v800_v51, 0.0  ;;  %v1141_v0 = vpack.c.bf16 %v1103_v32, %v1102_v2  ;;  %14162 = vst [vmem:[#allocation39_spill] sm:$0xff] %v12271_v42 }
 0x11e   : > { %14157 = vst [vmem:[#allocation34_spill] sm:$0xff] %v12240_v12  ;;  %v12242_v3 = vld [vmem:[#allocation2 + $0x99] sm:$0xff]  ;;  %v1061_v52 = vpack.c.bf16 %v12240_v12, %v12199_v16  ;;  %979 = vst.msk [vmem:[#allocation2 + $0xd8] sm:$0xff] %vm389_vm1, %v931_v50  ;;  %v1104_v7 = vld [vmem:[#allocation2 + $0xa8] sm:$0xff] }
 0x11f   : > { %v12247_v55 = vld [vmem:[#allocation2 + $0xb7] sm:$0xff]  ;;  %v12252_v23 = vld [vmem:[#allocation2 + $0xa7] sm:$0xff]  ;;  %v12254_v21 = vld [vmem:[#allocation2 + $0xaf] sm:$0xff]  ;;  %977 = vst.msk [vmem:[#allocation2 + $0xc8] sm:$0xff] %vm389_vm1, %v929_v49  ;;  %9923 = vmatmul.mubr.msk.bf16.gmra.mrb[64].mxu0 %vm389_vm1, %v1141_v0  ;;  %v1142_v32 = vpack.c.bf16 %v1105_v17, %v1104_v7 }
 0x120   : > { %14158 = vst [vmem:[#allocation35_spill] sm:$0xff] %v12247_v55  ;;  %14159 = vst [vmem:[#allocation36_spill] sm:$0xff] %v12252_v23  ;;  %9979 = vmatmul.mubr.msk.bf16.gmra.mrb[16].mxu1 %vm389_vm1, %v1061_v52  ;;  %v1062_v27 = vpack.c.bf16 %v12254_v21, %v12252_v23  ;;  %v12261_v2 = vld [vmem:[#allocation2 + $0xa1] sm:$0xff]  ;;  %v12263_v51 = vld [vmem:[#allocation2 + $0xa9] sm:$0xff] }
 0x121   : > { %14160 = vst [vmem:[#allocation37_spill] sm:$0xff] %v12254_v21  ;;  %v12267_v37 = vld [vmem:[#allocation2 + $0xa0] sm:$0xff]  ;;  %v12273_v0 = vld [vmem:[#allocation2 + $0xa8] sm:$0xff]  ;;  %v9876_v52 = vpop.f32.mrb[24].mxu0  ;;  %9926 = vmatprep.mubr.msk.bf16.mxu0 %vm389_vm1, %v1142_v32  ;;  %v12279_v7 = vld [vmem:[#allocation2 + $0xb0] sm:$0xff] }
 0x122   : > { %14161 = vst [vmem:[#allocation38_spill] sm:$0xff] %v12267_v37  ;;  %14163 = vst [vmem:[#allocation40_spill] sm:$0xff] %v12273_v0  ;;  %9982 = vmatprep.mubr.msk.bf16.mxu1 %vm389_vm1, %v1062_v27  ;;  %v934_v40 = vmax.f32 %v9876_v52, 0.0  ;;  %v813_v11 = vpop.f32.mrb[25].mxu0  ;;  %v12285_v48 = vld [vmem:[#allocation2 + $0xb8] sm:$0xff] }
 0x123   : > { %14164 = vst [vmem:[#allocation41_spill] sm:$0xff] %v12279_v7  ;;  %v932_v10 = vmax.f32 %v813_v11, 0.0  ;;  %v9877_v44 = vpop.f32.mrb[26].mxu0  ;;  %14165 = vst [vmem:[#allocation42_spill] sm:$0xff] %v12285_v48  ;;  %v12287_v17 = vld [vmem:[#allocation2 + $0xb1] sm:$0xff] }
 0x124   : > { %982 = vst.msk [vmem:[#allocation2 + $0xf0] sm:$0xff] %vm389_vm1, %v934_v40  ;;  %v935_v32 = vmax.f32 %v9877_v44, 0.0  ;;  %v816_v27 = vpop.f32.mrb[27].mxu0  ;;  %v12290_v43 = vld [vmem:[#allocation2 + $0xc0] sm:$0xff]  ;;  %v12301_v7 = vld [vmem:[#allocation2 + $0xd0] sm:$0xff] }
 0x125   : > { %14166 = vst [vmem:[#allocation43_spill] sm:$0xff] %v12290_v43  ;;  %v12292_v41 = vld [vmem:[#allocation2 + $0xbf] sm:$0xff]  ;;  %980 = vst.msk [vmem:[#allocation2 + $0xe0] sm:$0xff] %vm389_vm1, %v932_v10  ;;  %v933_v52 = vmax.f32 %v816_v27, 0.0  ;;  %v1143_v11 = vpack.c.bf16 %v12290_v43, %v12285_v48  ;;  %v12305_v44 = vld [vmem:[#allocation2 + $0xd7] sm:$0xff] }
 0x126   : > { %14167 = vst [vmem:[#allocation44_spill] sm:$0xff] %v12292_v41  ;;  %v12294_v50 = vld [vmem:[#allocation2 + $0xb9] sm:$0xff]  ;;  %v1063_v49 = vpack.c.bf16 %v12292_v41, %v12247_v55  ;;  %14168 = vst [vmem:[#allocation45_spill] sm:$0xff] %v12301_v7  ;;  %v12310_v37 = vld [vmem:[#allocation2 + $0xc8] sm:$0xff] }
 0x127   : > { %v12303_v40 = vld [vmem:[#allocation2 + $0xd8] sm:$0xff]  ;;  %14170 = vst [vmem:[#allocation47_spill] sm:$0xff] %v12305_v44  ;;  %983 = vst.msk [vmem:[#allocation2 + $0xf8] sm:$0xff] %vm389_vm1, %v935_v32  ;;  %v12312_v10 = vld [vmem:[#allocation2 + $0xc7] sm:$0xff]  ;;  %9927 = vmatmul.mubr.msk.bf16.gmra.mrb[68].mxu0 %vm389_vm1, %v1143_v11  ;;  %v1144_v0 = vpack.c.bf16 %v12301_v7, %v12310_v37 }
 0x128   : > { %14169 = vst [vmem:[#allocation46_spill] sm:$0xff] %v12303_v40  ;;  %14171 = vst [vmem:[#allocation48_spill] sm:$0xff] %v12310_v37  ;;  %v12314_v27 = vld [vmem:[#allocation2 + $0xcf] sm:$0xff]  ;;  %9983 = vmatmul.mubr.msk.bf16.gmra.mrb[20].mxu1 %vm389_vm1, %v1063_v49  ;;  %v12325_v42 = vld [vmem:[#allocation2 + $0xc1] sm:$0xff] }
 0x129   : > { %14172 = vst [vmem:[#allocation49_spill] sm:$0xff] %v12312_v10  ;;  %14173 = vst [vmem:[#allocation50_spill] sm:$0xff] %v12314_v27  ;;  %v1064_v32 = vpack.c.bf16 %v12314_v27, %v12312_v10  ;;  %v12327_v28 = vld [vmem:[#allocation2 + $0xc9] sm:$0xff]  ;;  %v9880_v49 = vpop.f32.mrb[28].mxu0  ;;  %9930 = vmatprep.mubr.msk.bf16.mxu0 %vm389_vm1, %v1144_v0  ;;  %v12339_v26 = vld [vmem:[#allocation2 + $0xd1] sm:$0xff] }
 0x12a   : > { %981 = vst.msk [vmem:[#allocation2 + $0xe8] sm:$0xff] %vm389_vm1, %v933_v52  ;;  %v938_v7 = vmax.f32 %v9880_v49, 0.0  ;;  %v829_v58 = vpop.f32.mrb[29].mxu0 }
 0x12b   : > { %9986 = vmatprep.mubr.msk.bf16.mxu1 %vm389_vm1, %v1064_v32  ;;  %v936_v13 = vmax.f32 %v829_v58, 0.0  ;;  %v9881_v31 = vpop.f32.mrb[30].mxu0  ;;  %v12353_v48 = vld [vmem:[#allocation2 + $0xf0] sm:$0xff] }
 0x12c   : > { %986 = vst.msk [vmem:[#allocation2 + $0x110] sm:$0xff] %vm389_vm1, %v938_v7  ;;  %v939_v52 = vmax.f32 %v9881_v31, 0.0  ;;  %v832_v46 = vpop.f32.mrb[31].mxu0  ;;  %v12342_v22 = vld [vmem:[#allocation2 + $0xe0] sm:$0xff]  ;;  %14176 = vst [vmem:[#allocation53_spill] sm:$0xff] %v12353_v48 }
 0x12d   : > { %14174 = vst [vmem:[#allocation51_spill] sm:$0xff] %v12342_v22  ;;  %v12344_v11 = vld [vmem:[#allocation2 + $0xdf] sm:$0xff]  ;;  %984 = vst.msk [vmem:[#allocation2 + $0x100] sm:$0xff] %vm389_vm1, %v936_v13  ;;  %v937_v32 = vmax.f32 %v832_v46, 0.0  ;;  %v1145_v49 = vpack.c.bf16 %v12342_v22, %v12303_v40 }
 0x12e   : > { %14175 = vst [vmem:[#allocation52_spill] sm:$0xff] %v12344_v11  ;;  %v12346_v0 = vld [vmem:[#allocation2 + $0xd9] sm:$0xff]  ;;  %v1065_v58 = vpack.c.bf16 %v12344_v11, %v12305_v44  ;;  %987 = vst.msk [vmem:[#allocation2 + $0x118] sm:$0xff] %vm389_vm1, %v939_v52  ;;  %v12391_v55 = vld [vmem:[#allocation2 + $0xf1] sm:$0xff] }
 0x12f   : > { %v12355_v7 = vld [vmem:[#allocation2 + $0xf8] sm:$0xff]  ;;  %985 = vst.msk [vmem:[#allocation2 + $0x108] sm:$0xff] %vm389_vm1, %v937_v32  ;;  %9931 = vmatmul.mubr.msk.bf16.gmra.mrb[72].mxu0 %vm389_vm1, %v1145_v49 }
 0x130   : > { %14177 = vst [vmem:[#allocation54_spill] sm:$0xff] %v12355_v7  ;;  %v12357_v31 = vld [vmem:[#allocation2 + $0xf7] sm:$0xff]  ;;  %9987 = vmatmul.mubr.msk.bf16.gmra.mrb[24].mxu1 %vm389_vm1, %v1065_v58 }
 0x131   : > { %14178 = vst [vmem:[#allocation55_spill] sm:$0xff] %v12357_v31  ;;  %v12362_v37 = vld [vmem:[#allocation2 + $0xe8] sm:$0xff]  ;;  %v9884_v58 = vpop.f32.mrb[32].mxu0 }
 0x132   : > { %14179 = vst [vmem:[#allocation56_spill] sm:$0xff] %v12362_v37  ;;  %v12364_v46 = vld [vmem:[#allocation2 + $0xe7] sm:$0xff]  ;;  %v12366_v13 = vld [vmem:[#allocation2 + $0xef] sm:$0xff]  ;;  %v1146_v43 = vpack.c.bf16 %v12353_v48, %v12362_v37  ;;  %v942_v48 = vmax.f32 %v9884_v58, 0.0  ;;  %v845_v41 = vpop.f32.mrb[33].mxu0 }
 0x133   : > { %14180 = vst [vmem:[#allocation57_spill] sm:$0xff] %v12364_v46  ;;  %14181 = vst [vmem:[#allocation58_spill] sm:$0xff] %v12366_v13  ;;  %v1066_v52 = vpack.c.bf16 %v12366_v13, %v12364_v46  ;;  %v12377_v29 = vld [vmem:[#allocation2 + $0xe1] sm:$0xff]  ;;  %v12379_v27 = vld [vmem:[#allocation2 + $0xe9] sm:$0xff]  ;;  %v940_v10 = vmax.f32 %v845_v41, 0.0  ;;  %v9885_v21 = vpop.f32.mrb[34].mxu0 }
 0x134   : > { %9934 = vmatprep.mubr.msk.bf16.mxu0 %vm389_vm1, %v1146_v43  ;;  %990 = vst.msk [vmem:[#allocation2 + $0x130] sm:$0xff] %vm389_vm1, %v942_v48  ;;  %v943_v32 = vmax.f32 %v9885_v21, 0.0  ;;  %v848_v44 = vpop.f32.mrb[35].mxu0  ;;  %v12394_v13 = vld [vmem:[#allocation2 + $0x100] sm:$0xff]  ;;  %v12405_v40 = vld [vmem:[#allocation2 + $0x110] sm:$0xff] }
 0x135   : > { %9990 = vmatprep.mubr.msk.bf16.mxu1 %vm389_vm1, %v1066_v52  ;;  %14182 = vst [vmem:[#allocation59_spill] sm:$0xff] %v12394_v13  ;;  %v12396_v49 = vld [vmem:[#allocation2 + $0xff] sm:$0xff]  ;;  %988 = vst.msk [vmem:[#allocation2 + $0x120] sm:$0xff] %vm389_vm1, %v940_v10  ;;  %v941_v52 = vmax.f32 %v848_v44, 0.0  ;;  %v1147_v58 = vpack.c.bf16 %v12394_v13, %v12355_v7  ;;  %v12409_v21 = vld [vmem:[#allocation2 + $0x117] sm:$0xff] }
 0x136   : > { %14183 = vst [vmem:[#allocation60_spill] sm:$0xff] %v12396_v49  ;;  %v12398_v43 = vld [vmem:[#allocation2 + $0xf9] sm:$0xff]  ;;  %v1067_v41 = vpack.c.bf16 %v12396_v49, %v12357_v31  ;;  %14184 = vst [vmem:[#allocation61_spill] sm:$0xff] %v12405_v40  ;;  %v12414_v37 = vld [vmem:[#allocation2 + $0x108] sm:$0xff] }
 0x137   : > { %v12407_v48 = vld [vmem:[#allocation2 + $0x118] sm:$0xff]  ;;  %14186 = vst [vmem:[#allocation63_spill] sm:$0xff] %v12409_v21  ;;  %991 = vst.msk [vmem:[#allocation2 + $0x138] sm:$0xff] %vm389_vm1, %v943_v32  ;;  %v12416_v44 = vld [vmem:[#allocation2 + $0x107] sm:$0xff]  ;;  %9935 = vmatmul.mubr.msk.bf16.gmra.mrb[76].mxu0 %vm389_vm1, %v1147_v58  ;;  %v1148_v22 = vpack.c.bf16 %v12405_v40, %v12414_v37 }
 0x138   : > { %14185 = vst [vmem:[#allocation62_spill] sm:$0xff] %v12407_v48  ;;  %14187 = vst [vmem:[#allocation64_spill] sm:$0xff] %v12414_v37  ;;  %v12418_v10 = vld [vmem:[#allocation2 + $0x10f] sm:$0xff]  ;;  %9991 = vmatmul.mubr.msk.bf16.gmra.mrb[28].mxu1 %vm389_vm1, %v1067_v41  ;;  %v12429_v31 = vld [vmem:[#allocation2 + $0x101] sm:$0xff] }
 0x139   : > { %14188 = vst [vmem:[#allocation65_spill] sm:$0xff] %v12416_v44  ;;  %14189 = vst [vmem:[#allocation66_spill] sm:$0xff] %v12418_v10  ;;  %v1068_v32 = vpack.c.bf16 %v12418_v10, %v12416_v44  ;;  %v12431_v11 = vld [vmem:[#allocation2 + $0x109] sm:$0xff]  ;;  %v9888_v41 = vpop.f32.mrb[36].mxu0  ;;  %9938 = vmatprep.mubr.msk.bf16.mxu0 %vm389_vm1, %v1148_v22  ;;  %v12443_v16 = vld [vmem:[#allocation2 + $0x111] sm:$0xff] }
 0x13a   : > { %989 = vst.msk [vmem:[#allocation2 + $0x128] sm:$0xff] %vm389_vm1, %v941_v52  ;;  %v946_v40 = vmax.f32 %v9888_v41, 0.0  ;;  %v861_v12 = vpop.f32.mrb[37].mxu0 }
 0x13b   : > { %9994 = vmatprep.mubr.msk.bf16.mxu1 %vm389_vm1, %v1068_v32  ;;  %v944_v23 = vmax.f32 %v861_v12, 0.0  ;;  %v9889_v36 = vpop.f32.mrb[38].mxu0  ;;  %v12457_v7 = vld [vmem:[#allocation2 + $0x130] sm:$0xff] }
 0x13c   : > { %994 = vst.msk [vmem:[#allocation2 + $0x150] sm:$0xff] %vm389_vm1, %v946_v40  ;;  %v947_v52 = vmax.f32 %v9889_v36, 0.0  ;;  %v864_v46 = vpop.f32.mrb[39].mxu0  ;;  %v12446_v10 = vld [vmem:[#allocation2 + $0x120] sm:$0xff]  ;;  %14192 = vst [vmem:[#allocation69_spill] sm:$0xff] %v12457_v7 }
 0x13d   : > { %14190 = vst [vmem:[#allocation67_spill] sm:$0xff] %v12446_v10  ;;  %v12448_v58 = vld [vmem:[#allocation2 + $0x11f] sm:$0xff]  ;;  %992 = vst.msk [vmem:[#allocation2 + $0x140] sm:$0xff] %vm389_vm1, %v944_v23  ;;  %v945_v32 = vmax.f32 %v864_v46, 0.0  ;;  %v1149_v41 = vpack.c.bf16 %v12446_v10, %v12407_v48 }
 0x13e   : > { %14191 = vst [vmem:[#allocation68_spill] sm:$0xff] %v12448_v58  ;;  %v12450_v22 = vld [vmem:[#allocation2 + $0x119] sm:$0xff]  ;;  %v1069_v12 = vpack.c.bf16 %v12448_v58, %v12409_v21  ;;  %995 = vst.msk [vmem:[#allocation2 + $0x158] sm:$0xff] %vm389_vm1, %v947_v52  ;;  %v12495_v6 = vld [vmem:[#allocation2 + $0x131] sm:$0xff] }
 0x13f   : > { %v12459_v40 = vld [vmem:[#allocation2 + $0x138] sm:$0xff]  ;;  %993 = vst.msk [vmem:[#allocation2 + $0x148] sm:$0xff] %vm389_vm1, %v945_v32  ;;  %9939 = vmatmul.mubr.msk.bf16.gmra.mrb[80].mxu0 %vm389_vm1, %v1149_v41 }
 0x140   : > { %14193 = vst [vmem:[#allocation70_spill] sm:$0xff] %v12459_v40  ;;  %v12461_v36 = vld [vmem:[#allocation2 + $0x137] sm:$0xff]  ;;  %9995 = vmatmul.mubr.msk.bf16.gmra.mrb[32].mxu1 %vm389_vm1, %v1069_v12 }
 0x141   : > { %14194 = vst [vmem:[#allocation71_spill] sm:$0xff] %v12461_v36  ;;  %v12466_v37 = vld [vmem:[#allocation2 + $0x128] sm:$0xff]  ;;  %v9892_v12 = vpop.f32.mrb[40].mxu0 }
 0x142   : > { %14195 = vst [vmem:[#allocation72_spill] sm:$0xff] %v12466_v37  ;;  %v12468_v23 = vld [vmem:[#allocation2 + $0x127] sm:$0xff]  ;;  %v12470_v46 = vld [vmem:[#allocation2 + $0x12f] sm:$0xff]  ;;  %v1150_v13 = vpack.c.bf16 %v12457_v7, %v12466_v37  ;;  %v950_v7 = vmax.f32 %v9892_v12, 0.0  ;;  %v877_v59 = vpop.f32.mrb[41].mxu0 }
 0x143   : > { %14196 = vst [vmem:[#allocation73_spill] sm:$0xff] %v12468_v23  ;;  %14197 = vst [vmem:[#allocation74_spill] sm:$0xff] %v12470_v46  ;;  %v1070_v52 = vpack.c.bf16 %v12470_v46, %v12468_v23  ;;  %v12481_v21 = vld [vmem:[#allocation2 + $0x121] sm:$0xff]  ;;  %v12483_v49 = vld [vmem:[#allocation2 + $0x129] sm:$0xff]  ;;  %v948_v33 = vmax.f32 %v877_v59, 0.0  ;;  %v9893_v15 = vpop.f32.mrb[42].mxu0 }
 0x144   : > { %9942 = vmatprep.mubr.msk.bf16.mxu0 %vm389_vm1, %v1150_v13  ;;  %998 = vst.msk [vmem:[#allocation2 + $0x170] sm:$0xff] %vm389_vm1, %v950_v7  ;;  %v951_v32 = vmax.f32 %v9893_v15, 0.0  ;;  %v880_v44 = vpop.f32.mrb[43].mxu0  ;;  %v12498_v46 = vld [vmem:[#allocation2 + $0x140] sm:$0xff]  ;;  %v12509_v48 = vld [vmem:[#allocation2 + $0x150] sm:$0xff] }
 0x145   : > { %9998 = vmatprep.mubr.msk.bf16.mxu1 %vm389_vm1, %v1070_v52  ;;  %14198 = vst [vmem:[#allocation75_spill] sm:$0xff] %v12498_v46  ;;  %v12500_v41 = vld [vmem:[#allocation2 + $0x13f] sm:$0xff]  ;;  %996 = vst.msk [vmem:[#allocation2 + $0x160] sm:$0xff] %vm389_vm1, %v948_v33  ;;  %v949_v52 = vmax.f32 %v880_v44, 0.0  ;;  %v1151_v12 = vpack.c.bf16 %v12498_v46, %v12459_v40  ;;  %v12513_v15 = vld [vmem:[#allocation2 + $0x157] sm:$0xff] }
 0x146   : > { %14199 = vst [vmem:[#allocation76_spill] sm:$0xff] %v12500_v41  ;;  %v12502_v13 = vld [vmem:[#allocation2 + $0x139] sm:$0xff]  ;;  %v1071_v59 = vpack.c.bf16 %v12500_v41, %v12461_v36  ;;  %14200 = vst [vmem:[#allocation77_spill] sm:$0xff] %v12509_v48  ;;  %v12518_v37 = vld [vmem:[#allocation2 + $0x148] sm:$0xff] }
 0x147   : > { %v12511_v7 = vld [vmem:[#allocation2 + $0x158] sm:$0xff]  ;;  %14202 = vst [vmem:[#allocation79_spill] sm:$0xff] %v12513_v15  ;;  %999 = vst.msk [vmem:[#allocation2 + $0x178] sm:$0xff] %vm389_vm1, %v951_v32  ;;  %v12520_v33 = vld [vmem:[#allocation2 + $0x147] sm:$0xff]  ;;  %9943 = vmatmul.mubr.msk.bf16.gmra.mrb[84].mxu0 %vm389_vm1, %v1151_v12  ;;  %v1152_v10 = vpack.c.bf16 %v12509_v48, %v12518_v37 }
 0x148   : > { %14201 = vst [vmem:[#allocation78_spill] sm:$0xff] %v12511_v7  ;;  %14203 = vst [vmem:[#allocation80_spill] sm:$0xff] %v12518_v37  ;;  %v12522_v44 = vld [vmem:[#allocation2 + $0x14f] sm:$0xff]  ;;  %9999 = vmatmul.mubr.msk.bf16.gmra.mrb[36].mxu1 %vm389_vm1, %v1071_v59  ;;  %v12533_v36 = vld [vmem:[#allocation2 + $0x141] sm:$0xff] }
 0x149   : > { %14204 = vst [vmem:[#allocation81_spill] sm:$0xff] %v12520_v33  ;;  %14205 = vst [vmem:[#allocation82_spill] sm:$0xff] %v12522_v44  ;;  %v1072_v32 = vpack.c.bf16 %v12522_v44, %v12520_v33  ;;  %v12535_v58 = vld [vmem:[#allocation2 + $0x149] sm:$0xff]  ;;  %v9896_v59 = vpop.f32.mrb[44].mxu0  ;;  %9946 = vmatprep.mubr.msk.bf16.mxu0 %vm389_vm1, %v1152_v10  ;;  %v12547_v30 = vld [vmem:[#allocation2 + $0x151] sm:$0xff] }
 0x14a   : > { %997 = vst.msk [vmem:[#allocation2 + $0x168] sm:$0xff] %vm389_vm1, %v949_v52  ;;  %v954_v48 = vmax.f32 %v9896_v59, 0.0  ;;  %v893_v61 = vpop.f32.mrb[45].mxu0 }
 0x14b   : > { %10002 = vmatprep.mubr.msk.bf16.mxu1 %vm389_vm1, %v1072_v32  ;;  %v952_v14 = vmax.f32 %v893_v61, 0.0  ;;  %v9897_v35 = vpop.f32.mrb[46].mxu0  ;;  %v12561_v40 = vld [vmem:[#allocation2 + $0x170] sm:$0xff] }
 0x14c   : > { %1002 = vst.msk [vmem:[#allocation2 + $0x190] sm:$0xff] %vm389_vm1, %v954_v48  ;;  %v955_v52 = vmax.f32 %v9897_v35, 0.0  ;;  %v896_v23 = vpop.f32.mrb[47].mxu0  ;;  %v12550_v44 = vld [vmem:[#allocation2 + $0x160] sm:$0xff]  ;;  %14208 = vst [vmem:[#allocation85_spill] sm:$0xff] %v12561_v40 }
 0x14d   : > { %14206 = vst [vmem:[#allocation83_spill] sm:$0xff] %v12550_v44  ;;  %v12552_v12 = vld [vmem:[#allocation2 + $0x15f] sm:$0xff]  ;;  %1000 = vst.msk [vmem:[#allocation2 + $0x180] sm:$0xff] %vm389_vm1, %v952_v14  ;;  %v953_v32 = vmax.f32 %v896_v23, 0.0  ;;  %v1153_v59 = vpack.c.bf16 %v12550_v44, %v12511_v7  ;;  %v1807_v7 = vld [vmem:[#allocation2 + $0x11] sm:$0xff] }
 0x14e   : > { %14207 = vst [vmem:[#allocation84_spill] sm:$0xff] %v12552_v12  ;;  %v12554_v10 = vld [vmem:[#allocation2 + $0x159] sm:$0xff]  ;;  %v1073_v61 = vpack.c.bf16 %v12552_v12, %v12513_v15  ;;  %1003 = vst.msk [vmem:[#allocation2 + $0x198] sm:$0xff] %vm389_vm1, %v955_v52  ;;  %v12599_v24 = vld [vmem:[#allocation2 + $0x171] sm:$0xff] }
 0x14f   : > { %v12563_v48 = vld [vmem:[#allocation2 + $0x178] sm:$0xff]  ;;  %1001 = vst.msk [vmem:[#allocation2 + $0x188] sm:$0xff] %vm389_vm1, %v953_v32  ;;  %9947 = vmatmul.mubr.msk.bf16.gmra.mrb[88].mxu0 %vm389_vm1, %v1153_v59  ;;  %14213 = vst [vmem:[#allocation90_spill] sm:$0xff] %v12599_v24 }
 0x150   : > { %14209 = vst [vmem:[#allocation86_spill] sm:$0xff] %v12563_v48  ;;  %v12565_v35 = vld [vmem:[#allocation2 + $0x177] sm:$0xff]  ;;  %10003 = vmatmul.mubr.msk.bf16.gmra.mrb[40].mxu1 %vm389_vm1, %v1073_v61  ;;  %v1806_v61 = vld [vmem:[#allocation2 + $0x9] sm:$0xff] }
 0x151   : > { %14210 = vst [vmem:[#allocation87_spill] sm:$0xff] %v12565_v35  ;;  %v12570_v37 = vld [vmem:[#allocation2 + $0x168] sm:$0xff]  ;;  %v1854_v12 = vpack.c.bf16 %v1807_v7, %v1806_v61 }
 0x152   : > { %14211 = vst [vmem:[#allocation88_spill] sm:$0xff] %v12570_v37  ;;  %v12572_v14 = vld [vmem:[#allocation2 + $0x167] sm:$0xff]  ;;  %v12574_v23 = vld [vmem:[#allocation2 + $0x16f] sm:$0xff]  ;;  %v1154_v46 = vpack.c.bf16 %v12561_v40, %v12570_v37 }
 0x153   : > { %14212 = vst [vmem:[#allocation89_spill] sm:$0xff] %v12574_v23  ;;  %v1074_v52 = vpack.c.bf16 %v12574_v23, %v12572_v14  ;;  %v12585_v15 = vld [vmem:[#allocation2 + $0x161] sm:$0xff]  ;;  %v12587_v41 = vld [vmem:[#allocation2 + $0x169] sm:$0xff]  ;;  %v11630_v23 = vld [vmem:[%s14026_s2 + $0x78] sm:$0xff]  }
 0x154   : > { %9950 = vmatprep.mubr.msk.bf16.mxu0 %vm389_vm1, %v1154_v46  ;;  %v12601_v34 = vld [vmem:[#allocation2 + $0x180] sm:$0xff]  ;;  %v12617_v37 = vld [vmem:[#allocation2 + $0x190] sm:$0xff] }
 0x155   : > { %10006 = vmatprep.mubr.msk.bf16.mxu1 %vm389_vm1, %v1074_v52  ;;  %14214 = vst [vmem:[#allocation91_spill] sm:$0xff] %v12601_v34  ;;  %v12603_v33 = vld [vmem:[#allocation2 + $0x17f] sm:$0xff]  ;;  %v1155_v59 = vpack.c.bf16 %v12601_v34, %v12563_v48  ;;  %v12625_v48 = vld [vmem:[#allocation2 + $0x191] sm:$0xff] }
 0x156   : > { %14215 = vst [vmem:[#allocation92_spill] sm:$0xff] %v12603_v33  ;;  %v12605_v32 = vld [vmem:[#allocation2 + $0x179] sm:$0xff]  ;;  %v1075_v46 = vpack.c.bf16 %v12603_v33, %v12565_v35  ;;  %v12613_v44 = vld [vmem:[#allocation2 + $0x187] sm:$0xff]  ;;  %v12615_v40 = vld [vmem:[#allocation2 + $0x18f] sm:$0xff]  ;;  %v1856_v33 = vpack.c.bf16 %v12084_v20, %v12071_v9 }
 0x157   : > { %14216 = vst [vmem:[#allocation93_spill] sm:$0xff] %v12605_v32  ;;  %9951 = vmatmul.mubr.msk.bf16.gmra.mrb[92].mxu0 %vm389_vm1, %v1155_v59  ;;  %v12621_v7 = vld [vmem:[#allocation2 + $0x188] sm:$0xff]  ;;  %14217 = vst [vmem:[#allocation94_spill] sm:$0xff] %v12625_v48  ;;  %v1808_v59 = vld [vmem:[#allocation2 + $0x19] sm:$0xff] }
 0x158   : > { %10007 = vmatmul.mubr.msk.bf16.gmra.mrb[44].mxu1 %vm389_vm1, %v1075_v46  ;;  %v12623_v61 = vld [vmem:[#allocation2 + $0x189] sm:$0xff]  ;;  %v1855_v46 = vpack.c.bf16 %v12069_v8, %v1808_v59  ;;  %v1857_v59 = vpack.c.bf16 %v12111_v38, %v12089_v25  ;;  %v14221_v34 = vld [vmem:[#allocation10_spill] sm:$0xff]  ;;  %v14239_v48 = vld [vmem:[#allocation29_spill] sm:$0xff] }
 0x159   : > { %10018 = vmatprep.mubr.msk.bf16.mxu1 %vm389_vm1, %v1854_v12  ;;  %v11628_v35 = vld [vmem:[%s14026_s2 + $0x68] sm:$0xff]   ;;  %v11629_v12 = vld [vmem:[%s14026_s2 + $0x70] sm:$0xff]  }
 0x160   : > { %10019 = vmatmul.mubr.msk.bf16.vlgmr.msra.gmra.mrb[0].mxu1 %vm389_vm1, %v1855_v46  ;;  %v1858_v46 = vpack.c.bf16 %v12140_v56, %v12113_v39 }
 0x161   : > { %10067 = vmatpush3.bf16.msra.mxu1 %v12132_v47  ;;  %10022 = vmatprep.mubr.msk.bf16.mxu1 %vm389_vm1, %v1856_v33  ;;  %v11631_v47 = vld [vmem:[%s14026_s2 + $0x80] sm:$0xff]   ;;  %v1859_v33 = vpack.c.bf16 %v12165_v18, %v12145_v62 }
 0x162   : > { %10068 = vmatprep.subr.bf16.mxu1 %v11628_v35 }
 0x165   : > { %10069 = vmatpush3.bf16.msra.mxu1 %v11628_v35  ;;  %v1860_v35 = vpack.c.bf16 %v12189_v54, %v12167_v19 }
 0x166   : > { %10070 = vmatprep.subr.bf16.mxu1 %v11629_v12 }
 0x168   : > { %10023 = vmatmul.mubr.msk.bf16.gmra.mrb[4].mxu1 %vm389_vm1, %v1857_v59  ;;  %v1862_v59 = vpack.c.bf16 %v12237_v45, %v12215_v57 }
 0x169   : > { %10026 = vmatprep.mubr.msk.bf16.mxu1 %vm389_vm1, %v1858_v46  ;;  %10071 = vmatpush3.bf16.msra.mxu1 %v11629_v12  ;;  %v1861_v12 = vpack.c.bf16 %v12213_v53, %v12194_v63  ;;  %v1864_v46 = vpack.c.bf16 %v12287_v17, %v12263_v51 }
 0x16a   : > { %10072 = vmatprep.subr.bf16.mxu1 %v11630_v23 }
 0x16d   : > { %10073 = vmatpush3.bf16.msra.mxu1 %v11630_v23  ;;  %v1863_v23 = vpack.c.bf16 %v12261_v2, %v12242_v3 }
 0x16e   : > { %10122 = vmatprep.subr.bf16.mxu1 %v11631_v47 }
 0x170   : > { %10027 = vmatmul.mubr.msk.bf16.gmra.mrb[8].mxu1 %vm389_vm1, %v1859_v33  ;;  %v1865_v33 = vpack.c.bf16 %v12325_v42, %v12294_v50 }
 0x171   : > { %10030 = vmatprep.mubr.msk.bf16.mxu1 %vm389_vm1, %v1860_v35  ;;  %v1866_v35 = vpack.c.bf16 %v12339_v26, %v12327_v28 }
 0x178   : > { %10031 = vmatmul.mubr.msk.bf16.gmra.mrb[12].mxu1 %vm389_vm1, %v1861_v12  ;;  %v1867_v12 = vpack.c.bf16 %v12377_v29, %v12346_v0 }
 0x179   : > { %10034 = vmatprep.mubr.msk.bf16.mxu1 %vm389_vm1, %v1862_v59  ;;  %v1868_v59 = vpack.c.bf16 %v12391_v55, %v12379_v27 }
 0x180   : > { %10035 = vmatmul.mubr.msk.bf16.gmra.mrb[16].mxu1 %vm389_vm1, %v1863_v23  ;;  %v1869_v23 = vpack.c.bf16 %v12429_v31, %v12398_v43 }
 0x181   : > { %10038 = vmatprep.mubr.msk.bf16.mxu1 %vm389_vm1, %v1864_v46  ;;  %v1870_v46 = vpack.c.bf16 %v12443_v16, %v12431_v11 }
 0x188   : > { %10039 = vmatmul.mubr.msk.bf16.gmra.mrb[20].mxu1 %vm389_vm1, %v1865_v33  ;;  %v1871_v33 = vpack.c.bf16 %v12481_v21, %v12450_v22 }
 0x189   : > { %10042 = vmatprep.mubr.msk.bf16.mxu1 %vm389_vm1, %v1866_v35  ;;  %v1872_v35 = vpack.c.bf16 %v12495_v6, %v12483_v49 }
 0x190   : > { %10043 = vmatmul.mubr.msk.bf16.gmra.mrb[24].mxu1 %vm389_vm1, %v1867_v12  ;;  %v1873_v12 = vpack.c.bf16 %v12533_v36, %v12502_v13 }
 0x191   : > { %10046 = vmatprep.mubr.msk.bf16.mxu1 %vm389_vm1, %v1868_v59  ;;  %v1874_v59 = vpack.c.bf16 %v12547_v30, %v12535_v58 }
 0x198   : > { %10047 = vmatmul.mubr.msk.bf16.gmra.mrb[28].mxu1 %vm389_vm1, %v1869_v23  ;;  %v1875_v23 = vpack.c.bf16 %v12585_v15, %v12554_v10 }
 0x199   : > { %10050 = vmatprep.mubr.msk.bf16.mxu1 %vm389_vm1, %v1870_v46  ;;  %v1876_v46 = vpack.c.bf16 %v12599_v24, %v12587_v41 }
 0x1a0   : > { %10051 = vmatmul.mubr.msk.bf16.gmra.mrb[32].mxu1 %vm389_vm1, %v1871_v33  ;;  %v12712_v33 = vld [vmem:[#allocation2 + $0x181] sm:$0xff] }
 0x1a1   : > { %10054 = vmatprep.mubr.msk.bf16.mxu1 %vm389_vm1, %v1872_v35  ;;  %v1877_v35 = vpack.c.bf16 %v12712_v33, %v12605_v32  ;;  %v14256_v32 = vld [vmem:[#allocation50_spill] sm:$0xff] }
 0x1a8   : > { %10055 = vmatmul.mubr.msk.bf16.gmra.mrb[36].mxu1 %vm389_vm1, %v1873_v12  ;;  %v14218_v12 = vpack.c.bf16 %v12060_v4, %v12050_v60  ;;  %v11633_v60 = vld [vmem:[%s14026_s2 + $0x90] sm:$0xff]   ;;  %v11634_v4 = vld [vmem:[%s14026_s2 + $0x98] sm:$0xff]  }
 0x1a9   : > { %10058 = vmatprep.mubr.msk.bf16.mxu1 %vm389_vm1, %v1874_v59  ;;  %v11632_v59 = vld [vmem:[%s14026_s2 + $0x88] sm:$0xff]  }
 0x1b0   : > { %10059 = vmatmul.mubr.msk.bf16.gmra.mrb[40].mxu1 %vm389_vm1, %v1875_v23  ;;  %v14219_v23 = vpack.c.bf16 %v12054_v1, %v12062_v5  ;;  %v14223_v1 = vld [vmem:[#allocation11_spill] sm:$0xff]  ;;  %v14224_v5 = vld [vmem:[#allocation13_spill] sm:$0xff] }
 0x1b1   : > { %10062 = vmatprep.mubr.msk.bf16.mxu1 %vm389_vm1, %v1876_v46  ;;  %v14220_v46 = vld [vmem:[#allocation12_spill] sm:$0xff] }
 0x1b2   : > { %v14222_v52 = vpack.c.bf16 %v14220_v46, %v14221_v34  ;;  %v14227_v34 = vld [vmem:[#allocation18_spill] sm:$0xff] }
 0x1b8   : > { %10063 = vmatmul.mubr.msk.bf16.gmra.mrb[44].mxu1 %vm389_vm1, %v1877_v35  ;;  %v14225_v35 = vpack.c.bf16 %v14223_v1, %v14224_v5  ;;  %v14232_v1 = vld [vmem:[#allocation28_spill] sm:$0xff]  ;;  %v14233_v5 = vld [vmem:[#allocation26_spill] sm:$0xff] }
 0x1b9   : > { %10074 = vmatprep.mubr.msk.bf16.mxu1 %vm389_vm1, %v14218_v12 }
 0x1c0   : > { %10075 = vmatmul.mubr.msk.bf16.vlgmr.msra.gmra.mrb[0].mxu1 %vm389_vm1, %v14219_v23  ;;  %v14230_v23 = vld [vmem:[#allocation21_spill] sm:$0xff] }
 0x1c1   : > { %10123 = vmatpush3.bf16.msra.mxu1 %v11631_v47  ;;  %10078 = vmatprep.mubr.msk.bf16.mxu1 %vm389_vm1, %v14222_v52  ;;  %v14226_v47 = vld [vmem:[#allocation20_spill] sm:$0xff]  ;;  %v12749_v52 = vld [vmem:[%s14026_s2 + $0xa0] sm:$0xff]  }
 0x1c2   : > { %10124 = vmatprep.subr.bf16.mxu1 %v11632_v59  ;;  %v14228_v12 = vpack.c.bf16 %v14226_v47, %v14227_v34 }
 0x1c5   : > { %10125 = vmatpush3.bf16.msra.mxu1 %v11632_v59  ;;  %v14229_v59 = vld [vmem:[#allocation19_spill] sm:$0xff] }
 0x1c6   : > { %10126 = vmatprep.subr.bf16.mxu1 %v11633_v60  ;;  %v14231_v46 = vpack.c.bf16 %v14229_v59, %v14230_v23  ;;  %v14241_v59 = vld [vmem:[#allocation36_spill] sm:$0xff]  ;;  %v14242_v23 = vld [vmem:[#allocation34_spill] sm:$0xff] }
 0x1c8   : > { %10079 = vmatmul.mubr.msk.bf16.gmra.mrb[4].mxu1 %vm389_vm1, %v14225_v35  ;;  %v14234_v35 = vpack.c.bf16 %v14232_v1, %v14233_v5 }
 0x1c9   : > { %10082 = vmatprep.mubr.msk.bf16.mxu1 %vm389_vm1, %v14228_v12  ;;  %10127 = vmatpush3.bf16.msra.mxu1 %v11633_v60 }
 0x1ca   : > { %10128 = vmatprep.subr.bf16.mxu1 %v11634_v4 }
 0x1cd   : > { %10129 = vmatpush3.bf16.msra.mxu1 %v11634_v4  ;;  %v14238_v4 = vld [vmem:[#allocation27_spill] sm:$0xff] }
 0x1ce   : > { %10178 = vmatprep.subr.bf16.mxu1 %v12749_v52  ;;  %v14240_v24 = vpack.c.bf16 %v14238_v4, %v14239_v48  ;;  %v14250_v48 = vld [vmem:[#allocation49_spill] sm:$0xff]  ;;  %v14251_v4 = vld [vmem:[#allocation44_spill] sm:$0xff] }
 0x1d0   : > { %10083 = vmatmul.mubr.msk.bf16.gmra.mrb[8].mxu1 %vm389_vm1, %v14231_v46  ;;  %v14243_v46 = vpack.c.bf16 %v14241_v59, %v14242_v23 }
 0x1d1   : > { %10086 = vmatprep.mubr.msk.bf16.mxu1 %vm389_vm1, %v14234_v35 }
 0x1d2   : > { %v9908_v60 = vpop.f32.mrb[48].mxu0 }
 0x1d3   : > { %v12760_v47 = vpop.f32.mrb[49].mxu0 }
 0x1d4   : > { %14235 = vst [vmem:[#allocation12_spill] sm:$0xff] %v12760_v47  ;;  %v12762_v34 = vpop.f32.mrb[50].mxu0  ;;  %v14248_v47 = vld [vmem:[#allocation37_spill] sm:$0xff] }
 0x1d5   : > { %14236 = vst [vmem:[#allocation10_spill] sm:$0xff] %v12762_v34  ;;  %v12764_v12 = vpop.f32.mrb[51].mxu0  ;;  %v14247_v34 = vld [vmem:[#allocation35_spill] sm:$0xff] }
 0x1d6   : > { %14237 = vst [vmem:[#allocation11_spill] sm:$0xff] %v12764_v12  ;;  %v14249_v12 = vpack.c.bf16 %v14247_v34, %v14248_v47  ;;  %v14259_v47 = vld [vmem:[#allocation52_spill] sm:$0xff] }
 0x1d8   : > { %10087 = vmatmul.mubr.msk.bf16.gmra.mrb[12].mxu1 %vm389_vm1, %v14240_v24  ;;  %v14252_v24 = vpack.c.bf16 %v14250_v48, %v14251_v4 }
 0x1d9   : > { %10090 = vmatprep.mubr.msk.bf16.mxu1 %vm389_vm1, %v14243_v46 }
 0x1da   : > { %v12774_v1 = vpop.f32.mrb[52].mxu0 }
 0x1db   : > { %14244 = vst [vmem:[#allocation13_spill] sm:$0xff] %v12774_v1  ;;  %v12776_v5 = vpop.f32.mrb[53].mxu0 }
 0x1dc   : > { %14245 = vst [vmem:[#allocation20_spill] sm:$0xff] %v12776_v5  ;;  %v12778_v35 = vpop.f32.mrb[54].mxu0  ;;  %v14255_v5 = vld [vmem:[#allocation47_spill] sm:$0xff] }
 0x1dd   : > { %14246 = vst [vmem:[#allocation18_spill] sm:$0xff] %v12778_v35  ;;  %v1313_v60 = vpop.f32.mrb[55].mxu0  ;;  %v14257_v35 = vpack.c.bf16 %v14255_v5, %v14256_v32  ;;  %v14267_v32 = vld [vmem:[#allocation65_spill] sm:$0xff]  ;;  %v14268_v5 = vld [vmem:[#allocation60_spill] sm:$0xff] }
 0x1de   : > { %v14258_v60 = vld [vmem:[#allocation57_spill] sm:$0xff] }
 0x1df   : > { %v14260_v34 = vpack.c.bf16 %v14258_v60, %v14259_v47 }
 0x1e0   : > { %10091 = vmatmul.mubr.msk.bf16.gmra.mrb[16].mxu1 %vm389_vm1, %v14249_v12 }
 0x1e1   : > { %10094 = vmatprep.mubr.msk.bf16.mxu1 %vm389_vm1, %v14252_v24 }
 0x1e2   : > { %v12788_v59 = vpop.f32.mrb[56].mxu0 }
 0x1e3   : > { %14253 = vst [vmem:[#allocation19_spill] sm:$0xff] %v12788_v59  ;;  %v1326_v23 = vpop.f32.mrb[57].mxu0  ;;  %v14282_v59 = vld [vmem:[#allocation74_spill] sm:$0xff] }
 0x1e4   : > { %v9917_v46 = vpop.f32.mrb[58].mxu0  ;;  %v14264_v23 = vld [vmem:[#allocation55_spill] sm:$0xff] }
 0x1e5   : > { %v12790_v1 = vpop.f32.mrb[59].mxu0  ;;  %v14265_v46 = vld [vmem:[#allocation58_spill] sm:$0xff] }
 0x1e6   : > { %14254 = vst [vmem:[#allocation21_spill] sm:$0xff] %v12790_v1  ;;  %v14266_v1 = vpack.c.bf16 %v14264_v23, %v14265_v46  ;;  %v14276_v23 = vld [vmem:[#allocation73_spill] sm:$0xff]  ;;  %v14277_v46 = vld [vmem:[#allocation68_spill] sm:$0xff] }
 0x1e8   : > { %10095 = vmatmul.mubr.msk.bf16.gmra.mrb[20].mxu1 %vm389_vm1, %v14257_v35  ;;  %v14269_v35 = vpack.c.bf16 %v14267_v32, %v14268_v5 }
 0x1e9   : > { %10098 = vmatprep.mubr.msk.bf16.mxu1 %vm389_vm1, %v14260_v34 }
 0x1ea   : > { %v9920_v12 = vpop.f32.mrb[60].mxu0 }
 0x1eb   : > { %v12800_v48 = vpop.f32.mrb[61].mxu0 }
 0x1ec   : > { %14261 = vst [vmem:[#allocation28_spill] sm:$0xff] %v12800_v48  ;;  %v12802_v4 = vpop.f32.mrb[62].mxu0  ;;  %v14274_v48 = vld [vmem:[#allocation66_spill] sm:$0xff] }
 0x1ed   : > { %14262 = vst [vmem:[#allocation26_spill] sm:$0xff] %v12802_v4  ;;  %v12804_v24 = vpop.f32.mrb[63].mxu0  ;;  %v14273_v4 = vld [vmem:[#allocation63_spill] sm:$0xff] }
 0x1ee   : > { %14263 = vst [vmem:[#allocation27_spill] sm:$0xff] %v12804_v24  ;;  %v14275_v24 = vpack.c.bf16 %v14273_v4, %v14274_v48  ;;  %v14285_v48 = vld [vmem:[#allocation76_spill] sm:$0xff] }
 0x1f0   : > { %10099 = vmatmul.mubr.msk.bf16.gmra.mrb[24].mxu1 %vm389_vm1, %v14266_v1  ;;  %v14278_v1 = vpack.c.bf16 %v14276_v23, %v14277_v46 }
 0x1f1   : > { %10102 = vmatprep.mubr.msk.bf16.mxu1 %vm389_vm1, %v14269_v35 }
 0x1f2   : > { %v12814_v60 = vpop.f32.mrb[64].mxu0 }
 0x1f3   : > { %14270 = vst [vmem:[#allocation29_spill] sm:$0xff] %v12814_v60  ;;  %v12816_v47 = vpop.f32.mrb[65].mxu0 }
 0x1f4   : > { %14271 = vst [vmem:[#allocation36_spill] sm:$0xff] %v12816_v47  ;;  %v12818_v34 = vpop.f32.mrb[66].mxu0  ;;  %v14281_v47 = vld [vmem:[#allocation71_spill] sm:$0xff] }
 0x1f5   : > { %14272 = vst [vmem:[#allocation34_spill] sm:$0xff] %v12818_v34  ;;  %v1361_v12 = vpop.f32.mrb[67].mxu0  ;;  %v14283_v34 = vpack.c.bf16 %v14281_v47, %v14282_v59  ;;  %v14293_v59 = vld [vmem:[#allocation84_spill] sm:$0xff] }
 0x1f6   : > { %v14284_v12 = vld [vmem:[#allocation81_spill] sm:$0xff]  ;;  %v14294_v47 = vpack.c.bf16 %v12572_v14, %v14293_v59  ;;  %v2705_v59 = vld [vmem:[#allocation2 + $0x28] sm:$0xff] }
 0x1f7   : > { %v14286_v4 = vpack.c.bf16 %v14284_v12, %v14285_v48 }
 0x1f8   : > { %10103 = vmatmul.mubr.msk.bf16.gmra.mrb[28].mxu1 %vm389_vm1, %v14275_v24 }
 0x1f9   : > { %10106 = vmatprep.mubr.msk.bf16.mxu1 %vm389_vm1, %v14278_v1 }
 0x1fa   : > { %v12828_v32 = vpop.f32.mrb[68].mxu0 }
 0x1fb   : > { %14279 = vst [vmem:[#allocation35_spill] sm:$0xff] %v12828_v32  ;;  %v1374_v5 = vpop.f32.mrb[69].mxu0 }
 0x1fc   : > { %v9929_v35 = vpop.f32.mrb[70].mxu0  ;;  %v14290_v5 = vld [vmem:[#allocation79_spill] sm:$0xff] }
 0x1fd   : > { %v12830_v60 = vpop.f32.mrb[71].mxu0  ;;  %v14291_v35 = vld [vmem:[#allocation82_spill] sm:$0xff] }
 0x1fe   : > { %14280 = vst [vmem:[#allocation37_spill] sm:$0xff] %v12830_v60  ;;  %v14292_v60 = vpack.c.bf16 %v14290_v5, %v14291_v35 }
 0x200   : > { %10107 = vmatmul.mubr.msk.bf16.gmra.mrb[32].mxu1 %vm389_vm1, %v14283_v34 }
 0x201   : > { %10110 = vmatprep.mubr.msk.bf16.mxu1 %vm389_vm1, %v14286_v4 }
 0x202   : > { %v9932_v24 = vpop.f32.mrb[72].mxu0 }
 0x203   : > { %v12840_v23 = vpop.f32.mrb[73].mxu0  ;;  %v14298_v24 = vld [vmem:[#allocation92_spill] sm:$0xff] }
 0x204   : > { %14287 = vst [vmem:[#allocation49_spill] sm:$0xff] %v12840_v23  ;;  %v12842_v46 = vpop.f32.mrb[74].mxu0  ;;  %v14300_v23 = vld [vmem:[#allocation89_spill] sm:$0xff] }
 0x205   : > { %14288 = vst [vmem:[#allocation44_spill] sm:$0xff] %v12842_v46  ;;  %v12844_v1 = vpop.f32.mrb[75].mxu0  ;;  %v14299_v46 = vld [vmem:[#allocation87_spill] sm:$0xff] }
 0x206   : > { %14289 = vst [vmem:[#allocation47_spill] sm:$0xff] %v12844_v1  ;;  %v2325_v1 = vpack.c.bf16 %v12613_v44, %v14298_v24  ;;  %v14301_v5 = vpack.c.bf16 %v14299_v46, %v14300_v23  ;;  %v2704_v24 = vld [vmem:[#allocation2 + $0x20] sm:$0xff] }
 0x208   : > { %10111 = vmatmul.mubr.msk.bf16.gmra.mrb[36].mxu1 %vm389_vm1, %v14292_v60  ;;  %v12869_v60 = vld [vmem:[#allocation2 + $0x197] sm:$0xff] }
 0x209   : > { %10114 = vmatprep.mubr.msk.bf16.mxu1 %vm389_vm1, %v14294_v47 }
 0x20a   : > { %v12854_v34 = vpop.f32.mrb[76].mxu0 }
 0x20b   : > { %14295 = vst [vmem:[#allocation50_spill] sm:$0xff] %v12854_v34  ;;  %v12856_v12 = vpop.f32.mrb[77].mxu0  ;;  %v11760_v34 = vld [vmem:[#allocation2 + $0x40] sm:$0xff] }
 0x20c   : > { %14296 = vst [vmem:[#allocation57_spill] sm:$0xff] %v12856_v12  ;;  %v12858_v48 = vpop.f32.mrb[78].mxu0 }
 0x20d   : > { %14297 = vst [vmem:[#allocation52_spill] sm:$0xff] %v12858_v48  ;;  %v1409_v4 = vpop.f32.mrb[79].mxu0  ;;  %v2752_v48 = vpack.c.bf16 %v2705_v59, %v2704_v24  ;;  %v11761_v59 = vld [vmem:[#allocation2 + $0x48] sm:$0xff] }
 0x20e   : > { %v2326_v4 = vpack.c.bf16 %v12869_v60, %v12615_v40  ;;  %v2754_v24 = vpack.c.bf16 %v11761_v59, %v11760_v34  ;;  %v11762_v34 = vld [vmem:[#allocation2 + $0x50] sm:$0xff] }
 0x20f   : > { %v14310_v59 = vld [vmem:[#allocation24_spill] sm:$0xff] }
 0x210   : > { %10115 = vmatmul.mubr.msk.bf16.gmra.mrb[40].mxu1 %vm389_vm1, %v14301_v5  ;;  %v2706_v5 = vld [vmem:[#allocation2 + $0x30] sm:$0xff] }
 0x211   : > { %10118 = vmatprep.mubr.msk.bf16.mxu1 %vm389_vm1, %v2325_v1 }
 0x212   : > { %v12867_v14 = vpop.f32.mrb[80].mxu0 }
 0x213   : > { %14302 = vst [vmem:[#allocation55_spill] sm:$0xff] %v12867_v14  ;;  %v1422_v35 = vpop.f32.mrb[81].mxu0 }
 0x214   : > { %v9941_v47 = vpop.f32.mrb[82].mxu0 }
 0x215   : > { %v12871_v12 = vpop.f32.mrb[83].mxu0  ;;  %v11759_v47 = vld [vmem:[#allocation2 + $0x38] sm:$0xff] }
 0x216   : > { %14303 = vst [vmem:[#allocation58_spill] sm:$0xff] %v12871_v12  ;;  %v2753_v14 = vpack.c.bf16 %v11759_v47, %v2706_v5  ;;  %v11636_v12 = vld [vmem:[%s14026_s2 + $0xa8] sm:$0xff]  }
 0x218   : > { %10119 = vmatmul.mubr.msk.bf16.gmra.mrb[44].mxu1 %vm389_vm1, %v2326_v4 }
 0x219   : > { %10130 = vmatprep.mubr.msk.bf16.mxu1 %vm389_vm1, %v2752_v48  ;;  %v11637_v48 = vld [vmem:[%s14026_s2 + $0xb0] sm:$0xff]  }
 0x21a   : > { %v9944_v23 = vpop.f32.mrb[84].mxu0 }
 0x21b   : > { %v12877_v46 = vpop.f32.mrb[85].mxu0 }
 0x21c   : > { %14304 = vst [vmem:[#allocation65_spill] sm:$0xff] %v12877_v46  ;;  %v12879_v1 = vpop.f32.mrb[86].mxu0  ;;  %v14316_v46 = vld [vmem:[#allocation32_spill] sm:$0xff] }
 0x21d   : > { %14305 = vst [vmem:[#allocation60_spill] sm:$0xff] %v12879_v1  ;;  %v12881_v35 = vpop.f32.mrb[87].mxu0 }
 0x21e   : > { %14306 = vst [vmem:[#allocation63_spill] sm:$0xff] %v12881_v35  ;;  %v14312_v35 = vld [vmem:[#allocation23_spill] sm:$0xff] }
 0x220   : > { %10131 = vmatmul.mubr.msk.bf16.vlgmr.msra.gmra.mrb[0].mxu1 %vm389_vm1, %v2753_v14  ;;  %v2755_v14 = vpack.c.bf16 %v14310_v59, %v11762_v34  ;;  %v14320_v59 = vld [vmem:[#allocation39_spill] sm:$0xff] }
 0x221   : > { %10179 = vmatpush3.bf16.msra.mxu1 %v12749_v52  ;;  %10134 = vmatprep.mubr.msk.bf16.mxu1 %vm389_vm1, %v2754_v24  ;;  %v11638_v52 = vld [vmem:[%s14026_s2 + $0xb8] sm:$0xff]   ;;  %v14311_v24 = vld [vmem:[#allocation22_spill] sm:$0xff] }
 0x222   : > { %10180 = vmatprep.subr.bf16.mxu1 %v11636_v12  ;;  %v12892_v4 = vpop.f32.mrb[88].mxu0  ;;  %v2756_v1 = vpack.c.bf16 %v14312_v35, %v14311_v24  ;;  %v14318_v35 = vld [vmem:[#allocation31_spill] sm:$0xff] }
 0x223   : > { %14307 = vst [vmem:[#allocation66_spill] sm:$0xff] %v12892_v4  ;;  %v12894_v23 = vpop.f32.mrb[89].mxu0  ;;  %v14315_v4 = vld [vmem:[#allocation25_spill] sm:$0xff] }
 0x224   : > { %14308 = vst [vmem:[#allocation73_spill] sm:$0xff] %v12894_v23  ;;  %v12896_v5 = vpop.f32.mrb[90].mxu0  ;;  %v2757_v32 = vpack.c.bf16 %v14316_v46, %v14315_v4  ;;  %v14329_v4 = vld [vmem:[#allocation45_spill] sm:$0xff] }
 0x225   : > { %14309 = vst [vmem:[#allocation68_spill] sm:$0xff] %v12896_v5  ;;  %10181 = vmatpush3.bf16.msra.mxu1 %v11636_v12  ;;  %v1457_v47 = vpop.f32.mrb[91].mxu0  ;;  %v11639_v12 = vld [vmem:[%s14026_s2 + $0xc0] sm:$0xff]  }
 0x226   : > { %10182 = vmatprep.subr.bf16.mxu1 %v11637_v48 }
 0x228   : > { %10135 = vmatmul.mubr.msk.bf16.gmra.mrb[4].mxu1 %vm389_vm1, %v2755_v14  ;;  %v14317_v14 = vld [vmem:[#allocation30_spill] sm:$0xff] }
 0x229   : > { %10138 = vmatprep.mubr.msk.bf16.mxu1 %vm389_vm1, %v2756_v1  ;;  %10183 = vmatpush3.bf16.msra.mxu1 %v11637_v48  ;;  %v2758_v1 = vpack.c.bf16 %v14318_v35, %v14317_v14  ;;  %v14319_v48 = vld [vmem:[#allocation33_spill] sm:$0xff]  ;;  %v14325_v35 = vld [vmem:[#allocation48_spill] sm:$0xff]  ;;  %v14326_v14 = vld [vmem:[#allocation43_spill] sm:$0xff] }
 0x22a   : > { %10184 = vmatprep.subr.bf16.mxu1 %v11638_v52  ;;  %v12909_v47 = vpop.f32.mrb[92].mxu0  ;;  %v2759_v24 = vpack.c.bf16 %v14320_v59, %v14319_v48  ;;  %v14335_v48 = vld [vmem:[#allocation53_spill] sm:$0xff] }
 0x22b   : > { %14313 = vst [vmem:[#allocation71_spill] sm:$0xff] %v12909_v47  ;;  %v1470_v34 = vpop.f32.mrb[93].mxu0  ;;  %v14321_v47 = vld [vmem:[#allocation38_spill] sm:$0xff] }
 0x22c   : > { %v9953_v5 = vpop.f32.mrb[94].mxu0  ;;  %v14322_v34 = vld [vmem:[#allocation40_spill] sm:$0xff] }
 0x22d   : > { %10185 = vmatpush3.bf16.msra.mxu1 %v11638_v52  ;;  %v12911_v23 = vpop.f32.mrb[95].mxu0  ;;  %v2760_v5 = vpack.c.bf16 %v14322_v34, %v14321_v47  ;;  %v14323_v52 = vld [vmem:[#allocation41_spill] sm:$0xff]  ;;  %v14331_v34 = vld [vmem:[#allocation56_spill] sm:$0xff]  ;;  %v14332_v47 = vld [vmem:[#allocation51_spill] sm:$0xff] }
 0x22e   : > { %14314 = vst [vmem:[#allocation74_spill] sm:$0xff] %v12911_v23  ;;  %10234 = vmatprep.subr.bf16.mxu1 %v11639_v12  ;;  %v14324_v23 = vld [vmem:[#allocation42_spill] sm:$0xff] }
 0x22f   : > { %v2761_v46 = vpack.c.bf16 %v14324_v23, %v14323_v52  ;;  %v14338_v52 = vld [vmem:[#allocation59_spill] sm:$0xff] }
 0x230   : > { %10139 = vmatmul.mubr.msk.bf16.gmra.mrb[8].mxu1 %vm389_vm1, %v2757_v32  ;;  %v14327_v32 = vpack.c.bf16 %v14325_v35, %v14326_v14  ;;  %v14340_v14 = vld [vmem:[#allocation62_spill] sm:$0xff] }
 0x231   : > { %10142 = vmatprep.mubr.msk.bf16.mxu1 %vm389_vm1, %v2758_v1  ;;  %v14328_v1 = vld [vmem:[#allocation46_spill] sm:$0xff] }
 0x232   : > { %v14330_v59 = vpack.c.bf16 %v14328_v1, %v14329_v4  ;;  %v14344_v1 = vld [vmem:[#allocation67_spill] sm:$0xff] }
 0x238   : > { %10143 = vmatmul.mubr.msk.bf16.gmra.mrb[12].mxu1 %vm389_vm1, %v2759_v24  ;;  %v14333_v24 = vpack.c.bf16 %v14331_v34, %v14332_v47  ;;  %v14346_v34 = vld [vmem:[#allocation70_spill] sm:$0xff] }
 0x239   : > { %10146 = vmatprep.mubr.msk.bf16.mxu1 %vm389_vm1, %v2760_v5  ;;  %v14334_v5 = vld [vmem:[#allocation54_spill] sm:$0xff] }
 0x23a   : > { %v14336_v23 = vpack.c.bf16 %v14334_v5, %v14335_v48  ;;  %v14349_v5 = vld [vmem:[#allocation80_spill] sm:$0xff] }
 0x240   : > { %10147 = vmatmul.mubr.msk.bf16.gmra.mrb[16].mxu1 %vm389_vm1, %v2761_v46  ;;  %v14337_v46 = vld [vmem:[#allocation64_spill] sm:$0xff] }
 0x241   : > { %10150 = vmatprep.mubr.msk.bf16.mxu1 %vm389_vm1, %v14327_v32  ;;  %v14339_v35 = vpack.c.bf16 %v14337_v46, %v14338_v52  ;;  %v14341_v32 = vld [vmem:[#allocation61_spill] sm:$0xff]  ;;  %v14352_v46 = vld [vmem:[#allocation78_spill] sm:$0xff] }
 0x242   : > { %v14342_v4 = vpack.c.bf16 %v14340_v14, %v14341_v32  ;;  %v14355_v32 = vld [vmem:[#allocation88_spill] sm:$0xff] }
 0x248   : > { %10151 = vmatmul.mubr.msk.bf16.gmra.mrb[20].mxu1 %vm389_vm1, %v14330_v59  ;;  %v14343_v59 = vld [vmem:[#allocation72_spill] sm:$0xff] }
 0x249   : > { %10154 = vmatprep.mubr.msk.bf16.mxu1 %vm389_vm1, %v14333_v24  ;;  %v14345_v47 = vpack.c.bf16 %v14343_v59, %v14344_v1  ;;  %v14347_v24 = vld [vmem:[#allocation69_spill] sm:$0xff]  ;;  %v14358_v1 = vld [vmem:[#allocation91_spill] sm:$0xff] }
 0x24a   : > { %v14348_v48 = vpack.c.bf16 %v14346_v34, %v14347_v24  ;;  %v14359_v34 = vld [vmem:[#allocation86_spill] sm:$0xff]  ;;  %v14360_v24 = vld [vmem:[#allocation85_spill] sm:$0xff] }
 0x250   : > { %10155 = vmatmul.mubr.msk.bf16.gmra.mrb[24].mxu1 %vm389_vm1, %v14336_v23  ;;  %v14350_v23 = vld [vmem:[#allocation75_spill] sm:$0xff] }
 0x251   : > { %10158 = vmatprep.mubr.msk.bf16.mxu1 %vm389_vm1, %v14339_v35  ;;  %v14351_v52 = vpack.c.bf16 %v14349_v5, %v14350_v23  ;;  %v14353_v35 = vld [vmem:[#allocation77_spill] sm:$0xff] }
 0x252   : > { %v14354_v14 = vpack.c.bf16 %v14352_v46, %v14353_v35  ;;  %v12979_v5 = vld [vmem:[#allocation2 + $0x198] sm:$0xff]  ;;  %v11640_v46 = vld [vmem:[%s14026_s2 + $0xc8] sm:$0xff]   ;;  %v14363_v35 = vpack.c.bf16 %v12089_v25, %v12084_v20  ;;  %v14365_v20 = vpack.c.bf16 %v12145_v62, %v12140_v56  ;;  %v14366_v25 = vpack.c.bf16 %v12167_v19, %v12165_v18 }
 0x253   : > { %v2775_v23 = vpack.c.bf16 %v12979_v5, %v12617_v37  ;;  %v14368_v56 = vpack.c.bf16 %v12215_v57, %v12213_v53  ;;  %v14369_v62 = vpack.c.bf16 %v12242_v3, %v12237_v45  ;;  %v14370_v18 = vpack.c.bf16 %v12263_v51, %v12261_v2  ;;  %v14383_v3 = vld [vmem:[#allocation93_spill] sm:$0xff]  ;;  %v14384_v2 = vld [vmem:[#allocation90_spill] sm:$0xff] }
 0x254   : > { %v14371_v19 = vpack.c.bf16 %v12294_v50, %v12287_v17  ;;  %v14373_v45 = vpack.c.bf16 %v12346_v0, %v12339_v26  ;;  %v14375_v53 = vpack.c.bf16 %v12398_v43, %v12391_v55  ;;  %v14377_v26 = vpack.c.bf16 %v12450_v22, %v12443_v16  ;;  %v13087_v50 = vld [vmem:[#allocation2 + $0x199] sm:$0xff]  ;;  %v11644_v22 = vld [vmem:[%s14026_s2 + $0xe8] sm:$0xff]  }
 0x255   : > { %v14379_v57 = vpack.c.bf16 %v12502_v13, %v12495_v6  ;;  %v14380_v55 = vpack.c.bf16 %v12535_v58, %v12533_v36  ;;  %v14381_v16 = vpack.c.bf16 %v12554_v10, %v12547_v30  ;;  %v3223_v6 = vpack.c.bf16 %v12623_v61, %v12712_v33  ;;  %v3603_v30 = vld [vmem:[#allocation2 + $0x3f] sm:$0xff]  ;;  %v3606_v58 = vld [vmem:[#allocation2 + $0x57] sm:$0xff]  ;;  %v3608_v13 = vld [vmem:[#allocation2 + $0x67] sm:$0xff] }
 0x256   : > { %v14385_v51 = vpack.c.bf16 %v14383_v3, %v14384_v2  ;;  %v14386_v17 = vld [vmem:[#allocation94_spill] sm:$0xff] }
 0x257   : > { %v3607_v43 = vld [vmem:[#allocation2 + $0x5f] sm:$0xff] }
 0x258   : > { %10159 = vmatmul.mubr.msk.bf16.gmra.mrb[28].mxu1 %vm389_vm1, %v14342_v4  ;;  %v14356_v4 = vld [vmem:[#allocation83_spill] sm:$0xff]  ;;  %v3652_v36 = vpack.c.bf16 %v3607_v43, %v3606_v58  ;;  %v3611_v10 = vld [vmem:[#allocation2 + $0x7f] sm:$0xff] }
 0x259   : > { %10162 = vmatprep.mubr.msk.bf16.mxu1 %vm389_vm1, %v14345_v47  ;;  %v14357_v59 = vpack.c.bf16 %v14355_v32, %v14356_v4  ;;  %v2774_v47 = vpack.c.bf16 %v12621_v7, %v14358_v1  ;;  %v11646_v32 = vld [vmem:[%s14026_s2 + $0xf8] sm:$0xff]   ;;  %v3612_v1 = vld [vmem:[#allocation2 + $0x87] sm:$0xff]  ;;  %v3641_v58 = vld [vmem:[#allocation2 + $0x16f] sm:$0xff] }
 0x25a   : > { %v3635_v3 = vld [vmem:[#allocation2 + $0x13f] sm:$0xff] }
 0x260   : > { %10163 = vmatmul.mubr.msk.bf16.gmra.mrb[32].mxu1 %vm389_vm1, %v14348_v48  ;;  %v14361_v48 = vpack.c.bf16 %v14359_v34, %v14360_v24  ;;  %v3615_v34 = vld [vmem:[#allocation2 + $0x9f] sm:$0xff] }
 0x261   : > { %10166 = vmatprep.mubr.msk.bf16.mxu1 %vm389_vm1, %v14351_v52  ;;  %v14362_v52 = vpack.c.bf16 %v12071_v9, %v12069_v8  ;;  %v11641_v8 = vld [vmem:[%s14026_s2 + $0xd0] sm:$0xff]   ;;  %v11642_v9 = vld [vmem:[%s14026_s2 + $0xd8] sm:$0xff]  }
 0x268   : > { %10167 = vmatmul.mubr.msk.bf16.gmra.mrb[36].mxu1 %vm389_vm1, %v14354_v14  ;;  %v14364_v14 = vpack.c.bf16 %v12113_v39, %v12111_v38  ;;  %v11643_v38 = vld [vmem:[%s14026_s2 + $0xe0] sm:$0xff]   ;;  %v14367_v39 = vpack.c.bf16 %v12194_v63, %v12189_v54  ;;  %v14372_v54 = vpack.c.bf16 %v12327_v28, %v12325_v42  ;;  %v14374_v63 = vpack.c.bf16 %v12379_v27, %v12377_v29 }
 0x269   : > { %10170 = vmatprep.mubr.msk.bf16.mxu1 %vm389_vm1, %v14357_v59  ;;  %v14376_v42 = vpack.c.bf16 %v12431_v11, %v12429_v31  ;;  %v14378_v29 = vpack.c.bf16 %v12483_v49, %v12481_v21  ;;  %v14382_v28 = vpack.c.bf16 %v12587_v41, %v12585_v15  ;;  %v3224_v27 = vpack.c.bf16 %v13087_v50, %v14386_v17  ;;  %v3602_v11 = vld [vmem:[#allocation2 + $0x37] sm:$0xff]  ;;  %v3604_v31 = vld [vmem:[#allocation2 + $0x47] sm:$0xff]  ;;  %v3605_v49 = vld [vmem:[#allocation2 + $0x4f] sm:$0xff] }
 0x26a   : > { %v3650_v0 = vpack.c.bf16 %v3603_v30, %v3602_v11  ;;  %v3651_v21 = vpack.c.bf16 %v3605_v49, %v3604_v31  ;;  %v11645_v41 = vld [vmem:[%s14026_s2 + $0xf0] sm:$0xff]   ;;  %v13109_v59 = vld [vmem:[%s14026_s2 + $0x100] sm:$0xff]  }
 0x26b   : > { %v3609_v15 = vld [vmem:[#allocation2 + $0x6f] sm:$0xff]  ;;  %v3638_v49 = vld [vmem:[#allocation2 + $0x157] sm:$0xff] }
 0x26c   : > { %v3653_v33 = vpack.c.bf16 %v3609_v15, %v3608_v13  ;;  %v3637_v11 = vld [vmem:[#allocation2 + $0x14f] sm:$0xff]  ;;  %v3647_v15 = vld [vmem:[#allocation2 + $0x19f] sm:$0xff] }
 0x270   : > { %10171 = vmatmul.mubr.msk.bf16.gmra.mrb[40].mxu1 %vm389_vm1, %v14361_v48  ;;  %v3614_v48 = vld [vmem:[#allocation2 + $0x97] sm:$0xff] }
 0x271   : > { %10174 = vmatprep.mubr.msk.bf16.mxu1 %vm389_vm1, %v2774_v47  ;;  %v3613_v47 = vld [vmem:[#allocation2 + $0x8f] sm:$0xff] }
 0x272   : > { %v3655_v24 = vpack.c.bf16 %v3613_v47, %v3612_v1  ;;  %v14388_v1 = vld [vmem:[#allocation14_spill] sm:$0xff]  ;;  %v14389_v47 = vld [vmem:[#allocation15_spill] sm:$0xff] }
 0x278   : > { %10175 = vmatmul.mubr.msk.bf16.gmra.mrb[44].mxu1 %vm389_vm1, %v2775_v23  ;;  %v3656_v23 = vpack.c.bf16 %v3615_v34, %v3614_v48  ;;  %v14390_v34 = vpack.c.bf16 %v14388_v1, %v14389_v47  ;;  %v14394_v48 = vld [vmem:[#allocation22_spill] sm:$0xff]  ;;  %v4087_v47 = vld [vmem:[#allocation2 + $0x158] sm:$0xff] }
 0x279   : > { %10186 = vmatprep.mubr.msk.bf16.mxu1 %vm389_vm1, %v14362_v52  ;;  %v3616_v52 = vld [vmem:[#allocation2 + $0xa7] sm:$0xff] }
 0x280   : > { %10187 = vmatmul.mubr.msk.bf16.vlgmr.msra.gmra.mrb[0].mxu1 %vm389_vm1, %v14363_v35  ;;  %v3619_v35 = vld [vmem:[#allocation2 + $0xbf] sm:$0xff] }
 0x281   : > { %10235 = vmatpush3.bf16.msra.mxu1 %v11639_v12  ;;  %10190 = vmatprep.mubr.msk.bf16.mxu1 %vm389_vm1, %v14364_v14  ;;  %v3610_v12 = vld [vmem:[#allocation2 + $0x77] sm:$0xff] }
 0x282   : > { %10236 = vmatprep.subr.bf16.mxu1 %v11640_v46  ;;  %v3654_v4 = vpack.c.bf16 %v3611_v10, %v3610_v12  ;;  %v3672_v10 = vpack.c.bf16 %v3647_v15, %v12869_v60  ;;  %v3648_v12 = vld [vmem:[#allocation2 + $0x1a7] sm:$0xff]  ;;  %v4083_v15 = vld [vmem:[#allocation2 + $0x138] sm:$0xff] }
 0x283   : > { %v11648_v60 = vld [vmem:[%s14026_s2 + $0x108] sm:$0xff]  }
 0x285   : > { %10237 = vmatpush3.bf16.msra.mxu1 %v11640_v46  ;;  %v3617_v46 = vld [vmem:[#allocation2 + $0xaf] sm:$0xff] }
 0x286   : > { %10238 = vmatprep.subr.bf16.mxu1 %v11641_v8  ;;  %v3657_v14 = vpack.c.bf16 %v3617_v46, %v3616_v52  ;;  %v11649_v46 = vld [vmem:[%s14026_s2 + $0x110] sm:$0xff]  }
 0x288   : > { %10191 = vmatmul.mubr.msk.bf16.gmra.mrb[4].mxu1 %vm389_vm1, %v14365_v20  ;;  %v3620_v20 = vld [vmem:[#allocation2 + $0xc7] sm:$0xff] }
 0x289   : > { %10194 = vmatprep.mubr.msk.bf16.mxu1 %vm389_vm1, %v14366_v25  ;;  %10239 = vmatpush3.bf16.msra.mxu1 %v11641_v8  ;;  %v3618_v8 = vld [vmem:[#allocation2 + $0xb7] sm:$0xff]  ;;  %v3621_v25 = vld [vmem:[#allocation2 + $0xcf] sm:$0xff] }
 0x28a   : > { %10240 = vmatprep.subr.bf16.mxu1 %v11642_v9 }
 0x28d   : > { %10241 = vmatpush3.bf16.msra.mxu1 %v11642_v9  ;;  %v3658_v9 = vpack.c.bf16 %v3619_v35, %v3618_v8  ;;  %v11650_v35 = vld [vmem:[%s14026_s2 + $0x118] sm:$0xff]   ;;  %v14398_v8 = vld [vmem:[#allocation23_spill] sm:$0xff] }
 0x28e   : > { %10290 = vmatprep.subr.bf16.mxu1 %v11643_v38 }
 0x290   : > { %10195 = vmatmul.mubr.msk.bf16.gmra.mrb[8].mxu1 %vm389_vm1, %v14367_v39  ;;  %v3659_v39 = vpack.c.bf16 %v3621_v25, %v3620_v20  ;;  %v14401_v20 = vld [vmem:[#allocation32_spill] sm:$0xff] }
 0x291   : > { %10198 = vmatprep.mubr.msk.bf16.mxu1 %vm389_vm1, %v14368_v56  ;;  %v3622_v56 = vld [vmem:[#allocation2 + $0xd7] sm:$0xff] }
 0x298   : > { %10199 = vmatmul.mubr.msk.bf16.gmra.mrb[12].mxu1 %vm389_vm1, %v14369_v62 }
 0x299   : > { %10202 = vmatprep.mubr.msk.bf16.mxu1 %vm389_vm1, %v14370_v18  ;;  %v3624_v18 = vld [vmem:[#allocation2 + $0xe7] sm:$0xff] }
 0x2a0   : > { %10203 = vmatmul.mubr.msk.bf16.gmra.mrb[16].mxu1 %vm389_vm1, %v14371_v19  ;;  %v3625_v19 = vld [vmem:[#allocation2 + $0xef] sm:$0xff] }
 0x2a1   : > { %10206 = vmatprep.mubr.msk.bf16.mxu1 %vm389_vm1, %v14372_v54  ;;  %v3627_v54 = vld [vmem:[#allocation2 + $0xff] sm:$0xff] }
 0x2a8   : > { %10207 = vmatmul.mubr.msk.bf16.gmra.mrb[20].mxu1 %vm389_vm1, %v14373_v45  ;;  %v3661_v45 = vpack.c.bf16 %v3625_v19, %v3624_v18  ;;  %v14407_v18 = vld [vmem:[#allocation39_spill] sm:$0xff] }
 0x2a9   : > { %10210 = vmatprep.mubr.msk.bf16.mxu1 %vm389_vm1, %v14374_v63  ;;  %v3626_v63 = vld [vmem:[#allocation2 + $0xf7] sm:$0xff] }
 0x2b0   : > { %10211 = vmatmul.mubr.msk.bf16.gmra.mrb[24].mxu1 %vm389_vm1, %v14375_v53  ;;  %v3662_v53 = vpack.c.bf16 %v3627_v54, %v3626_v63  ;;  %v4068_v54 = vld [vmem:[#allocation2 + $0xc0] sm:$0xff] }
 0x2b1   : > { %10214 = vmatprep.mubr.msk.bf16.mxu1 %vm389_vm1, %v14376_v42  ;;  %v3628_v42 = vld [vmem:[#allocation2 + $0x107] sm:$0xff] }
 0x2b8   : > { %10215 = vmatmul.mubr.msk.bf16.gmra.mrb[28].mxu1 %vm389_vm1, %v14377_v26  ;;  %v3629_v26 = vld [vmem:[#allocation2 + $0x10f] sm:$0xff] }
 0x2b9   : > { %10218 = vmatprep.mubr.msk.bf16.mxu1 %vm389_vm1, %v14378_v29  ;;  %v3631_v29 = vld [vmem:[#allocation2 + $0x11f] sm:$0xff] }
 0x2c0   : > { %10219 = vmatmul.mubr.msk.bf16.gmra.mrb[32].mxu1 %vm389_vm1, %v14379_v57  ;;  %v3663_v57 = vpack.c.bf16 %v3629_v26, %v3628_v42  ;;  %v14410_v42 = vld [vmem:[#allocation40_spill] sm:$0xff] }
 0x2c1   : > { %10222 = vmatprep.mubr.msk.bf16.mxu1 %vm389_vm1, %v14380_v55  ;;  %v3630_v55 = vld [vmem:[#allocation2 + $0x117] sm:$0xff] }
 0x2c8   : > { %10223 = vmatmul.mubr.msk.bf16.gmra.mrb[36].mxu1 %vm389_vm1, %v14381_v16  ;;  %v3664_v16 = vpack.c.bf16 %v3631_v29, %v3630_v55  ;;  %v4069_v29 = vld [vmem:[#allocation2 + $0xc8] sm:$0xff]  ;;  %v4070_v55 = vld [vmem:[#allocation2 + $0xd0] sm:$0xff] }
 0x2c9   : > { %10226 = vmatprep.mubr.msk.bf16.mxu1 %vm389_vm1, %v14382_v28  ;;  %v3632_v28 = vld [vmem:[#allocation2 + $0x127] sm:$0xff] }
 0x2d0   : > { %10227 = vmatmul.mubr.msk.bf16.gmra.mrb[40].mxu1 %vm389_vm1, %v14385_v51  ;;  %v3634_v51 = vld [vmem:[#allocation2 + $0x137] sm:$0xff] }
 0x2d1   : > { %10230 = vmatprep.mubr.msk.bf16.mxu1 %vm389_vm1, %v3223_v6  ;;  %v3633_v6 = vld [vmem:[#allocation2 + $0x12f] sm:$0xff]  ;;  %v3666_v30 = vpack.c.bf16 %v3635_v3, %v3634_v51 }
 0x2d2   : > { %v3665_v2 = vpack.c.bf16 %v3633_v6, %v3632_v28  ;;  %v4071_v28 = vld [vmem:[#allocation2 + $0xd8] sm:$0xff]  ;;  %v4073_v3 = vld [vmem:[#allocation2 + $0xe8] sm:$0xff]  ;;  %v4074_v51 = vld [vmem:[#allocation2 + $0xf0] sm:$0xff] }
 0x2d8   : > { %10231 = vmatmul.mubr.msk.bf16.gmra.mrb[44].mxu1 %vm389_vm1, %v3224_v27  ;;  %v3636_v27 = vld [vmem:[#allocation2 + $0x147] sm:$0xff] }
 0x2d9   : > { %10242 = vmatprep.mubr.msk.bf16.mxu1 %vm389_vm1, %v3650_v0  ;;  %v3639_v0 = vld [vmem:[#allocation2 + $0x15f] sm:$0xff]  ;;  %v3667_v31 = vpack.c.bf16 %v3637_v11, %v3636_v27 }
 0x2da   : > { %v3668_v43 = vpack.c.bf16 %v3639_v0, %v3638_v49  ;;  %v4075_v27 = vld [vmem:[#allocation2 + $0xf8] sm:$0xff]  ;;  %v4077_v0 = vld [vmem:[#allocation2 + $0x108] sm:$0xff]  ;;  %v4078_v49 = vld [vmem:[#allocation2 + $0x110] sm:$0xff] }
 0x2e0   : > { %10243 = vmatmul.mubr.msk.bf16.vlgmr.msra.gmra.mrb[0].mxu1 %vm389_vm1, %v3651_v21  ;;  %v3640_v21 = vld [vmem:[#allocation2 + $0x167] sm:$0xff] }
 0x2e1   : > { %10291 = vmatpush3.bf16.msra.mxu1 %v11643_v38  ;;  %10246 = vmatprep.mubr.msk.bf16.mxu1 %vm389_vm1, %v3652_v36  ;;  %v3623_v38 = vld [vmem:[#allocation2 + $0xdf] sm:$0xff]  ;;  %v3669_v36 = vpack.c.bf16 %v3641_v58, %v3640_v21 }
 0x2e2   : > { %10292 = vmatprep.subr.bf16.mxu1 %v11644_v22  ;;  %v3660_v62 = vpack.c.bf16 %v3623_v38, %v3622_v56  ;;  %v14403_v38 = vld [vmem:[#allocation33_spill] sm:$0xff] }
 0x2e3   : > { %v4079_v21 = vld [vmem:[#allocation2 + $0x118] sm:$0xff] }
 0x2e5   : > { %10293 = vmatpush3.bf16.msra.mxu1 %v11644_v22  ;;  %v3643_v22 = vld [vmem:[#allocation2 + $0x17f] sm:$0xff] }
 0x2e6   : > { %10294 = vmatprep.subr.bf16.mxu1 %v11645_v41 }
 0x2e8   : > { %10247 = vmatmul.mubr.msk.bf16.gmra.mrb[4].mxu1 %vm389_vm1, %v3653_v33  ;;  %v14387_v33 = vpack.c.bf16 %v12615_v40, %v12613_v44  ;;  %v14392_v40 = vld [vmem:[#allocation16_spill] sm:$0xff] }
 0x2e9   : > { %10250 = vmatprep.mubr.msk.bf16.mxu1 %vm389_vm1, %v3654_v4  ;;  %10295 = vmatpush3.bf16.msra.mxu1 %v11645_v41  ;;  %v3642_v41 = vld [vmem:[#allocation2 + $0x177] sm:$0xff] }
 0x2ea   : > { %10296 = vmatprep.subr.bf16.mxu1 %v11646_v32  ;;  %v3670_v13 = vpack.c.bf16 %v3643_v22, %v3642_v41  ;;  %v4081_v22 = vld [vmem:[#allocation2 + $0x128] sm:$0xff]  ;;  %v4082_v41 = vld [vmem:[#allocation2 + $0x130] sm:$0xff] }
 0x2ed   : > { %10297 = vmatpush3.bf16.msra.mxu1 %v11646_v32  ;;  %v3649_v32 = vld [vmem:[#allocation2 + $0x1af] sm:$0xff] }
 0x2ee   : > { %10346 = vmatprep.subr.bf16.mxu1 %v13109_v59  ;;  %v3673_v4 = vpack.c.bf16 %v3649_v32, %v3648_v12  ;;  %v4085_v12 = vld [vmem:[#allocation2 + $0x148] sm:$0xff]  ;;  %v4088_v32 = vld [vmem:[#allocation2 + $0x160] sm:$0xff] }
 0x2f0   : > { %10251 = vmatmul.mubr.msk.bf16.gmra.mrb[8].mxu1 %vm389_vm1, %v3655_v24  ;;  %v14391_v24 = vld [vmem:[#allocation17_spill] sm:$0xff] }
 0x2f1   : > { %10254 = vmatprep.mubr.msk.bf16.mxu1 %vm389_vm1, %v3656_v23  ;;  %v14393_v44 = vpack.c.bf16 %v14391_v24, %v14392_v40  ;;  %v14395_v23 = vld [vmem:[#allocation24_spill] sm:$0xff]  ;;  %v4092_v24 = vld [vmem:[#allocation2 + $0x180] sm:$0xff] }
 0x2f2   : > { %v14396_v52 = vpack.c.bf16 %v14394_v48, %v14395_v23  ;;  %v4090_v40 = vld [vmem:[#allocation2 + $0x170] sm:$0xff]  ;;  %v4091_v48 = vld [vmem:[#allocation2 + $0x178] sm:$0xff] }
 0x2f3   : > { %v4119_v23 = vpack.c.bf16 %v4092_v24, %v4091_v48  ;;  %v4537_v48 = vld [vmem:[#allocation2 + $0x161] sm:$0xff] }
 0x2f8   : > { %10255 = vmatmul.mubr.msk.bf16.gmra.mrb[12].mxu1 %vm389_vm1, %v3657_v14  ;;  %v14397_v14 = vld [vmem:[#allocation25_spill] sm:$0xff] }
 0x2f9   : > { %10258 = vmatprep.mubr.msk.bf16.mxu1 %vm389_vm1, %v3658_v9  ;;  %v14399_v9 = vpack.c.bf16 %v14397_v14, %v14398_v8  ;;  %v4097_v14 = vld [vmem:[#allocation2 + $0x1a8] sm:$0xff]  ;;  %v4098_v8 = vld [vmem:[#allocation2 + $0x1b0] sm:$0xff] }
 0x300   : > { %10259 = vmatmul.mubr.msk.bf16.gmra.mrb[16].mxu1 %vm389_vm1, %v3659_v39  ;;  %v14404_v39 = vld [vmem:[#allocation31_spill] sm:$0xff] }
 0x301   : > { %10262 = vmatprep.mubr.msk.bf16.mxu1 %vm389_vm1, %v3660_v62  ;;  %v14405_v56 = vpack.c.bf16 %v14403_v38, %v14404_v39  ;;  %v14406_v62 = vld [vmem:[#allocation38_spill] sm:$0xff]  ;;  %v4502_v38 = vld [vmem:[#allocation2 + $0x49] sm:$0xff]  ;;  %v4503_v39 = vld [vmem:[#allocation2 + $0x51] sm:$0xff] }
 0x302   : > { %v14408_v19 = vpack.c.bf16 %v14406_v62, %v14407_v18  ;;  %v4504_v62 = vld [vmem:[#allocation2 + $0x59] sm:$0xff]  ;;  %v4507_v18 = vld [vmem:[#allocation2 + $0x71] sm:$0xff] }
 0x308   : > { %10263 = vmatmul.mubr.msk.bf16.gmra.mrb[20].mxu1 %vm389_vm1, %v3661_v45  ;;  %v4067_v45 = vld [vmem:[#allocation2 + $0xb8] sm:$0xff] }
 0x309   : > { %10266 = vmatprep.mubr.msk.bf16.mxu1 %vm389_vm1, %v3662_v53  ;;  %v4107_v63 = vpack.c.bf16 %v4068_v54, %v4067_v45  ;;  %v14409_v53 = vld [vmem:[#allocation41_spill] sm:$0xff] }
 0x30a   : > { %v14411_v26 = vpack.c.bf16 %v14409_v53, %v14410_v42  ;;  %v4508_v45 = vld [vmem:[#allocation2 + $0x79] sm:$0xff]  ;;  %v4510_v53 = vld [vmem:[#allocation2 + $0x89] sm:$0xff]  ;;  %v4511_v42 = vld [vmem:[#allocation2 + $0x91] sm:$0xff] }
 0x310   : > { %10267 = vmatmul.mubr.msk.bf16.gmra.mrb[24].mxu1 %vm389_vm1, %v3663_v57  ;;  %v4072_v57 = vld [vmem:[#allocation2 + $0xe0] sm:$0xff] }
 0x311   : > { %10270 = vmatprep.mubr.msk.bf16.mxu1 %vm389_vm1, %v3664_v16  ;;  %v4108_v16 = vpack.c.bf16 %v4070_v55, %v4069_v29  ;;  %v4109_v6 = vpack.c.bf16 %v4072_v57, %v4071_v28  ;;  %v4553_v29 = vpack.c.bf16 %v4511_v42, %v4510_v53  ;;  %v4512_v57 = vld [vmem:[#allocation2 + $0x99] sm:$0xff]  ;;  %v4515_v28 = vld [vmem:[#allocation2 + $0xb1] sm:$0xff] }
 0x318   : > { %10271 = vmatmul.mubr.msk.bf16.gmra.mrb[28].mxu1 %vm389_vm1, %v3665_v2  ;;  %v4076_v2 = vld [vmem:[#allocation2 + $0x100] sm:$0xff] }
 0x319   : > { %10274 = vmatprep.mubr.msk.bf16.mxu1 %vm389_vm1, %v3666_v30  ;;  %v4110_v30 = vpack.c.bf16 %v4074_v51, %v4073_v3  ;;  %v4111_v11 = vpack.c.bf16 %v4076_v2, %v4075_v27  ;;  %v4516_v2 = vld [vmem:[#allocation2 + $0xb9] sm:$0xff]  ;;  %v4519_v27 = vld [vmem:[#allocation2 + $0xd1] sm:$0xff] }
 0x320   : > { %10275 = vmatmul.mubr.msk.bf16.gmra.mrb[32].mxu1 %vm389_vm1, %v3667_v31  ;;  %v4080_v31 = vld [vmem:[#allocation2 + $0x120] sm:$0xff] }
 0x321   : > { %10278 = vmatprep.mubr.msk.bf16.mxu1 %vm389_vm1, %v3668_v43  ;;  %v4112_v43 = vpack.c.bf16 %v4078_v49, %v4077_v0  ;;  %v4113_v58 = vpack.c.bf16 %v4080_v31, %v4079_v21  ;;  %v4520_v31 = vld [vmem:[#allocation2 + $0xd9] sm:$0xff]  ;;  %v4523_v21 = vld [vmem:[#allocation2 + $0xf1] sm:$0xff] }
 0x328   : > { %10279 = vmatmul.mubr.msk.bf16.gmra.mrb[36].mxu1 %vm389_vm1, %v3669_v36  ;;  %v4084_v36 = vld [vmem:[#allocation2 + $0x140] sm:$0xff] }
 0x329   : > { %10282 = vmatprep.mubr.msk.bf16.mxu1 %vm389_vm1, %v3670_v13  ;;  %v4114_v13 = vpack.c.bf16 %v4082_v41, %v4081_v22 }
 0x330   : > { %10283 = vmatmul.mubr.msk.bf16.gmra.mrb[40].mxu1 %vm389_vm1, %v14387_v33  ;;  %v11651_v33 = vld [vmem:[%s14028_s4 + $0x20] sm:$0xff]  }
 0x331   : > { %10286 = vmatprep.mubr.msk.bf16.mxu1 %vm389_vm1, %v3672_v10  ;;  %v4115_v10 = vpack.c.bf16 %v4084_v36, %v4083_v15  ;;  %10402 = vmatprep.subr.bf16.mxu0 %v11651_v33  ;;  %v4524_v36 = vld [vmem:[#allocation2 + $0xf9] sm:$0xff]  ;;  %v4527_v15 = vld [vmem:[#allocation2 + $0x111] sm:$0xff] }
 0x332   : > { %10403 = vmatpush3.bf16.msra.mxu0 %v11651_v33 }
 0x338   : > { %10287 = vmatmul.mubr.msk.bf16.gmra.mrb[44].mxu1 %vm389_vm1, %v3673_v4  ;;  %v4086_v4 = vld [vmem:[#allocation2 + $0x150] sm:$0xff] }
 0x339   : > { %10298 = vmatprep.mubr.msk.bf16.mxu1 %vm389_vm1, %v14390_v34  ;;  %v4116_v1 = vpack.c.bf16 %v4086_v4, %v4085_v12  ;;  %v4117_v34 = vpack.c.bf16 %v4088_v32, %v4087_v47  ;;  %v4528_v12 = vld [vmem:[#allocation2 + $0x119] sm:$0xff]  ;;  %v4530_v4 = vld [vmem:[#allocation2 + $0x129] sm:$0xff]  ;;  %v4533_v47 = vld [vmem:[#allocation2 + $0x141] sm:$0xff] }
 0x340   : > { %10299 = vmatmul.mubr.msk.bf16.vlgmr.msra.gmra.mrb[0].mxu1 %vm389_vm1, %v14393_v44 }
 0x341   : > { %10347 = vmatpush3.bf16.msra.mxu1 %v13109_v59  ;;  %10302 = vmatprep.mubr.msk.bf16.mxu1 %vm389_vm1, %v14396_v52  ;;  %v14400_v59 = vld [vmem:[#allocation30_spill] sm:$0xff] }
 0x342   : > { %10348 = vmatprep.subr.bf16.mxu1 %v11648_v60  ;;  %v14402_v25 = vpack.c.bf16 %v14400_v59, %v14401_v20  ;;  %v4096_v52 = vld [vmem:[#allocation2 + $0x1a0] sm:$0xff] }
 0x343   : > { %v4501_v59 = vld [vmem:[#allocation2 + $0x41] sm:$0xff]  ;;  %v4500_v20 = vld [vmem:[#allocation2 + $0x39] sm:$0xff] }
 0x345   : > { %10349 = vmatpush3.bf16.msra.mxu1 %v11648_v60  ;;  %v4089_v60 = vld [vmem:[#allocation2 + $0x168] sm:$0xff] }
 0x346   : > { %10350 = vmatprep.subr.bf16.mxu1 %v11649_v46  ;;  %v4118_v44 = vpack.c.bf16 %v4090_v40, %v4089_v60  ;;  %v4532_v60 = vld [vmem:[#allocation2 + $0x139] sm:$0xff]  ;;  %v4534_v40 = vld [vmem:[#allocation2 + $0x149] sm:$0xff] }
 0x347   : > { %v4564_v24 = vpack.c.bf16 %v4533_v47, %v4532_v60 }
 0x348   : > { %10303 = vmatmul.mubr.msk.bf16.gmra.mrb[4].mxu1 %vm389_vm1, %v14399_v9  ;;  %v4122_v9 = vpack.c.bf16 %v4098_v8, %v4097_v14  ;;  %v4539_v14 = vld [vmem:[#allocation2 + $0x171] sm:$0xff]  ;;  %v4541_v8 = vld [vmem:[#allocation2 + $0x181] sm:$0xff] }
 0x349   : > { %10306 = vmatprep.mubr.msk.bf16.mxu1 %vm389_vm1, %v14402_v25  ;;  %10351 = vmatpush3.bf16.msra.mxu1 %v11649_v46  ;;  %v4121_v46 = vpack.c.bf16 %v4096_v52, %v12979_v5  ;;  %v4548_v25 = vpack.c.bf16 %v4501_v59, %v4500_v20  ;;  %v4505_v5 = vld [vmem:[#allocation2 + $0x61] sm:$0xff]  ;;  %v4536_v52 = vld [vmem:[#allocation2 + $0x159] sm:$0xff] }
 0x34a   : > { %10352 = vmatprep.subr.bf16.mxu1 %v11650_v35  ;;  %v4540_v59 = vld [vmem:[#allocation2 + $0x179] sm:$0xff] }
 0x34b   : > { %v4568_v20 = vpack.c.bf16 %v4541_v8, %v4540_v59 }
 0x34d   : > { %10353 = vmatpush3.bf16.msra.mxu1 %v11650_v35  ;;  %v14412_v35 = vpack.c.bf16 %v12617_v37, %v12621_v7  ;;  %v4550_v37 = vpack.c.bf16 %v4505_v5, %v4504_v62  ;;  %v4506_v7 = vld [vmem:[#allocation2 + $0x69] sm:$0xff] }
 0x34e   : > { %v4551_v54 = vpack.c.bf16 %v4507_v18, %v4506_v7  ;;  %v4546_v5 = vld [vmem:[#allocation2 + $0x1a9] sm:$0xff] }
 0x34f   : > { %v5147_v7 = vld [vmem:[#allocation4 + $0x10] sm:$0xff] }
 0x350   : > { %10307 = vmatmul.mubr.msk.bf16.gmra.mrb[8].mxu1 %vm389_vm1, %v14405_v56  ;;  %v4549_v56 = vpack.c.bf16 %v4503_v39, %v4502_v38  ;;  %v14413_v39 = vpack.c.bf16 %v14386_v17, %v12623_v61  ;;  %v11654_v61 = vld [vmem:[%s14028_s4 + $0x38] sm:$0xff]   ;;  %v5146_v17 = vld [vmem:[#allocation4 + $0x8] sm:$0xff] }
 0x351   : > { %10310 = vmatprep.mubr.msk.bf16.mxu1 %vm389_vm1, %v14408_v19  ;;  %v4509_v19 = vld [vmem:[#allocation2 + $0x81] sm:$0xff]  ;;  %v5162_v18 = vpack.c.bf16 %v5147_v7, %v5146_v17  ;;  %v14426_v7 = vld [vmem:[#allocation36_spill] sm:$0xff] }
 0x353   : > { %10410 = vmatprep.mubr.msk.bf16.mxu0 %vm389_vm1, %v5162_v18 }
 0x358   : > { %10311 = vmatmul.mubr.msk.bf16.gmra.mrb[12].mxu1 %vm389_vm1, %v14411_v26  ;;  %v4513_v26 = vld [vmem:[#allocation2 + $0xa1] sm:$0xff] }
 0x359   : > { %10314 = vmatprep.mubr.msk.bf16.mxu1 %vm389_vm1, %v4107_v63  ;;  %v4552_v63 = vpack.c.bf16 %v4509_v19, %v4508_v45  ;;  %v4554_v55 = vpack.c.bf16 %v4513_v26, %v4512_v57  ;;  %v13241_v19 = vld [vmem:[%s14028_s4] sm:$0xff]  }
 0x35a   : > { %v14415_v26 = vld [vmem:[#allocation10_spill] sm:$0xff] }
 0x360   : > { %10315 = vmatmul.mubr.msk.bf16.gmra.mrb[16].mxu1 %vm389_vm1, %v4108_v16  ;;  %v4514_v16 = vld [vmem:[#allocation2 + $0xa9] sm:$0xff] }
 0x361   : > { %10318 = vmatprep.mubr.msk.bf16.mxu1 %vm389_vm1, %v4109_v6  ;;  %v4517_v6 = vld [vmem:[#allocation2 + $0xc1] sm:$0xff]  ;;  %v4555_v3 = vpack.c.bf16 %v4515_v28, %v4514_v16 }
 0x362   : > { %v4556_v51 = vpack.c.bf16 %v4517_v6, %v4516_v2  ;;  %v14417_v6 = vld [vmem:[#allocation13_spill] sm:$0xff] }
 0x368   : > { %10319 = vmatmul.mubr.msk.bf16.gmra.mrb[20].mxu1 %vm389_vm1, %v4110_v30  ;;  %v4518_v30 = vld [vmem:[#allocation2 + $0xc9] sm:$0xff] }
 0x369   : > { %10322 = vmatprep.mubr.msk.bf16.mxu1 %vm389_vm1, %v4111_v11  ;;  %v4521_v11 = vld [vmem:[#allocation2 + $0xe1] sm:$0xff]  ;;  %v4557_v0 = vpack.c.bf16 %v4519_v27, %v4518_v30 }
 0x36a   : > { %v4558_v49 = vpack.c.bf16 %v4521_v11, %v4520_v31  ;;  %v14419_v11 = vld [vmem:[#allocation18_spill] sm:$0xff] }
 0x370   : > { %10323 = vmatmul.mubr.msk.bf16.gmra.mrb[24].mxu1 %vm389_vm1, %v4112_v43  ;;  %v4522_v43 = vld [vmem:[#allocation2 + $0xe9] sm:$0xff] }
 0x371   : > { %10326 = vmatprep.mubr.msk.bf16.mxu1 %vm389_vm1, %v4113_v58  ;;  %v4525_v58 = vld [vmem:[#allocation2 + $0x101] sm:$0xff]  ;;  %v4559_v22 = vpack.c.bf16 %v4523_v21, %v4522_v43 }
 0x372   : > { %v4560_v41 = vpack.c.bf16 %v4525_v58, %v4524_v36  ;;  %v14420_v58 = vld [vmem:[#allocation19_spill] sm:$0xff] }
 0x378   : > { %10327 = vmatmul.mubr.msk.bf16.gmra.mrb[28].mxu1 %vm389_vm1, %v4114_v13  ;;  %v4526_v13 = vld [vmem:[#allocation2 + $0x109] sm:$0xff] }
 0x379   : > { %10330 = vmatprep.mubr.msk.bf16.mxu1 %vm389_vm1, %v4115_v10  ;;  %v4529_v10 = vld [vmem:[#allocation2 + $0x121] sm:$0xff]  ;;  %v4561_v33 = vpack.c.bf16 %v4527_v15, %v4526_v13 }
 0x37a   : > { %v4562_v32 = vpack.c.bf16 %v4529_v10, %v4528_v12 }
 0x380   : > { %10331 = vmatmul.mubr.msk.bf16.gmra.mrb[32].mxu1 %vm389_vm1, %v4116_v1  ;;  %v4531_v1 = vld [vmem:[#allocation2 + $0x131] sm:$0xff] }
 0x381   : > { %10334 = vmatprep.mubr.msk.bf16.mxu1 %vm389_vm1, %v4117_v34  ;;  %v4563_v34 = vpack.c.bf16 %v4531_v1, %v4530_v4  ;;  %v13262_v1 = vld [vmem:[%s14027_s3] ss:$0 sm:$0xff] }
 0x388   : > { %10335 = vmatmul.mubr.msk.bf16.gmra.mrb[36].mxu1 %vm389_vm1, %v4118_v44  ;;  %v4535_v44 = vld [vmem:[#allocation2 + $0x151] sm:$0xff] }
 0x389   : > { %10338 = vmatprep.mubr.msk.bf16.mxu1 %vm389_vm1, %v4119_v23  ;;  %v4565_v23 = vpack.c.bf16 %v4535_v44, %v4534_v40  ;;  %v14422_v44 = vld [vmem:[#allocation28_spill] sm:$0xff] }
 0x390   : > { %10339 = vmatmul.mubr.msk.bf16.gmra.mrb[40].mxu1 %vm389_vm1, %v14412_v35  ;;  %v4538_v35 = vld [vmem:[#allocation2 + $0x169] sm:$0xff] }
 0x391   : > { %10342 = vmatprep.mubr.msk.bf16.mxu1 %vm389_vm1, %v4121_v46  ;;  %v4566_v46 = vpack.c.bf16 %v4537_v48, %v4536_v52 }
 0x398   : > { %10343 = vmatmul.mubr.msk.bf16.gmra.mrb[44].mxu1 %vm389_vm1, %v4122_v9  ;;  %v4567_v9 = vpack.c.bf16 %v4539_v14, %v4538_v35  ;;  %v14423_v35 = vld [vmem:[#allocation26_spill] sm:$0xff] }
 0x399   : > { %10354 = vmatprep.mubr.msk.bf16.mxu1 %vm389_vm1, %v4548_v25  ;;  %v4545_v25 = vld [vmem:[#allocation2 + $0x1a1] sm:$0xff] }
 0x39a   : > { %v4570_v38 = vpack.c.bf16 %v4545_v25, %v13087_v50  ;;  %v11653_v50 = vld [vmem:[%s14028_s4 + $0x30] sm:$0xff]  }
 0x3a0   : > { %10355 = vmatmul.mubr.msk.bf16.vlgmr.msra.gmra.mrb[0].mxu1 %vm389_vm1, %v4549_v56  ;;  %v4547_v56 = vld [vmem:[#allocation2 + $0x1b1] sm:$0xff] }
 0x3a1   : > { %10358 = vmatprep.mubr.msk.bf16.mxu1 %vm389_vm1, %v4550_v37  ;;  %v4571_v62 = vpack.c.bf16 %v4547_v56, %v4546_v5  ;;  %v11652_v37 = vld [vmem:[%s14028_s4 + $0x28] sm:$0xff]  }
 0x3a2   : > { %10404 = vmatprep.subr.bf16.mxu0 %v11652_v37 }
 0x3a3   : > { %10405 = vmatpush3.bf16.msra.mxu0 %v11652_v37 }
 0x3a4   : > { %10406 = vmatprep.subr.bf16.mxu0 %v11653_v50 }
 0x3a7   : > { %10407 = vmatpush3.bf16.msra.mxu0 %v11653_v50 }
 0x3a8   : > { %10359 = vmatmul.mubr.msk.bf16.gmra.mrb[4].mxu1 %vm389_vm1, %v4551_v54  ;;  %10408 = vmatprep.subr.bf16.mxu0 %v11654_v61 }
 0x3a9   : > { %10362 = vmatprep.mubr.msk.bf16.mxu1 %vm389_vm1, %v4552_v63  ;;  %v14414_v63 = vld [vmem:[#allocation12_spill] sm:$0xff] }
 0x3ab   : > { %10409 = vmatpush3.bf16.msra.mxu0 %v11654_v61  ;;  %v5149_v61 = vld [vmem:[#allocation4 + $0x20] sm:$0xff] }
 0x3ac   : > { %10426 = vmatprep.subr.bf16.mxu0 %v13241_v19 }
 0x3b0   : > { %10363 = vmatmul.mubr.msk.bf16.gmra.mrb[8].mxu1 %vm389_vm1, %v4553_v29 }
 0x3b1   : > { %10366 = vmatprep.mubr.msk.bf16.mxu1 %vm389_vm1, %v4554_v55  ;;  %v14416_v55 = vld [vmem:[#allocation11_spill] sm:$0xff] }
 0x3b8   : > { %10367 = vmatmul.mubr.msk.bf16.gmra.mrb[12].mxu1 %vm389_vm1, %v4555_v3 }
 0x3b9   : > { %10370 = vmatprep.mubr.msk.bf16.mxu1 %vm389_vm1, %v4556_v51  ;;  %v14418_v51 = vld [vmem:[#allocation20_spill] sm:$0xff] }
 0x3c0   : > { %10371 = vmatmul.mubr.msk.bf16.gmra.mrb[16].mxu1 %vm389_vm1, %v4557_v0 }
 0x3c1   : > { %10374 = vmatprep.mubr.msk.bf16.mxu1 %vm389_vm1, %v4558_v49 }
 0x3c8   : > { %10375 = vmatmul.mubr.msk.bf16.gmra.mrb[20].mxu1 %vm389_vm1, %v4559_v22 }
 0x3c9   : > { %10378 = vmatprep.mubr.msk.bf16.mxu1 %vm389_vm1, %v4560_v41 }
 0x3d0   : > { %10379 = vmatmul.mubr.msk.bf16.gmra.mrb[24].mxu1 %vm389_vm1, %v4561_v33 }
 0x3d1   : > { %10382 = vmatprep.mubr.msk.bf16.mxu1 %vm389_vm1, %v4562_v32  ;;  %v14421_v32 = vld [vmem:[#allocation21_spill] sm:$0xff] }
 0x3d8   : > { %10383 = vmatmul.mubr.msk.bf16.gmra.mrb[28].mxu1 %vm389_vm1, %v4563_v34 }
 0x3d9   : > { %10386 = vmatprep.mubr.msk.bf16.mxu1 %vm389_vm1, %v4564_v24 }
 0x3e0   : > { %10387 = vmatmul.mubr.msk.bf16.gmra.mrb[32].mxu1 %vm389_vm1, %v4565_v23 }
 0x3e1   : > { %10390 = vmatprep.mubr.msk.bf16.mxu1 %vm389_vm1, %v4566_v46 }
 0x3e8   : > { %10391 = vmatmul.mubr.msk.bf16.gmra.mrb[36].mxu1 %vm389_vm1, %v4567_v9  ;;  %v14424_v9 = vld [vmem:[#allocation27_spill] sm:$0xff] }
 0x3e9   : > { %10394 = vmatprep.mubr.msk.bf16.mxu1 %vm389_vm1, %v4568_v20 }
 0x3f0   : > { %10395 = vmatmul.mubr.msk.bf16.gmra.mrb[40].mxu1 %vm389_vm1, %v14413_v39 }
 0x3f1   : > { %10398 = vmatprep.mubr.msk.bf16.mxu1 %vm389_vm1, %v4570_v38 }
 0x3f8   : > { %10399 = vmatmul.mubr.msk.bf16.gmra.mrb[44].mxu1 %vm389_vm1, %v4571_v62  ;;  %v14425_v62 = vld [vmem:[#allocation29_spill] sm:$0xff] }
 0x473   : > { %v10356_v54 = vpop.f32.mrb[0].mxu1 }
 0x474   : > { %v4710_v45 = vpop.f32.mrb[1].mxu1 }
 0x475   : > { %v10907_v53 = vadd.f32 %v4710_v45, %v14414_v63  ;;  %v10357_v42 = vpop.f32.mrb[2].mxu1  ;;  %v14427_v45 = vld [vmem:[#allocation34_spill] sm:$0xff] }
 0x476   : > { %v10908_v29 = vadd.f32 %v10357_v42, %v14415_v26  ;;  %v4713_v57 = vpop.f32.mrb[3].mxu1 }
 0x477   : > { %4949 = vst.msk [vmem:[#allocation3] sm:$0xff] %vm389_vm1, %v10907_v53  ;;  %v10909_v16 = vadd.f32 %v4713_v57, %v14416_v55  ;;  %v11656_v57 = vld [vmem:[%s14028_s4 + $0x8] sm:$0xff]  }
 0x478   : > { %4952 = vst.msk [vmem:[#allocation3 + $0x18] sm:$0xff] %vm389_vm1, %v10908_v29 }
 0x479   : > { %4950 = vst.msk [vmem:[#allocation3 + $0x8] sm:$0xff] %vm389_vm1, %v10909_v16  ;;  %v11657_v16 = vld [vmem:[%s14028_s4 + $0x10] sm:$0xff]  }
 0x47b   : > { %v10360_v28 = vpop.f32.mrb[4].mxu1 }
 0x47c   : > { %v10910_v3 = vadd.f32 %v10360_v28, %v14417_v6  ;;  %v4726_v2 = vpop.f32.mrb[5].mxu1 }
 0x47d   : > { %v10911_v30 = vadd.f32 %v4726_v2, %v14418_v51  ;;  %v10361_v27 = vpop.f32.mrb[6].mxu1 }
 0x47e   : > { %4955 = vst.msk [vmem:[#allocation3 + $0x30] sm:$0xff] %vm389_vm1, %v10910_v3  ;;  %v10912_v0 = vadd.f32 %v10361_v27, %v14419_v11  ;;  %v4729_v31 = vpop.f32.mrb[7].mxu1  ;;  %v14428_v3 = vld [vmem:[#allocation35_spill] sm:$0xff] }
 0x47f   : > { %4953 = vst.msk [vmem:[#allocation3 + $0x20] sm:$0xff] %vm389_vm1, %v10911_v30  ;;  %v5151_v31 = vld [vmem:[#allocation4 + $0x30] sm:$0xff] }
 0x480   : > { %4956 = vst.msk [vmem:[#allocation3 + $0x38] sm:$0xff] %vm389_vm1, %v10912_v0  ;;  %v4997_v43 = vld [vmem:[#allocation3] ss:$2 sm:$0xff]  ;;  %v4999_v21 = vld [vmem:[#allocation3 + $0x1] ss:$2 sm:$0xff] }
 0x481   : > { %v5000_v33 = vmax.f32 %v4997_v43, %v4999_v21  ;;  %v14429_v43 = vld [vmem:[#allocation37_spill] sm:$0xff] }
 0x483   : > { %v10364_v49 = vpop.f32.mrb[8].mxu1 }
 0x484   : > { %v10914_v22 = vadd.f32 %v10364_v49, %v14420_v58  ;;  %v4742_v36 = vpop.f32.mrb[9].mxu1  ;;  %v11658_v58 = vld [vmem:[%s14028_s4 + $0x18] sm:$0xff]  }
 0x485   : > { %v10365_v41 = vpop.f32.mrb[10].mxu1 }
 0x486   : > { %v5002_v13 = vld [vmem:[#allocation3 + $0x18] ss:$2 sm:$0xff]  ;;  %v5004_v15 = vld [vmem:[#allocation3 + $0x19] ss:$2 sm:$0xff]  ;;  %4959 = vst.msk [vmem:[#allocation3 + $0x50] sm:$0xff] %vm389_vm1, %v10914_v22  ;;  %v4745_v10 = vpop.f32.mrb[11].mxu1 }
 0x487   : > { %v5005_v12 = vmax.f32 %v5002_v13, %v5004_v15  ;;  %v10917_v4 = vadd.f32 %v4745_v10, %v14421_v32  ;;  %v5017_v52 = vld [vmem:[#allocation3 + $0x30] ss:$2 sm:$0xff]  ;;  %v5019_v46 = vld [vmem:[#allocation3 + $0x31] ss:$2 sm:$0xff]  ;;  %v13307_v10 = vld [vmem:[%s14028_s4 + $0x40] sm:$0xff]  }
 0x488   : > { %v5020_v38 = vmax.f32 %v5017_v52, %v5019_v46  ;;  %v14430_v32 = vld [vmem:[#allocation49_spill] sm:$0xff] }
 0x489   : > { %v5006_v47 = vmax.f32 %v5000_v33, %v5005_v12  ;;  %4958 = vst.msk [vmem:[#allocation3 + $0x48] sm:$0xff] %vm389_vm1, %v10917_v4 }
 0x48b   : > { %v5013_v34 = vadd.f32 %v13262_v1, %v5006_v47  ;;  %v10368_v60 = vpop.f32.mrb[12].mxu1 }
 0x48c   : > { %v4758_v24 = vpop.f32.mrb[13].mxu1 }
 0x48d   : > { %v5014_v40 = vmax.f32 %v5013_v34, 0.0  ;;  %v10919_v48 = vadd.f32 %v4758_v24, %v14422_v44  ;;  %v10369_v23 = vpop.f32.mrb[14].mxu1  ;;  %v14431_v24 = vld [vmem:[#allocation44_spill] sm:$0xff] }
 0x48e   : > { %v10920_v14 = vadd.f32 %v10369_v23, %v14423_v35  ;;  %v4761_v8 = vpop.f32.mrb[15].mxu1 }
 0x48f   : > { %5015 = vst.msk [vmem:[#allocation4 + $0x18] sm:$0xff] %vm389_vm1, %v5014_v40  ;;  %4961 = vst.msk [vmem:[#allocation3 + $0x60] sm:$0xff] %vm389_vm1, %v10919_v48  ;;  %v10921_v59 = vadd.f32 %v4761_v8, %v14424_v9  ;;  %v14432_v48 = vld [vmem:[#allocation47_spill] sm:$0xff] }
 0x490   : > { %v5022_v20 = vld [vmem:[#allocation3 + $0x48] ss:$2 sm:$0xff]  ;;  %v5024_v25 = vld [vmem:[#allocation3 + $0x49] ss:$2 sm:$0xff]  ;;  %4964 = vst.msk [vmem:[#allocation3 + $0x78] sm:$0xff] %vm389_vm1, %v10920_v14 }
 0x491   : > { %v5025_v39 = vmax.f32 %v5022_v20, %v5024_v25  ;;  %4962 = vst.msk [vmem:[#allocation3 + $0x68] sm:$0xff] %vm389_vm1, %v10921_v59  ;;  %v14433_v59 = vld [vmem:[#allocation50_spill] sm:$0xff] }
 0x493   : > { %v5026_v5 = vmax.f32 %v5020_v38, %v5025_v39  ;;  %v10372_v56 = vpop.f32.mrb[16].mxu1  ;;  %v5153_v38 = vld [vmem:[#allocation4 + $0x40] sm:$0xff] }
 0x494   : > { %v10922_v37 = vadd.f32 %v10372_v56, %v14425_v62  ;;  %v4774_v50 = vpop.f32.mrb[17].mxu1 }
 0x495   : > { %v5027_v17 = vadd.f32 %v13262_v1, %v5026_v5  ;;  %v10923_v18 = vadd.f32 %v4774_v50, %v14426_v7  ;;  %v10373_v54 = vpop.f32.mrb[18].mxu1  ;;  %v14434_v5 = vld [vmem:[#allocation57_spill] sm:$0xff] }
 0x496   : > { %4967 = vst.msk [vmem:[#allocation3 + $0x90] sm:$0xff] %vm389_vm1, %v10922_v37  ;;  %v10924_v63 = vadd.f32 %v10373_v54, %v14427_v45  ;;  %v4777_v53 = vpop.f32.mrb[19].mxu1  ;;  %v5148_v42 = vld [vmem:[#allocation4 + $0x18] sm:$0xff]  ;;  %v14435_v37 = vld [vmem:[#allocation52_spill] sm:$0xff] }
 0x497   : > { %v5028_v26 = vmax.f32 %v5027_v17, 0.0  ;;  %4965 = vst.msk [vmem:[#allocation3 + $0x80] sm:$0xff] %vm389_vm1, %v10923_v18  ;;  %v13279_v29 = vpack.c.bf16 %v5149_v61, %v5148_v42  ;;  %v14436_v53 = vld [vmem:[#allocation55_spill] sm:$0xff] }
 0x498   : > { %4968 = vst.msk [vmem:[#allocation3 + $0x98] sm:$0xff] %vm389_vm1, %v10924_v63  ;;  %v5031_v28 = vld [vmem:[#allocation3 + $0x60] ss:$2 sm:$0xff]  ;;  %v5033_v6 = vld [vmem:[#allocation3 + $0x61] ss:$2 sm:$0xff] }
 0x499   : > { %5029 = vst.msk [vmem:[#allocation4 + $0x28] sm:$0xff] %vm389_vm1, %v5028_v26  ;;  %10411 = vmatmul.mubr.msk.bf16.vlgmr.msra.gmra.mrb[96].mxu0 %vm389_vm1, %v13279_v29 }
 0x49a   : > { %10427 = vmatpush3.bf16.msra.mxu0 %v13241_v19  ;;  %v5034_v19 = vmax.f32 %v5031_v28, %v5033_v6  ;;  %v5155_v6 = vld [vmem:[#allocation4 + $0x50] sm:$0xff] }
 0x49b   : > { %v10376_v55 = vpop.f32.mrb[20].mxu1  ;;  %10428 = vmatprep.subr.bf16.mxu0 %v11656_v57 }
 0x49c   : > { %v10926_v2 = vadd.f32 %v10376_v55, %v14428_v3  ;;  %v4790_v51 = vpop.f32.mrb[21].mxu1 }
 0x49d   : > { %v10377_v30 = vpop.f32.mrb[22].mxu1  ;;  %v14437_v51 = vld [vmem:[#allocation58_spill] sm:$0xff] }
 0x49e   : > { %v5036_v27 = vld [vmem:[#allocation3 + $0x78] ss:$2 sm:$0xff]  ;;  %v5038_v11 = vld [vmem:[#allocation3 + $0x79] ss:$2 sm:$0xff]  ;;  %4971 = vst.msk [vmem:[#allocation3 + $0xb0] sm:$0xff] %vm389_vm1, %v10926_v2  ;;  %v4793_v0 = vpop.f32.mrb[23].mxu1  ;;  %10429 = vmatpush3.bf16.msra.mxu0 %v11656_v57 }
 0x49f   : > { %v5039_v49 = vmax.f32 %v5036_v27, %v5038_v11  ;;  %v10929_v21 = vadd.f32 %v4793_v0, %v14429_v43  ;;  %10430 = vmatprep.subr.bf16.mxu0 %v11657_v16  ;;  %v5045_v34 = vld [vmem:[#allocation3 + $0x90] ss:$2 sm:$0xff]  ;;  %v5047_v60 = vld [vmem:[#allocation3 + $0x91] ss:$2 sm:$0xff] }
 0x4a0   : > { %v5150_v22 = vld [vmem:[#allocation4 + $0x28] sm:$0xff]  ;;  %v5048_v35 = vmax.f32 %v5045_v34, %v5047_v60 }
 0x4a1   : > { %v5040_v36 = vmax.f32 %v5034_v19, %v5039_v49  ;;  %4970 = vst.msk [vmem:[#allocation3 + $0xa8] sm:$0xff] %vm389_vm1, %v10929_v21  ;;  %v13299_v41 = vpack.c.bf16 %v5151_v31, %v5150_v22  ;;  %v14438_v21 = vld [vmem:[#allocation65_spill] sm:$0xff] }
 0x4a2   : > { %10431 = vmatpush3.bf16.msra.mxu0 %v11657_v16 }
 0x4a3   : > { %v5041_v13 = vadd.f32 %v13262_v1, %v5040_v36  ;;  %v10380_v15 = vpop.f32.mrb[24].mxu1  ;;  %10414 = vmatprep.mubr.msk.bf16.mxu0 %vm389_vm1, %v13299_v41  ;;  %10432 = vmatprep.subr.bf16.mxu0 %v11658_v58 }
 0x4a4   : > { %v4806_v33 = vpop.f32.mrb[25].mxu1  ;;  %v14439_v15 = vld [vmem:[#allocation60_spill] sm:$0xff] }
 0x4a5   : > { %v5042_v12 = vmax.f32 %v5041_v13, 0.0  ;;  %v10931_v4 = vadd.f32 %v4806_v33, %v14430_v32  ;;  %v10381_v47 = vpop.f32.mrb[26].mxu1  ;;  %v14440_v32 = vld [vmem:[#allocation63_spill] sm:$0xff] }
 0x4a6   : > { %v10932_v40 = vadd.f32 %v10381_v47, %v14431_v24  ;;  %v4809_v44 = vpop.f32.mrb[27].mxu1  ;;  %10433 = vmatpush3.bf16.msra.mxu0 %v11658_v58 }
 0x4a7   : > { %5043 = vst.msk [vmem:[#allocation4 + $0x38] sm:$0xff] %vm389_vm1, %v5042_v12  ;;  %4973 = vst.msk [vmem:[#allocation3 + $0xc0] sm:$0xff] %vm389_vm1, %v10931_v4  ;;  %v10933_v23 = vadd.f32 %v4809_v44, %v14432_v48  ;;  %10450 = vmatprep.subr.bf16.mxu0 %v13307_v10  ;;  %v14441_v48 = vld [vmem:[#allocation66_spill] sm:$0xff] }
 0x4a8   : > { %v5050_v52 = vld [vmem:[#allocation3 + $0xa8] ss:$2 sm:$0xff]  ;;  %v5052_v46 = vld [vmem:[#allocation3 + $0xa9] ss:$2 sm:$0xff]  ;;  %4976 = vst.msk [vmem:[#allocation3 + $0xd8] sm:$0xff] %vm389_vm1, %v10932_v40 }
 0x4a9   : > { %v5053_v14 = vmax.f32 %v5050_v52, %v5052_v46  ;;  %4974 = vst.msk [vmem:[#allocation3 + $0xc8] sm:$0xff] %vm389_vm1, %v10933_v23  ;;  %v5157_v46 = vld [vmem:[#allocation4 + $0x60] sm:$0xff] }
 0x4ab   : > { %v5054_v8 = vmax.f32 %v5048_v35, %v5053_v14  ;;  %v10384_v9 = vpop.f32.mrb[28].mxu1  ;;  %v14442_v14 = vld [vmem:[#allocation73_spill] sm:$0xff] }
 0x4ac   : > { %v10934_v20 = vadd.f32 %v10384_v9, %v14433_v59  ;;  %v4822_v25 = vpop.f32.mrb[29].mxu1  ;;  %v14443_v59 = vld [vmem:[#allocation68_spill] sm:$0xff] }
 0x4ad   : > { %v5055_v39 = vadd.f32 %v13262_v1, %v5054_v8  ;;  %v10935_v56 = vadd.f32 %v4822_v25, %v14434_v5  ;;  %v10385_v62 = vpop.f32.mrb[30].mxu1 }
 0x4ae   : > { %4979 = vst.msk [vmem:[#allocation3 + $0xf0] sm:$0xff] %vm389_vm1, %v10934_v20  ;;  %v10936_v50 = vadd.f32 %v10385_v62, %v14435_v37  ;;  %v4825_v61 = vpop.f32.mrb[31].mxu1  ;;  %v5152_v17 = vld [vmem:[#allocation4 + $0x38] sm:$0xff] }
 0x4af   : > { %v5056_v7 = vmax.f32 %v5055_v39, 0.0  ;;  %4977 = vst.msk [vmem:[#allocation3 + $0xe0] sm:$0xff] %vm389_vm1, %v10935_v56  ;;  %v13323_v18 = vpack.c.bf16 %v5153_v38, %v5152_v17 }
 0x4b0   : > { %4980 = vst.msk [vmem:[#allocation3 + $0xf8] sm:$0xff] %vm389_vm1, %v10936_v50  ;;  %v5059_v45 = vld [vmem:[#allocation3 + $0xc0] ss:$2 sm:$0xff]  ;;  %v5061_v63 = vld [vmem:[#allocation3 + $0xc1] ss:$2 sm:$0xff] }
 0x4b1   : > { %5057 = vst.msk [vmem:[#allocation4 + $0x48] sm:$0xff] %vm389_vm1, %v5056_v7  ;;  %10415 = vmatmul.mubr.msk.bf16.gmra.mrb[100].mxu0 %vm389_vm1, %v13323_v18  ;;  %v5062_v3 = vmax.f32 %v5059_v45, %v5061_v63  ;;  %v14444_v50 = vld [vmem:[#allocation71_spill] sm:$0xff] }
 0x4b3   : > { %v10388_v54 = vpop.f32.mrb[32].mxu1 }
 0x4b4   : > { %v10938_v42 = vadd.f32 %v10388_v54, %v14436_v53  ;;  %v4838_v26 = vpop.f32.mrb[33].mxu1  ;;  %v5159_v53 = vld [vmem:[#allocation4 + $0x70] sm:$0xff] }
 0x4b5   : > { %v10389_v57 = vpop.f32.mrb[34].mxu1 }
 0x4b6   : > { %v5064_v55 = vld [vmem:[#allocation3 + $0xd8] ss:$2 sm:$0xff]  ;;  %v5066_v16 = vld [vmem:[#allocation3 + $0xd9] ss:$2 sm:$0xff]  ;;  %4983 = vst.msk [vmem:[#allocation3 + $0x110] sm:$0xff] %vm389_vm1, %v10938_v42  ;;  %v4841_v28 = vpop.f32.mrb[35].mxu1 }
 0x4b7   : > { %v5067_v2 = vmax.f32 %v5064_v55, %v5066_v16  ;;  %v10941_v30 = vadd.f32 %v4841_v28, %v14437_v51  ;;  %v5073_v36 = vld [vmem:[#allocation3 + $0xf0] ss:$2 sm:$0xff]  ;;  %v5075_v13 = vld [vmem:[#allocation3 + $0xf1] ss:$2 sm:$0xff]  ;;  %v14445_v57 = vld [vmem:[#allocation74_spill] sm:$0xff] }
 0x4b8   : > { %v5154_v27 = vld [vmem:[#allocation4 + $0x48] sm:$0xff]  ;;  %v5076_v60 = vmax.f32 %v5073_v36, %v5075_v13 }
 0x4b9   : > { %v5068_v11 = vmax.f32 %v5062_v3, %v5067_v2  ;;  %4982 = vst.msk [vmem:[#allocation3 + $0x108] sm:$0xff] %vm389_vm1, %v10941_v30  ;;  %v13333_v0 = vpack.c.bf16 %v5155_v6, %v5154_v27 }
 0x4bb   : > { %v5069_v31 = vadd.f32 %v13262_v1, %v5068_v11  ;;  %v10392_v19 = vpop.f32.mrb[36].mxu1  ;;  %10418 = vmatprep.mubr.msk.bf16.mxu0 %vm389_vm1, %v13333_v0 }
 0x4bc   : > { %v4854_v49 = vpop.f32.mrb[37].mxu1 }
 0x4bd   : > { %v5070_v43 = vmax.f32 %v5069_v31, 0.0  ;;  %v10943_v58 = vadd.f32 %v4854_v49, %v14438_v21  ;;  %v10393_v22 = vpop.f32.mrb[38].mxu1  ;;  %v5115_v21 = vld [vmem:[#allocation4 + $0xf] sm:$0xff] }
 0x4be   : > { %v10944_v33 = vadd.f32 %v10393_v22, %v14439_v15  ;;  %v4857_v12 = vpop.f32.mrb[39].mxu1 }
 0x4bf   : > { %5071 = vst.msk [vmem:[#allocation4 + $0x58] sm:$0xff] %vm389_vm1, %v5070_v43  ;;  %4985 = vst.msk [vmem:[#allocation3 + $0x120] sm:$0xff] %vm389_vm1, %v10943_v58  ;;  %v10945_v4 = vadd.f32 %v4857_v12, %v14440_v32  ;;  %v5114_v43 = vld [vmem:[#allocation4 + $0x7] sm:$0xff]  ;;  %v5116_v12 = vld [vmem:[#allocation4 + $0x17] sm:$0xff] }
 0x4c0   : > { %v5078_v47 = vld [vmem:[#allocation3 + $0x108] ss:$2 sm:$0xff]  ;;  %v5080_v34 = vld [vmem:[#allocation3 + $0x109] ss:$2 sm:$0xff]  ;;  %4988 = vst.msk [vmem:[#allocation3 + $0x138] sm:$0xff] %vm389_vm1, %v10944_v33  ;;  %v5161_v58 = vld [vmem:[#allocation4 + $0x80] sm:$0xff]  ;;  %v5130_v13 = vpack.c.bf16 %v5115_v21, %v5114_v43 }
 0x4c1   : > { %v5081_v24 = vmax.f32 %v5078_v47, %v5080_v34  ;;  %4986 = vst.msk [vmem:[#allocation3 + $0x128] sm:$0xff] %vm389_vm1, %v10945_v4  ;;  %v5117_v32 = vld [vmem:[#allocation4 + $0x1f] sm:$0xff]  ;;  %v5118_v4 = vld [vmem:[#allocation4 + $0x27] sm:$0xff]  ;;  %v5119_v47 = vld [vmem:[#allocation4 + $0x2f] sm:$0xff] }
 0x4c2   : > { %v13374_v34 = vpack.c.bf16 %v5117_v32, %v5116_v12 }
 0x4c3   : > { %v5082_v40 = vmax.f32 %v5076_v60, %v5081_v24  ;;  %v10396_v44 = vpop.f32.mrb[40].mxu1  ;;  %v13379_v60 = vpack.c.bf16 %v5119_v47, %v5118_v4  ;;  %v11661_v24 = vld [vmem:[%s14028_s4 + $0x50] sm:$0xff]   ;;  %v11672_v47 = vld [vmem:[%s14028_s4 + $0xa8] sm:$0xff]  }
 0x4c4   : > { %v10946_v23 = vadd.f32 %v10396_v44, %v14441_v48  ;;  %v4870_v52 = vpop.f32.mrb[41].mxu1  ;;  %v5121_v44 = vld [vmem:[#allocation4 + $0x3f] sm:$0xff]  ;;  %v5122_v48 = vld [vmem:[#allocation4 + $0x47] sm:$0xff] }
 0x4c5   : > { %v5083_v35 = vadd.f32 %v13262_v1, %v5082_v40  ;;  %v10947_v8 = vadd.f32 %v4870_v52, %v14442_v14  ;;  %v10397_v9 = vpop.f32.mrb[42].mxu1  ;;  %v5120_v40 = vld [vmem:[#allocation4 + $0x37] sm:$0xff] }
 0x4c6   : > { %4991 = vst.msk [vmem:[#allocation3 + $0x150] sm:$0xff] %vm389_vm1, %v10946_v23  ;;  %v10948_v20 = vadd.f32 %v10397_v9, %v14443_v59  ;;  %v4873_v25 = vpop.f32.mrb[43].mxu1  ;;  %v5156_v38 = vld [vmem:[#allocation4 + $0x58] sm:$0xff]  ;;  %v5123_v23 = vld [vmem:[#allocation4 + $0x4f] sm:$0xff]  ;;  %v13389_v52 = vpack.c.bf16 %v5121_v44, %v5120_v40 }
 0x4c7   : > { %v5084_v39 = vmax.f32 %v5083_v35, 0.0  ;;  %4989 = vst.msk [vmem:[#allocation3 + $0x140] sm:$0xff] %vm389_vm1, %v10947_v8  ;;  %v13351_v5 = vpack.c.bf16 %v5157_v46, %v5156_v38  ;;  %v13394_v46 = vpack.c.bf16 %v5123_v23, %v5122_v48  ;;  %v11663_v35 = vld [vmem:[%s14028_s4 + $0x60] sm:$0xff]   ;;  %v5124_v14 = vld [vmem:[#allocation4 + $0x57] sm:$0xff]  ;;  %v11676_v48 = vld [vmem:[%s14028_s4 + $0xc8] sm:$0xff]  }
 0x4c8   : > { %4992 = vst.msk [vmem:[#allocation3 + $0x158] sm:$0xff] %vm389_vm1, %v10948_v20  ;;  %v5087_v62 = vld [vmem:[#allocation3 + $0x120] ss:$2 sm:$0xff]  ;;  %v5089_v37 = vld [vmem:[#allocation3 + $0x121] ss:$2 sm:$0xff]  ;;  %v5869_v40 = vld [vmem:[#allocation4 + $0x90] sm:$0xff] }
 0x4c9   : > { %5085 = vst.msk [vmem:[#allocation4 + $0x68] sm:$0xff] %vm389_vm1, %v5084_v39  ;;  %10419 = vmatmul.mubr.msk.bf16.gmra.mrb[104].mxu0 %vm389_vm1, %v13351_v5  ;;  %v5090_v42 = vmax.f32 %v5087_v62, %v5089_v37  ;;  %v5125_v8 = vld [vmem:[#allocation4 + $0x5f] sm:$0xff]  ;;  %v5469_v62 = vld [vmem:[#allocation4 + $0x11] sm:$0xff] }
 0x4ca   : > { %v13403_v20 = vpack.c.bf16 %v5125_v8, %v5124_v14  ;;  %v11677_v23 = vld [vmem:[%s14028_s4 + $0xd0] sm:$0xff]  }
 0x4cb   : > { %v10400_v56 = vpop.f32.mrb[44].mxu1  ;;  %v6062_v8 = vld [vmem:[#allocation4 + $0x91] sm:$0xff] }
 0x4cc   : > { %v10950_v61 = vadd.f32 %v10400_v56, %v14444_v50  ;;  %v4886_v17 = vpop.f32.mrb[45].mxu1  ;;  %v5468_v56 = vld [vmem:[#allocation4 + $0x9] sm:$0xff] }
 0x4cd   : > { %v10401_v7 = vpop.f32.mrb[46].mxu1  ;;  %v5484_v50 = vpack.c.bf16 %v5469_v62, %v5468_v56  ;;  %v5473_v17 = vld [vmem:[#allocation4 + $0x31] sm:$0xff]  ;;  %v6448_v62 = vld [vmem:[#allocation4 + $0xa0] sm:$0xff] }
 0x4ce   : > { %v5092_v54 = vld [vmem:[#allocation3 + $0x138] ss:$2 sm:$0xff]  ;;  %v5094_v45 = vld [vmem:[#allocation3 + $0x139] ss:$2 sm:$0xff]  ;;  %4995 = vst.msk [vmem:[#allocation3 + $0x170] sm:$0xff] %vm389_vm1, %v10950_v61  ;;  %v4889_v63 = vpop.f32.mrb[47].mxu1 }
 0x4cf   : > { %v5095_v26 = vmax.f32 %v5092_v54, %v5094_v45  ;;  %v10953_v55 = vadd.f32 %v4889_v63, %v14445_v57  ;;  %v5101_v51 = vld [vmem:[#allocation3 + $0x150] ss:$2 sm:$0xff]  ;;  %v5103_v30 = vld [vmem:[#allocation3 + $0x151] ss:$2 sm:$0xff]  ;;  %v5471_v61 = vld [vmem:[#allocation4 + $0x21] sm:$0xff] }
 0x4d0   : > { %v5158_v16 = vld [vmem:[#allocation4 + $0x68] sm:$0xff]  ;;  %v5104_v31 = vmax.f32 %v5101_v51, %v5103_v30  ;;  %v5470_v7 = vld [vmem:[#allocation4 + $0x19] sm:$0xff]  ;;  %v5477_v57 = vld [vmem:[#allocation4 + $0x51] sm:$0xff] }
 0x4d1   : > { %v5096_v28 = vmax.f32 %v5090_v42, %v5095_v26  ;;  %4994 = vst.msk [vmem:[#allocation3 + $0x168] sm:$0xff] %vm389_vm1, %v10953_v55  ;;  %v13361_v6 = vpack.c.bf16 %v5159_v53, %v5158_v16  ;;  %v5126_v9 = vld [vmem:[#allocation4 + $0x67] sm:$0xff]  ;;  %v5127_v59 = vld [vmem:[#allocation4 + $0x6f] sm:$0xff]  ;;  %v13416_v54 = vpack.c.bf16 %v5471_v61, %v5470_v7  ;;  %v5474_v55 = vld [vmem:[#allocation4 + $0x39] sm:$0xff] }
 0x4d2   : > { %v13405_v25 = vpack.c.bf16 %v5127_v59, %v5126_v9  ;;  %v5472_v45 = vld [vmem:[#allocation4 + $0x29] sm:$0xff]  ;;  %v5475_v26 = vld [vmem:[#allocation4 + $0x41] sm:$0xff] }
 0x4d3   : > { %v5097_v3 = vadd.f32 %v13262_v1, %v5096_v28  ;;  %10422 = vmatprep.mubr.msk.bf16.mxu0 %vm389_vm1, %v13361_v6  ;;  %v11664_v63 = vld [vmem:[%s14028_s4 + $0x68] sm:$0xff]   ;;  %v13421_v53 = vpack.c.bf16 %v5473_v17, %v5472_v45  ;;  %v11665_v42 = vld [vmem:[%s14028_s4 + $0x70] sm:$0xff]   ;;  %v13430_v16 = vpack.c.bf16 %v5475_v26, %v5474_v55  ;;  %v11667_v51 = vld [vmem:[%s14028_s4 + $0x80] sm:$0xff]  }
 0x4d4   : > { %v5476_v28 = vld [vmem:[#allocation4 + $0x49] sm:$0xff]  ;;  %v5479_v30 = vld [vmem:[#allocation4 + $0x61] sm:$0xff] }
 0x4d5   : > { %v5098_v2 = vmax.f32 %v5097_v3, 0.0  ;;  %v11666_v3 = vld [vmem:[%s14028_s4 + $0x78] sm:$0xff]   ;;  %v11680_v59 = vld [vmem:[%s14028_s4 + $0xe8] sm:$0xff]   ;;  %v11685_v56 = vld [vmem:[%s14028_s4 + $0x110] sm:$0xff]  }
 0x4d6   : > { %v6641_v61 = vld [vmem:[#allocation4 + $0xa1] sm:$0xff]  ;;  %v11693_v45 = vld [vmem:[%s14030_s6 + $0x70] sm:$0xff]  }
 0x4d7   : > { %5099 = vst.msk [vmem:[#allocation4 + $0x78] sm:$0xff] %vm389_vm1, %v5098_v2  ;;  %v13435_v2 = vpack.c.bf16 %v5477_v57, %v5476_v28  ;;  %v11691_v7 = vld [vmem:[%s14030_s6 + $0x60] sm:$0xff]  }
 0x4d8   : > { %v5106_v27 = vld [vmem:[#allocation3 + $0x168] ss:$2 sm:$0xff]  ;;  %v5108_v11 = vld [vmem:[#allocation3 + $0x169] ss:$2 sm:$0xff]  ;;  %v11695_v26 = vld [vmem:[%s14030_s6] sm:$0xff]  }
 0x4d9   : > { %v5109_v19 = vmax.f32 %v5106_v27, %v5108_v11  ;;  %v5478_v11 = vld [vmem:[#allocation4 + $0x59] sm:$0xff] }
 0x4da   : > { %v13645_v57 = vld [vmem:[%s14029_s5] ss:$0 sm:$0xff] }
 0x4db   : > { %v5110_v49 = vmax.f32 %v5104_v31, %v5109_v19  ;;  %v13444_v31 = vpack.c.bf16 %v5479_v30, %v5478_v11  ;;  %v5480_v19 = vld [vmem:[#allocation4 + $0x69] sm:$0xff] }
 0x4dd   : > { %v5111_v22 = vadd.f32 %v13262_v1, %v5110_v49  ;;  %v11660_v1 = vld [vmem:[%s14028_s4 + $0x48] sm:$0xff]  }
 0x4de   : > { %v5160_v36 = vld [vmem:[#allocation4 + $0x78] sm:$0xff] }
 0x4df   : > { %v5112_v15 = vmax.f32 %v5111_v22, 0.0  ;;  %v13368_v33 = vpack.c.bf16 %v5161_v58, %v5160_v36  ;;  %v5128_v38 = vld [vmem:[#allocation4 + $0x77] sm:$0xff]  ;;  %v5129_v39 = vld [vmem:[#allocation4 + $0x7f] sm:$0xff]  ;;  %v11668_v22 = vld [vmem:[%s14028_s4 + $0x88] sm:$0xff]  }
 0x4e0   : > { %v13411_v37 = vpack.c.bf16 %v5129_v39, %v5128_v38  ;;  %v5481_v27 = vld [vmem:[#allocation4 + $0x71] sm:$0xff]  ;;  %v5482_v21 = vld [vmem:[#allocation4 + $0x79] sm:$0xff] }
 0x4e1   : > { %5113 = vst.msk [vmem:[#allocation4 + $0x88] sm:$0xff] %vm389_vm1, %v5112_v15  ;;  %10423 = vmatmul.mubr.msk.bf16.gmra.mrb[108].mxu0 %vm389_vm1, %v13368_v33  ;;  %v13446_v49 = vpack.c.bf16 %v5481_v27, %v5480_v19  ;;  %v11669_v36 = vld [vmem:[%s14028_s4 + $0x90] sm:$0xff]   ;;  %v11671_v15 = vld [vmem:[%s14028_s4 + $0xa0] sm:$0xff]  }
 0x4e2   : > { %10434 = vmatprep.mubr.msk.bf16.mxu0 %vm389_vm1, %v5130_v13  ;;  %v11670_v13 = vld [vmem:[%s14028_s4 + $0x98] sm:$0xff]   ;;  %v11681_v38 = vld [vmem:[%s14028_s4 + $0xf0] sm:$0xff]  }
 0x4e3   : > { %v6255_v39 = vld [vmem:[#allocation4 + $0x9f] sm:$0xff] }
 0x4e8   : > { %v5483_v43 = vld [vmem:[#allocation4 + $0x81] sm:$0xff]  ;;  %v5676_v32 = vld [vmem:[#allocation4 + $0x8f] sm:$0xff] }
 0x4e9   : > { %10435 = vmatmul.mubr.msk.bf16.vlgmr.msra.gmra.mrb[96].mxu0 %vm389_vm1, %v13374_v34  ;;  %v13452_v58 = vpack.c.bf16 %v5483_v43, %v5482_v21  ;;  %v5675_v12 = vld [vmem:[#allocation4 + $0x87] sm:$0xff] }
 0x4ea   : > { %10451 = vmatpush3.bf16.msra.mxu0 %v13307_v10  ;;  %10438 = vmatprep.mubr.msk.bf16.mxu0 %vm389_vm1, %v13379_v60  ;;  %v11662_v10 = vld [vmem:[%s14028_s4 + $0x58] sm:$0xff]   ;;  %v13482_v4 = vpack.c.bf16 %v5676_v32, %v5675_v12  ;;  %v6061_v14 = vld [vmem:[#allocation4 + $0x89] sm:$0xff] }
 0x4eb   : > { %10452 = vmatprep.subr.bf16.mxu0 %v11660_v1  ;;  %v13542_v9 = vpack.c.bf16 %v6062_v8, %v6061_v14 }
 0x4ee   : > { %10453 = vmatpush3.bf16.msra.mxu0 %v11660_v1  ;;  %v11675_v1 = vld [vmem:[%s14028_s4 + $0xc0] sm:$0xff]  }
 0x4ef   : > { %10454 = vmatprep.subr.bf16.mxu0 %v11661_v24 }
 0x4f1   : > { %10439 = vmatmul.mubr.msk.bf16.gmra.mrb[100].mxu0 %vm389_vm1, %v13389_v52 }
 0x4f2   : > { %10442 = vmatprep.mubr.msk.bf16.mxu0 %vm389_vm1, %v13394_v46  ;;  %10455 = vmatpush3.bf16.msra.mxu0 %v11661_v24  ;;  %v5868_v24 = vld [vmem:[#allocation4 + $0x88] sm:$0xff] }
 0x4f3   : > { %10456 = vmatprep.subr.bf16.mxu0 %v11662_v10  ;;  %v13512_v44 = vpack.c.bf16 %v5869_v40, %v5868_v24 }
 0x4f6   : > { %10457 = vmatpush3.bf16.msra.mxu0 %v11662_v10  ;;  %v11678_v10 = vld [vmem:[%s14028_s4 + $0xd8] sm:$0xff]  }
 0x4f7   : > { %10474 = vmatprep.subr.bf16.mxu0 %v11663_v35 }
 0x4f9   : > { %10443 = vmatmul.mubr.msk.bf16.gmra.mrb[104].mxu0 %vm389_vm1, %v13403_v20 }
 0x4fa   : > { %10446 = vmatprep.mubr.msk.bf16.mxu0 %vm389_vm1, %v13405_v25 }
 0x501   : > { %10447 = vmatmul.mubr.msk.bf16.gmra.mrb[108].mxu0 %vm389_vm1, %v13411_v37 }
 0x502   : > { %10458 = vmatprep.mubr.msk.bf16.mxu0 %vm389_vm1, %v5484_v50  ;;  %v6640_v50 = vld [vmem:[#allocation4 + $0x99] sm:$0xff] }
 0x503   : > { %v6649_v17 = vpack.c.bf16 %v6641_v61, %v6640_v50 }
 0x509   : > { %10459 = vmatmul.mubr.msk.bf16.vlgmr.msra.gmra.mrb[96].mxu0 %vm389_vm1, %v13416_v54 }
 0x50a   : > { %10475 = vmatpush3.bf16.msra.mxu0 %v11663_v35  ;;  %10462 = vmatprep.mubr.msk.bf16.mxu0 %vm389_vm1, %v13421_v53  ;;  %v11679_v35 = vld [vmem:[%s14028_s4 + $0xe0] sm:$0xff]  }
 0x50b   : > { %10476 = vmatprep.subr.bf16.mxu0 %v11664_v63 }
 0x50e   : > { %10477 = vmatpush3.bf16.msra.mxu0 %v11664_v63  ;;  %v11694_v63 = vld [vmem:[%s14030_s6 + $0x78] sm:$0xff]  }
 0x50f   : > { %10478 = vmatprep.subr.bf16.mxu0 %v11665_v42 }
 0x511   : > { %10463 = vmatmul.mubr.msk.bf16.gmra.mrb[100].mxu0 %vm389_vm1, %v13430_v16 }
 0x512   : > { %10466 = vmatprep.mubr.msk.bf16.mxu0 %vm389_vm1, %v13435_v2  ;;  %10479 = vmatpush3.bf16.msra.mxu0 %v11665_v42 }
 0x513   : > { %10480 = vmatprep.subr.bf16.mxu0 %v11666_v3 }
 0x516   : > { %10481 = vmatpush3.bf16.msra.mxu0 %v11666_v3 }
 0x517   : > { %10498 = vmatprep.subr.bf16.mxu0 %v11667_v51 }
 0x519   : > { %10467 = vmatmul.mubr.msk.bf16.gmra.mrb[104].mxu0 %vm389_vm1, %v13444_v31 }
 0x51a   : > { %10470 = vmatprep.mubr.msk.bf16.mxu0 %vm389_vm1, %v13446_v49 }
 0x521   : > { %10471 = vmatmul.mubr.msk.bf16.gmra.mrb[108].mxu0 %vm389_vm1, %v13452_v58 }
 0x522   : > { %10482 = vmatprep.mubr.msk.bf16.mxu0 %vm389_vm1, %v13374_v34  ;;  %v11673_v34 = vld [vmem:[%s14028_s4 + $0xb0] sm:$0xff]  }
 0x529   : > { %10483 = vmatmul.mubr.msk.bf16.vlgmr.msra.gmra.mrb[96].mxu0 %vm389_vm1, %v13379_v60 }
 0x52a   : > { %10499 = vmatpush3.bf16.msra.mxu0 %v11667_v51  ;;  %10486 = vmatprep.mubr.msk.bf16.mxu0 %vm389_vm1, %v13389_v52 }
 0x52b   : > { %10500 = vmatprep.subr.bf16.mxu0 %v11668_v22 }
 0x52e   : > { %10501 = vmatpush3.bf16.msra.mxu0 %v11668_v22 }
 0x52f   : > { %10502 = vmatprep.subr.bf16.mxu0 %v11669_v36 }
 0x531   : > { %10487 = vmatmul.mubr.msk.bf16.gmra.mrb[100].mxu0 %vm389_vm1, %v13394_v46 }
 0x532   : > { %10490 = vmatprep.mubr.msk.bf16.mxu0 %vm389_vm1, %v13403_v20  ;;  %10503 = vmatpush3.bf16.msra.mxu0 %v11669_v36 }
 0x533   : > { %10504 = vmatprep.subr.bf16.mxu0 %v11670_v13 }
 0x536   : > { %10505 = vmatpush3.bf16.msra.mxu0 %v11670_v13 }
 0x537   : > { %10522 = vmatprep.subr.bf16.mxu0 %v11671_v15 }
 0x539   : > { %10491 = vmatmul.mubr.msk.bf16.gmra.mrb[104].mxu0 %vm389_vm1, %v13405_v25 }
 0x53a   : > { %10494 = vmatprep.mubr.msk.bf16.mxu0 %vm389_vm1, %v13411_v37 }
 0x541   : > { %10495 = vmatmul.mubr.msk.bf16.gmra.mrb[108].mxu0 %vm389_vm1, %v13482_v4 }
 0x542   : > { %10506 = vmatprep.mubr.msk.bf16.mxu0 %vm389_vm1, %v13279_v29  ;;  %v11674_v29 = vld [vmem:[%s14028_s4 + $0xb8] sm:$0xff]  }
 0x549   : > { %10507 = vmatmul.mubr.msk.bf16.vlgmr.msra.gmra.mrb[96].mxu0 %vm389_vm1, %v13299_v41 }
 0x54a   : > { %10523 = vmatpush3.bf16.msra.mxu0 %v11671_v15  ;;  %10510 = vmatprep.mubr.msk.bf16.mxu0 %vm389_vm1, %v13323_v18 }
 0x54b   : > { %10524 = vmatprep.subr.bf16.mxu0 %v11672_v47 }
 0x54e   : > { %10525 = vmatpush3.bf16.msra.mxu0 %v11672_v47 }
 0x54f   : > { %10526 = vmatprep.subr.bf16.mxu0 %v11673_v34 }
 0x551   : > { %10511 = vmatmul.mubr.msk.bf16.gmra.mrb[100].mxu0 %vm389_vm1, %v13333_v0 }
 0x552   : > { %10514 = vmatprep.mubr.msk.bf16.mxu0 %vm389_vm1, %v13351_v5  ;;  %10527 = vmatpush3.bf16.msra.mxu0 %v11673_v34 }
 0x553   : > { %10528 = vmatprep.subr.bf16.mxu0 %v11674_v29 }
 0x556   : > { %10529 = vmatpush3.bf16.msra.mxu0 %v11674_v29 }
 0x557   : > { %10546 = vmatprep.subr.bf16.mxu0 %v11675_v1 }
 0x559   : > { %10515 = vmatmul.mubr.msk.bf16.gmra.mrb[104].mxu0 %vm389_vm1, %v13361_v6 }
 0x55a   : > { %10518 = vmatprep.mubr.msk.bf16.mxu0 %vm389_vm1, %v13368_v33 }
 0x561   : > { %10519 = vmatmul.mubr.msk.bf16.gmra.mrb[108].mxu0 %vm389_vm1, %v13512_v44 }
 0x562   : > { %10530 = vmatprep.mubr.msk.bf16.mxu0 %vm389_vm1, %v13416_v54  ;;  %v11692_v54 = vld [vmem:[%s14030_s6 + $0x68] sm:$0xff]  }
 0x569   : > { %10531 = vmatmul.mubr.msk.bf16.vlgmr.msra.gmra.mrb[96].mxu0 %vm389_vm1, %v13421_v53 }
 0x56a   : > { %10547 = vmatpush3.bf16.msra.mxu0 %v11675_v1  ;;  %10534 = vmatprep.mubr.msk.bf16.mxu0 %vm389_vm1, %v13430_v16 }
 0x56b   : > { %10548 = vmatprep.subr.bf16.mxu0 %v11676_v48 }
 0x56e   : > { %10549 = vmatpush3.bf16.msra.mxu0 %v11676_v48  ;;  %v11697_v48 = vld [vmem:[%s14030_s6 + $0x10] sm:$0xff]  }
 0x56f   : > { %10550 = vmatprep.subr.bf16.mxu0 %v11677_v23 }
 0x571   : > { %10535 = vmatmul.mubr.msk.bf16.gmra.mrb[100].mxu0 %vm389_vm1, %v13435_v2 }
 0x572   : > { %10538 = vmatprep.mubr.msk.bf16.mxu0 %vm389_vm1, %v13444_v31  ;;  %10551 = vmatpush3.bf16.msra.mxu0 %v11677_v23 }
 0x573   : > { %10552 = vmatprep.subr.bf16.mxu0 %v11678_v10 }
 0x576   : > { %10553 = vmatpush3.bf16.msra.mxu0 %v11678_v10 }
 0x577   : > { %10570 = vmatprep.subr.bf16.mxu0 %v11679_v35 }
 0x579   : > { %10539 = vmatmul.mubr.msk.bf16.gmra.mrb[104].mxu0 %vm389_vm1, %v13446_v49 }
 0x57a   : > { %10542 = vmatprep.mubr.msk.bf16.mxu0 %vm389_vm1, %v13452_v58 }
 0x581   : > { %10543 = vmatmul.mubr.msk.bf16.gmra.mrb[108].mxu0 %vm389_vm1, %v13542_v9 }
 0x582   : > { %10554 = vmatprep.mubr.msk.bf16.mxu0 %vm389_vm1, %v13379_v60  ;;  %v11682_v60 = vld [vmem:[%s14028_s4 + $0xf8] sm:$0xff]  }
 0x589   : > { %10555 = vmatmul.mubr.msk.bf16.vlgmr.msra.gmra.mrb[96].mxu0 %vm389_vm1, %v13389_v52  ;;  %v11683_v52 = vld [vmem:[%s14028_s4 + $0x100] sm:$0xff]  }
 0x58a   : > { %10571 = vmatpush3.bf16.msra.mxu0 %v11679_v35  ;;  %10558 = vmatprep.mubr.msk.bf16.mxu0 %vm389_vm1, %v13394_v46  ;;  %v6254_v46 = vld [vmem:[#allocation4 + $0x97] sm:$0xff] }
 0x58b   : > { %10572 = vmatprep.subr.bf16.mxu0 %v11680_v59 }
 0x58e   : > { %10573 = vmatpush3.bf16.msra.mxu0 %v11680_v59 }
 0x58f   : > { %10574 = vmatprep.subr.bf16.mxu0 %v11681_v38 }
 0x591   : > { %10559 = vmatmul.mubr.msk.bf16.gmra.mrb[100].mxu0 %vm389_vm1, %v13403_v20  ;;  %v6263_v20 = vpack.c.bf16 %v6255_v39, %v6254_v46 }
 0x592   : > { %10562 = vmatprep.mubr.msk.bf16.mxu0 %vm389_vm1, %v13405_v25  ;;  %10575 = vmatpush3.bf16.msra.mxu0 %v11681_v38  ;;  %v11684_v25 = vld [vmem:[%s14028_s4 + $0x108] sm:$0xff]  }
 0x593   : > { %10576 = vmatprep.subr.bf16.mxu0 %v11682_v60 }
 0x596   : > { %10577 = vmatpush3.bf16.msra.mxu0 %v11682_v60 }
 0x597   : > { %10594 = vmatprep.subr.bf16.mxu0 %v11683_v52 }
 0x599   : > { %10563 = vmatmul.mubr.msk.bf16.gmra.mrb[104].mxu0 %vm389_vm1, %v13411_v37  ;;  %v11690_v37 = vld [vmem:[%s14030_s6 + $0x58] sm:$0xff]  }
 0x59a   : > { %10566 = vmatprep.mubr.msk.bf16.mxu0 %vm389_vm1, %v13482_v4  ;;  %v11696_v4 = vld [vmem:[%s14030_s6 + $0x8] sm:$0xff]  }
 0x5a1   : > { %10567 = vmatmul.mubr.msk.bf16.gmra.mrb[108].mxu0 %vm389_vm1, %v6263_v20 }
 0x5a2   : > { %10578 = vmatprep.mubr.msk.bf16.mxu0 %vm389_vm1, %v13299_v41  ;;  %v11686_v41 = vld [vmem:[%s14028_s4 + $0x118] sm:$0xff]  }
 0x5a9   : > { %10579 = vmatmul.mubr.msk.bf16.vlgmr.msra.gmra.mrb[96].mxu0 %vm389_vm1, %v13323_v18  ;;  %v11687_v18 = vld [vmem:[%s14030_s6 + $0x40] sm:$0xff]  }
 0x5aa   : > { %10595 = vmatpush3.bf16.msra.mxu0 %v11683_v52  ;;  %10582 = vmatprep.mubr.msk.bf16.mxu0 %vm389_vm1, %v13333_v0  ;;  %v6447_v0 = vld [vmem:[#allocation4 + $0x98] sm:$0xff] }
 0x5ab   : > { %10596 = vmatprep.subr.bf16.mxu0 %v11684_v25  ;;  %v11698_v52 = vld [vmem:[%s14030_s6 + $0x18] sm:$0xff]  }
 0x5ae   : > { %10597 = vmatpush3.bf16.msra.mxu0 %v11684_v25 }
 0x5af   : > { %10598 = vmatprep.subr.bf16.mxu0 %v11685_v56 }
 0x5b1   : > { %10583 = vmatmul.mubr.msk.bf16.gmra.mrb[100].mxu0 %vm389_vm1, %v13351_v5  ;;  %v6456_v5 = vpack.c.bf16 %v6448_v62, %v6447_v0  ;;  %v11699_v0 = vld [vmem:[%s14030_s6 + $0x20] sm:$0xff]  }
 0x5b2   : > { %10586 = vmatprep.mubr.msk.bf16.mxu0 %vm389_vm1, %v13361_v6  ;;  %10599 = vmatpush3.bf16.msra.mxu0 %v11685_v56  ;;  %v11688_v6 = vld [vmem:[%s14030_s6 + $0x48] sm:$0xff]  }
 0x5b3   : > { %10600 = vmatprep.subr.bf16.mxu0 %v11686_v41 }
 0x5b6   : > { %10601 = vmatpush3.bf16.msra.mxu0 %v11686_v41 }
 0x5b7   : > { %10618 = vmatprep.subr.bf16.mxu0 %v11687_v18 }
 0x5b9   : > { %10587 = vmatmul.mubr.msk.bf16.gmra.mrb[104].mxu0 %vm389_vm1, %v13368_v33  ;;  %v11689_v33 = vld [vmem:[%s14030_s6 + $0x50] sm:$0xff]  }
 0x5ba   : > { %10590 = vmatprep.mubr.msk.bf16.mxu0 %vm389_vm1, %v13512_v44 }
 0x5c1   : > { %10591 = vmatmul.mubr.msk.bf16.gmra.mrb[108].mxu0 %vm389_vm1, %v6456_v5 }
 0x5c2   : > { %10602 = vmatprep.mubr.msk.bf16.mxu0 %vm389_vm1, %v13421_v53  ;;  %v11763_v53 = vld [vmem:[#allocation5] sm:$0xff] }
 0x5c3   : > { %v13636_v42 = vpack.c.bf16 %v11763_v53, %v11763_v53 }
 0x5c9   : > { %10603 = vmatmul.mubr.msk.bf16.vlgmr.msra.gmra.mrb[96].mxu0 %vm389_vm1, %v13430_v16 }
 0x5ca   : > { %10606 = vmatprep.mubr.msk.bf16.mxu0 %vm389_vm1, %v13435_v2  ;;  %10619 = vmatpush3.bf16.msra.mxu0 %v11687_v18 }
 0x5cb   : > { %10620 = vmatprep.subr.bf16.mxu0 %v11688_v6 }
 0x5ce   : > { %10621 = vmatpush3.bf16.msra.mxu0 %v11688_v6 }
 0x5cf   : > { %10622 = vmatprep.subr.bf16.mxu0 %v11689_v33 }
 0x5d1   : > { %10607 = vmatmul.mubr.msk.bf16.gmra.mrb[100].mxu0 %vm389_vm1, %v13444_v31 }
 0x5d2   : > { %10610 = vmatprep.mubr.msk.bf16.mxu0 %vm389_vm1, %v13446_v49  ;;  %10623 = vmatpush3.bf16.msra.mxu0 %v11689_v33 }
 0x5d3   : > { %10624 = vmatprep.subr.bf16.mxu0 %v11690_v37 }
 0x5d6   : > { %10625 = vmatpush3.bf16.msra.mxu0 %v11690_v37 }
 0x5d7   : > { %10626 = vmatprep.subr.bf16.mxu0 %v11691_v7 }
 0x5d9   : > { %10611 = vmatmul.mubr.msk.bf16.gmra.mrb[104].mxu0 %vm389_vm1, %v13452_v58 }
 0x5da   : > { %10614 = vmatprep.mubr.msk.bf16.mxu0 %vm389_vm1, %v13542_v9  ;;  %10627 = vmatpush3.bf16.msra.mxu0 %v11691_v7 }
 0x5db   : > { %10628 = vmatprep.subr.bf16.mxu0 %v11692_v54 }
 0x5de   : > { %10629 = vmatpush3.bf16.msra.mxu0 %v11692_v54  ;;  %v11700_v54 = vld [vmem:[%s14030_s6 + $0x28] sm:$0xff]  }
 0x5df   : > { %10630 = vmatprep.subr.bf16.mxu0 %v11693_v45 }
 0x5e1   : > { %10615 = vmatmul.mubr.msk.bf16.gmra.mrb[108].mxu0 %vm389_vm1, %v6649_v17 }
 0x5e2   : > { %10631 = vmatpush3.bf16.msra.mxu0 %v11693_v45  ;;  %10634 = vmatprep.mubr.bf16.mxu0 %v13636_v42 }
 0x5e3   : > { %10632 = vmatprep.subr.bf16.mxu0 %v11694_v63 }
 0x5e6   : > { %10633 = vmatpush3.bf16.msra.mxu0 %v11694_v63 }
 0x5e7   : > { %10650 = vmatprep.subr.bf16.mxu0 %v11695_v26 }
 0x69c   : > { %v10604_v55 = vpop.f32.mrb[96].mxu0 }
 0x69d   : > { %v6827_v16 = vadd.f32 %v10604_v55, %v13645_v57  ;;  %v6740_v28 = vpop.f32.mrb[97].mxu0 }
 0x69e   : > { %v6825_v3 = vadd.f32 %v13645_v57, %v6740_v28  ;;  %v10605_v2 = vpop.f32.mrb[98].mxu0 }
 0x69f   : > { %v6843_v51 = vmax.f32 %v6827_v16, 0.0  ;;  %v6828_v30 = vadd.f32 %v10605_v2, %v13645_v57  ;;  %v6743_v27 = vpop.f32.mrb[99].mxu0  ;;  %v6889_v2 = vld [vmem:[#allocation5 + $0x7] sm:$0xff] }
 0x6a0   : > { %v6841_v11 = vmax.f32 %v6825_v3, 0.0  ;;  %v6826_v31 = vadd.f32 %v13645_v57, %v6743_v27  ;;  %v11701_v3 = vld [vmem:[%s14030_s6 + $0x30] sm:$0xff]  }
 0x6a1   : > { %6875 = vst [vmem:[#allocation5 + $0x28] sm:$0xff] %v6843_v51  ;;  %v6844_v19 = vmax.f32 %v6828_v30, 0.0 }
 0x6a2   : > { %6873 = vst [vmem:[#allocation5 + $0x18] sm:$0xff] %v6841_v11  ;;  %v6842_v49 = vmax.f32 %v6826_v31, 0.0 }
 0x6a3   : > { %v6860_v43 = vmul.f32 0.0, %v6844_v19  ;;  %v11702_v19 = vld [vmem:[%s14030_s6 + $0x38] sm:$0xff]  }
 0x6a4   : > { %v6858_v21 = vmul.f32 0.0, %v6842_v49  ;;  %v10608_v58 = vpop.f32.mrb[100].mxu0  ;;  %v11703_v49 = vld [vmem:[%s14030_s6 + $0x80] sm:$0xff]  }
 0x6a5   : > { %6876 = vst [vmem:[#allocation5 + $0x30] sm:$0xff] %v6860_v43  ;;  %v6831_v22 = vadd.f32 %v10608_v58, %v13645_v57  ;;  %v6756_v36 = vpop.f32.mrb[101].mxu0  ;;  %v13652_v13 = vpack.c.bf16 %v6860_v43, %v6843_v51  ;;  %v6890_v51 = vld [vmem:[#allocation5 + $0xf] sm:$0xff] }
 0x6a6   : > { %6874 = vst [vmem:[#allocation5 + $0x20] sm:$0xff] %v6858_v21  ;;  %v6829_v15 = vadd.f32 %v13645_v57, %v6756_v36  ;;  %v10609_v12 = vpop.f32.mrb[102].mxu0  ;;  %v13655_v32 = vpack.c.bf16 %v6858_v21, %v6841_v11 }
 0x6a7   : > { %v6847_v47 = vmax.f32 %v6831_v22, 0.0  ;;  %v6832_v34 = vadd.f32 %v10609_v12, %v13645_v57  ;;  %v6759_v29 = vpop.f32.mrb[103].mxu0 }
 0x6a8   : > { %v6845_v1 = vmax.f32 %v6829_v15, 0.0  ;;  %v6830_v24 = vadd.f32 %v13645_v57, %v6759_v29  ;;  %10635 = vmatmul.mubr.bf16.vlgmr.msra.gmra.mrb[112].mxu0 %v13655_v32  ;;  %v11704_v15 = vld [vmem:[%s14030_s6 + $0x88] sm:$0xff]  }
 0x6a9   : > { %6879 = vst [vmem:[#allocation5 + $0x48] sm:$0xff] %v6847_v47  ;;  %v6848_v40 = vmax.f32 %v6832_v34, 0.0  ;;  %10651 = vmatpush3.bf16.msra.mxu0 %v11695_v26  ;;  %10638 = vmatprep.mubr.bf16.mxu0 %v13652_v13  ;;  %v6891_v22 = vld [vmem:[#allocation5 + $0x17] sm:$0xff] }
 0x6aa   : > { %6877 = vst [vmem:[#allocation5 + $0x38] sm:$0xff] %v6845_v1  ;;  %v6846_v44 = vmax.f32 %v6830_v24, 0.0  ;;  %10652 = vmatprep.subr.bf16.mxu0 %v11696_v4 }
 0x6ab   : > { %v6864_v23 = vmul.f32 0.0, %v6848_v40  ;;  %v11706_v40 = vld [vmem:[%s14030_s6 + $0x98] sm:$0xff]  }
 0x6ac   : > { %v6862_v10 = vmul.f32 0.0, %v6846_v44  ;;  %v10612_v35 = vpop.f32.mrb[104].mxu0  ;;  %v6894_v58 = vld [vmem:[#allocation5 + $0x2f] sm:$0xff] }
 0x6ad   : > { %6880 = vst [vmem:[#allocation5 + $0x50] sm:$0xff] %v6864_v23  ;;  %v6835_v14 = vadd.f32 %v10612_v35, %v13645_v57  ;;  %v6772_v8 = vpop.f32.mrb[105].mxu0  ;;  %10653 = vmatpush3.bf16.msra.mxu0 %v11696_v4  ;;  %v13668_v9 = vpack.c.bf16 %v6864_v23, %v6847_v47  ;;  %v6892_v43 = vld [vmem:[#allocation5 + $0x1f] sm:$0xff]  ;;  %v6893_v21 = vld [vmem:[#allocation5 + $0x27] sm:$0xff] }
 0x6ae   : > { %6878 = vst [vmem:[#allocation5 + $0x40] sm:$0xff] %v6862_v10  ;;  %v6833_v59 = vadd.f32 %v13645_v57, %v6772_v8  ;;  %v10613_v38 = vpop.f32.mrb[106].mxu0  ;;  %10654 = vmatprep.subr.bf16.mxu0 %v11697_v48  ;;  %v13671_v60 = vpack.c.bf16 %v6862_v10, %v6845_v1  ;;  %v13710_v36 = vpack.c.bf16 %v6892_v43, %v6891_v22  ;;  %v11705_v4 = vld [vmem:[%s14030_s6 + $0x90] sm:$0xff]  }
 0x6af   : > { %v6851_v46 = vmax.f32 %v6835_v14, 0.0  ;;  %v6836_v39 = vadd.f32 %v10613_v38, %v13645_v57  ;;  %v6775_v20 = vpop.f32.mrb[107].mxu0  ;;  %v13715_v12 = vpack.c.bf16 %v6894_v58, %v6893_v21  ;;  %v11717_v43 = vld [vmem:[%s14030_s6 + $0xf0] sm:$0xff]  }
 0x6b0   : > { %v6849_v25 = vmax.f32 %v6833_v59, 0.0  ;;  %v6834_v56 = vadd.f32 %v13645_v57, %v6775_v20  ;;  %10639 = vmatmul.mubr.bf16.gmra.mrb[116].mxu0 %v13671_v60  ;;  %v11708_v59 = vld [vmem:[%s14030_s6 + $0xa8] sm:$0xff]  }
 0x6b1   : > { %6883 = vst [vmem:[#allocation5 + $0x68] sm:$0xff] %v6851_v46  ;;  %v6852_v41 = vmax.f32 %v6836_v39, 0.0  ;;  %10655 = vmatpush3.bf16.msra.mxu0 %v11697_v48  ;;  %10642 = vmatprep.mubr.bf16.mxu0 %v13668_v9  ;;  %v6895_v1 = vld [vmem:[#allocation5 + $0x37] sm:$0xff]  ;;  %v7259_v39 = vld [vmem:[#allocation5 + $0x9] sm:$0xff] }
 0x6b2   : > { %6881 = vst [vmem:[#allocation5 + $0x58] sm:$0xff] %v6849_v25  ;;  %v6850_v18 = vmax.f32 %v6834_v56, 0.0  ;;  %10656 = vmatprep.subr.bf16.mxu0 %v11698_v52  ;;  %v11707_v48 = vld [vmem:[%s14030_s6 + $0xa0] sm:$0xff]  }
 0x6b3   : > { %v6868_v62 = vmul.f32 0.0, %v6852_v41  ;;  %v7260_v20 = vld [vmem:[#allocation5 + $0x11] sm:$0xff]  ;;  %v11710_v41 = vld [vmem:[%s14030_s6 + $0xb8] sm:$0xff]  }
 0x6b4   : > { %v6866_v5 = vmul.f32 0.0, %v6850_v18  ;;  %v10616_v6 = vpop.f32.mrb[108].mxu0  ;;  %v6898_v29 = vld [vmem:[#allocation5 + $0x4f] sm:$0xff]  ;;  %v7275_v18 = vpack.c.bf16 %v7260_v20, %v7259_v39  ;;  %v11740_v20 = vld [vmem:[%s14030_s6 + $0x1a8] sm:$0xff]  }
 0x6b5   : > { %6884 = vst [vmem:[#allocation5 + $0x70] sm:$0xff] %v6868_v62  ;;  %v6839_v33 = vadd.f32 %v10616_v6, %v13645_v57  ;;  %v6788_v37 = vpop.f32.mrb[109].mxu0  ;;  %10657 = vmatpush3.bf16.msra.mxu0 %v11698_v52  ;;  %v13684_v50 = vpack.c.bf16 %v6868_v62, %v6851_v46  ;;  %v6896_v47 = vld [vmem:[#allocation5 + $0x3f] sm:$0xff]  ;;  %v6897_v34 = vld [vmem:[#allocation5 + $0x47] sm:$0xff]  ;;  %v7264_v6 = vld [vmem:[#allocation5 + $0x31] sm:$0xff] }
 0x6b6   : > { %6882 = vst [vmem:[#allocation5 + $0x60] sm:$0xff] %v6866_v5  ;;  %v6837_v61 = vadd.f32 %v13645_v57, %v6788_v37  ;;  %v10617_v17 = vpop.f32.mrb[110].mxu0  ;;  %10658 = vmatprep.subr.bf16.mxu0 %v11699_v0  ;;  %v13687_v7 = vpack.c.bf16 %v6866_v5, %v6849_v25  ;;  %v13722_v24 = vpack.c.bf16 %v6896_v47, %v6895_v1  ;;  %v11709_v52 = vld [vmem:[%s14030_s6 + $0xb0] sm:$0xff]   ;;  %v7263_v37 = vld [vmem:[#allocation5 + $0x29] sm:$0xff]  ;;  %v11720_v47 = vld [vmem:[%s14030_s6 + $0x108] sm:$0xff]  }
 0x6b7   : > { %v6855_v45 = vmax.f32 %v6839_v33, 0.0  ;;  %v6840_v63 = vadd.f32 %v10617_v17, %v13645_v57  ;;  %v6791_v53 = vpop.f32.mrb[111].mxu0  ;;  %v13727_v44 = vpack.c.bf16 %v6898_v29, %v6897_v34  ;;  %v7261_v62 = vld [vmem:[#allocation5 + $0x19] sm:$0xff]  ;;  %v7262_v5 = vld [vmem:[#allocation5 + $0x21] sm:$0xff]  ;;  %v13760_v17 = vpack.c.bf16 %v7264_v6, %v7263_v37  ;;  %v11723_v29 = vld [vmem:[%s14030_s6 + $0x120] sm:$0xff]  }
 0x6b8   : > { %v6853_v26 = vmax.f32 %v6837_v61, 0.0  ;;  %v6838_v55 = vadd.f32 %v13645_v57, %v6791_v53  ;;  %10643 = vmatmul.mubr.bf16.gmra.mrb[120].mxu0 %v13687_v7  ;;  %v6905_v57 = vpack.c.bf16 %v6890_v51, %v6889_v2  ;;  %v13755_v33 = vpack.c.bf16 %v7262_v5, %v7261_v62  ;;  %v11712_v61 = vld [vmem:[%s14030_s6 + $0xc8] sm:$0xff]   ;;  %v11722_v34 = vld [vmem:[%s14030_s6 + $0x118] sm:$0xff]   ;;  %v11739_v39 = vld [vmem:[%s14030_s6 + $0x1a0] sm:$0xff]  }
 0x6b9   : > { %6887 = vst [vmem:[#allocation5 + $0x88] sm:$0xff] %v6855_v45  ;;  %v6856_v16 = vmax.f32 %v6840_v63, 0.0  ;;  %10659 = vmatpush3.bf16.msra.mxu0 %v11699_v0  ;;  %10646 = vmatprep.mubr.bf16.mxu0 %v13684_v50  ;;  %v6899_v14 = vld [vmem:[#allocation5 + $0x57] sm:$0xff]  ;;  %v7266_v63 = vld [vmem:[#allocation5 + $0x41] sm:$0xff] }
 0x6ba   : > { %6885 = vst [vmem:[#allocation5 + $0x78] sm:$0xff] %v6853_v26  ;;  %v6854_v28 = vmax.f32 %v6838_v55, 0.0  ;;  %10660 = vmatprep.subr.bf16.mxu0 %v11700_v54  ;;  %v11711_v0 = vld [vmem:[%s14030_s6 + $0xc0] sm:$0xff]   ;;  %v11724_v1 = vld [vmem:[%s14030_s6 + $0x128] sm:$0xff]   ;;  %v11742_v62 = vld [vmem:[%s14030_s6 + $0x1b8] sm:$0xff]  }
 0x6bb   : > { %v6872_v30 = vmul.f32 0.0, %v6856_v16  ;;  %v7268_v53 = vld [vmem:[#allocation5 + $0x51] sm:$0xff]  ;;  %v7267_v55 = vld [vmem:[#allocation5 + $0x49] sm:$0xff]  ;;  %v8078_v37 = vld [vmem:[#allocation5 + $0x9f] sm:$0xff] }
 0x6bc   : > { %v6870_v27 = vmul.f32 0.0, %v6854_v28  ;;  %v6902_v35 = vld [vmem:[#allocation5 + $0x6f] sm:$0xff]  ;;  %v13772_v28 = vpack.c.bf16 %v7268_v53, %v7267_v55  ;;  %v11744_v6 = vld [vmem:[%s14030_s6 + $0x1c8] sm:$0xff]   ;;  %v8267_v55 = vld [vmem:[#allocation5 + $0x40] sm:$0xff] }
 0x6bd   : > { %6888 = vst [vmem:[#allocation5 + $0x90] sm:$0xff] %v6872_v30  ;;  %10661 = vmatpush3.bf16.msra.mxu0 %v11700_v54  ;;  %v13699_v11 = vpack.c.bf16 %v6872_v30, %v6855_v45  ;;  %v6900_v23 = vld [vmem:[#allocation5 + $0x5f] sm:$0xff]  ;;  %v6901_v10 = vld [vmem:[#allocation5 + $0x67] sm:$0xff]  ;;  %v11743_v5 = vld [vmem:[%s14030_s6 + $0x1c0] sm:$0xff]  }
 0x6be   : > { %6886 = vst [vmem:[#allocation5 + $0x80] sm:$0xff] %v6870_v27  ;;  %10662 = vmatprep.subr.bf16.mxu0 %v11701_v3  ;;  %v13701_v31 = vpack.c.bf16 %v6870_v27, %v6853_v26  ;;  %v13734_v8 = vpack.c.bf16 %v6900_v23, %v6899_v14  ;;  %v13739_v38 = vpack.c.bf16 %v6902_v35, %v6901_v10  ;;  %v11713_v54 = vld [vmem:[%s14030_s6 + $0xd0] sm:$0xff]   ;;  %v11714_v16 = vld [vmem:[%s14030_s6 + $0xd8] sm:$0xff]   ;;  %v11727_v14 = vld [vmem:[%s14030_s6 + $0x140] sm:$0xff]  }
 0x6bf   : > { %v7265_v45 = vld [vmem:[#allocation5 + $0x39] sm:$0xff]  ;;  %v7270_v51 = vld [vmem:[#allocation5 + $0x61] sm:$0xff]  ;;  %v11751_v53 = vld [vmem:[%s14030_s6 + $0x200] sm:$0xff]  }
 0x6c0   : > { %10647 = vmatmul.mubr.bf16.gmra.mrb[124].mxu0 %v13701_v31  ;;  %v13767_v26 = vpack.c.bf16 %v7266_v63, %v7265_v45  ;;  %v7269_v2 = vld [vmem:[#allocation5 + $0x59] sm:$0xff]  ;;  %v11726_v35 = vld [vmem:[%s14030_s6 + $0x138] sm:$0xff]  }
 0x6c1   : > { %10663 = vmatpush3.bf16.msra.mxu0 %v11701_v3  ;;  %10666 = vmatprep.mubr.bf16.mxu0 %v6905_v57  ;;  %v6903_v25 = vld [vmem:[#allocation5 + $0x77] sm:$0xff]  ;;  %v13779_v27 = vpack.c.bf16 %v7270_v51, %v7269_v2  ;;  %v7271_v57 = vld [vmem:[#allocation5 + $0x69] sm:$0xff] }
 0x6c2   : > { %10664 = vmatprep.subr.bf16.mxu0 %v11702_v19  ;;  %v11715_v3 = vld [vmem:[%s14030_s6 + $0xe0] sm:$0xff]   ;;  %v8264_v45 = vld [vmem:[#allocation5 + $0x28] sm:$0xff] }
 0x6c3   : > { %v7272_v30 = vld [vmem:[#allocation5 + $0x71] sm:$0xff]  ;;  %v11750_v63 = vld [vmem:[%s14030_s6 + $0x1f8] sm:$0xff]  }
 0x6c4   : > { %v7475_v23 = vld [vmem:[#allocation5 + $0x8f] sm:$0xff] }
 0x6c5   : > { %10665 = vmatpush3.bf16.msra.mxu0 %v11702_v19  ;;  %v6904_v46 = vld [vmem:[#allocation5 + $0x7f] sm:$0xff]  ;;  %v8268_v51 = vld [vmem:[#allocation5 + $0x48] sm:$0xff] }
 0x6c6   : > { %10682 = vmatprep.subr.bf16.mxu0 %v11703_v49  ;;  %v13746_v56 = vpack.c.bf16 %v6904_v46, %v6903_v25  ;;  %v11716_v19 = vld [vmem:[%s14030_s6 + $0xe8] sm:$0xff]   ;;  %v7274_v58 = vld [vmem:[#allocation5 + $0x81] sm:$0xff] }
 0x6c7   : > { %v7273_v21 = vld [vmem:[#allocation5 + $0x79] sm:$0xff]  ;;  %v11738_v46 = vld [vmem:[%s14030_s6 + $0x198] sm:$0xff]  }
 0x6c8   : > { %10667 = vmatmul.mubr.bf16.vlgmr.msra.gmra.mrb[112].mxu0 %v13710_v36  ;;  %v13791_v22 = vpack.c.bf16 %v7274_v58, %v7273_v21  ;;  %v11741_v25 = vld [vmem:[%s14030_s6 + $0x1b0] sm:$0xff]   ;;  %v8273_v21 = vld [vmem:[#allocation5 + $0x70] sm:$0xff]  ;;  %v8270_v58 = vld [vmem:[#allocation5 + $0x58] sm:$0xff] }
 0x6c9   : > { %10683 = vmatpush3.bf16.msra.mxu0 %v11703_v49  ;;  %10670 = vmatprep.mubr.bf16.mxu0 %v13715_v12  ;;  %v13784_v49 = vpack.c.bf16 %v7272_v30, %v7271_v57  ;;  %v11752_v30 = vld [vmem:[%s14030_s6 + $0x208] sm:$0xff]  }
 0x6ca   : > { %10684 = vmatprep.subr.bf16.mxu0 %v11704_v15 }
 0x6cd   : > { %10685 = vmatpush3.bf16.msra.mxu0 %v11704_v15  ;;  %v11718_v15 = vld [vmem:[%s14030_s6 + $0xf8] sm:$0xff]  }
 0x6ce   : > { %10686 = vmatprep.subr.bf16.mxu0 %v11705_v4 }
 0x6d0   : > { %10671 = vmatmul.mubr.bf16.gmra.mrb[116].mxu0 %v13722_v24 }
 0x6d1   : > { %10687 = vmatpush3.bf16.msra.mxu0 %v11705_v4  ;;  %10674 = vmatprep.mubr.bf16.mxu0 %v13727_v44  ;;  %v11719_v4 = vld [vmem:[%s14030_s6 + $0x100] sm:$0xff]  }
 0x6d2   : > { %10688 = vmatprep.subr.bf16.mxu0 %v11706_v40 }
 0x6d5   : > { %10689 = vmatpush3.bf16.msra.mxu0 %v11706_v40  ;;  %v11725_v40 = vld [vmem:[%s14030_s6 + $0x130] sm:$0xff]  }
 0x6d6   : > { %10690 = vmatprep.subr.bf16.mxu0 %v11707_v48 }
 0x6d8   : > { %10675 = vmatmul.mubr.bf16.gmra.mrb[120].mxu0 %v13734_v8 }
 0x6d9   : > { %10691 = vmatpush3.bf16.msra.mxu0 %v11707_v48  ;;  %10678 = vmatprep.mubr.bf16.mxu0 %v13739_v38  ;;  %v7474_v48 = vld [vmem:[#allocation5 + $0x87] sm:$0xff] }
 0x6da   : > { %10692 = vmatprep.subr.bf16.mxu0 %v11708_v59  ;;  %v13825_v10 = vpack.c.bf16 %v7475_v23, %v7474_v48  ;;  %v8276_v23 = vld [vmem:[#allocation5 + $0x88] sm:$0xff] }
 0x6dd   : > { %10693 = vmatpush3.bf16.msra.mxu0 %v11708_v59  ;;  %v11728_v59 = vld [vmem:[%s14030_s6 + $0x148] sm:$0xff]  }
 0x6de   : > { %10694 = vmatprep.subr.bf16.mxu0 %v11709_v52 }
 0x6e0   : > { %10679 = vmatmul.mubr.bf16.gmra.mrb[124].mxu0 %v13746_v56 }
 0x6e1   : > { %10695 = vmatpush3.bf16.msra.mxu0 %v11709_v52  ;;  %10698 = vmatprep.mubr.bf16.mxu0 %v7275_v18  ;;  %v11730_v52 = vld [vmem:[%s14030_s6 + $0x158] sm:$0xff]   ;;  %v7877_v18 = vld [vmem:[#allocation5 + $0x91] sm:$0xff] }
 0x6e2   : > { %10696 = vmatprep.subr.bf16.mxu0 %v11710_v41 }
 0x6e5   : > { %10697 = vmatpush3.bf16.msra.mxu0 %v11710_v41  ;;  %v7876_v41 = vld [vmem:[#allocation5 + $0x89] sm:$0xff] }
 0x6e6   : > { %10714 = vmatprep.subr.bf16.mxu0 %v11711_v0 }
 0x6e8   : > { %10699 = vmatmul.mubr.bf16.vlgmr.msra.gmra.mrb[112].mxu0 %v13755_v33 }
 0x6e9   : > { %10715 = vmatpush3.bf16.msra.mxu0 %v11711_v0  ;;  %10702 = vmatprep.mubr.bf16.mxu0 %v13760_v17  ;;  %v13891_v0 = vpack.c.bf16 %v7877_v18, %v7876_v41 }
 0x6ea   : > { %10716 = vmatprep.subr.bf16.mxu0 %v11712_v61 }
 0x6ed   : > { %10717 = vmatpush3.bf16.msra.mxu0 %v11712_v61  ;;  %v8265_v61 = vld [vmem:[#allocation5 + $0x30] sm:$0xff] }
 0x6ee   : > { %10718 = vmatprep.subr.bf16.mxu0 %v11713_v54 }
 0x6f0   : > { %10703 = vmatmul.mubr.bf16.gmra.mrb[116].mxu0 %v13767_v26 }
 0x6f1   : > { %10719 = vmatpush3.bf16.msra.mxu0 %v11713_v54  ;;  %10706 = vmatprep.mubr.bf16.mxu0 %v13772_v28 }
 0x6f2   : > { %10720 = vmatprep.subr.bf16.mxu0 %v11714_v16 }
 0x6f5   : > { %10721 = vmatpush3.bf16.msra.mxu0 %v11714_v16  ;;  %v8269_v16 = vld [vmem:[#allocation5 + $0x50] sm:$0xff] }
 0x6f6   : > { %10722 = vmatprep.subr.bf16.mxu0 %v11715_v3  ;;  %v8282_v57 = vpack.c.bf16 %v8269_v16, %v8268_v51 }
 0x6f8   : > { %10707 = vmatmul.mubr.bf16.gmra.mrb[120].mxu0 %v13779_v27 }
 0x6f9   : > { %10723 = vmatpush3.bf16.msra.mxu0 %v11715_v3  ;;  %10710 = vmatprep.mubr.bf16.mxu0 %v13784_v49  ;;  %v8266_v3 = vld [vmem:[#allocation5 + $0x38] sm:$0xff] }
 0x6fa   : > { %10724 = vmatprep.subr.bf16.mxu0 %v11716_v19  ;;  %v8281_v2 = vpack.c.bf16 %v8267_v55, %v8266_v3 }
 0x6fd   : > { %10725 = vmatpush3.bf16.msra.mxu0 %v11716_v19  ;;  %v11753_v19 = vld [vmem:[%s14030_s6 + $0x210] sm:$0xff]  }
 0x6fe   : > { %10726 = vmatprep.subr.bf16.mxu0 %v11717_v43 }
 0x700   : > { %10711 = vmatmul.mubr.bf16.gmra.mrb[124].mxu0 %v13791_v22 }
 0x701   : > { %10727 = vmatpush3.bf16.msra.mxu0 %v11717_v43  ;;  %10730 = vmatprep.mubr.bf16.mxu0 %v13710_v36  ;;  %v11721_v36 = vld [vmem:[%s14030_s6 + $0x110] sm:$0xff]  }
 0x702   : > { %10728 = vmatprep.subr.bf16.mxu0 %v11718_v15  ;;  %v8271_v43 = vld [vmem:[#allocation5 + $0x60] sm:$0xff] }
 0x705   : > { %10729 = vmatpush3.bf16.msra.mxu0 %v11718_v15  ;;  %v8283_v15 = vpack.c.bf16 %v8271_v43, %v8270_v58 }
 0x706   : > { %10746 = vmatprep.subr.bf16.mxu0 %v11719_v4 }
 0x708   : > { %10731 = vmatmul.mubr.bf16.vlgmr.msra.gmra.mrb[112].mxu0 %v13715_v12 }
 0x709   : > { %10747 = vmatpush3.bf16.msra.mxu0 %v11719_v4  ;;  %10734 = vmatprep.mubr.bf16.mxu0 %v13722_v24  ;;  %v8272_v4 = vld [vmem:[#allocation5 + $0x68] sm:$0xff] }
 0x70a   : > { %10748 = vmatprep.subr.bf16.mxu0 %v11720_v47 }
 0x70d   : > { %10749 = vmatpush3.bf16.msra.mxu0 %v11720_v47  ;;  %v11754_v47 = vld [vmem:[%s14030_s6 + $0x218] sm:$0xff]  }
 0x70e   : > { %10750 = vmatprep.subr.bf16.mxu0 %v11721_v36 }
 0x710   : > { %10735 = vmatmul.mubr.bf16.gmra.mrb[116].mxu0 %v13727_v44 }
 0x711   : > { %10751 = vmatpush3.bf16.msra.mxu0 %v11721_v36  ;;  %10738 = vmatprep.mubr.bf16.mxu0 %v13734_v8  ;;  %v8284_v36 = vpack.c.bf16 %v8273_v21, %v8272_v4 }
 0x712   : > { %10752 = vmatprep.subr.bf16.mxu0 %v11722_v34 }
 0x715   : > { %10753 = vmatpush3.bf16.msra.mxu0 %v11722_v34  ;;  %v11755_v34 = vld [vmem:[%s14030_s6 + $0x220] sm:$0xff]  }
 0x716   : > { %10754 = vmatprep.subr.bf16.mxu0 %v11723_v29 }
 0x718   : > { %10739 = vmatmul.mubr.bf16.gmra.mrb[120].mxu0 %v13739_v38 }
 0x719   : > { %10755 = vmatpush3.bf16.msra.mxu0 %v11723_v29  ;;  %10742 = vmatprep.mubr.bf16.mxu0 %v13746_v56  ;;  %v8275_v29 = vld [vmem:[#allocation5 + $0x80] sm:$0xff] }
 0x71a   : > { %10756 = vmatprep.subr.bf16.mxu0 %v11724_v1 }
 0x71d   : > { %10757 = vmatpush3.bf16.msra.mxu0 %v11724_v1  ;;  %v8277_v1 = vld [vmem:[#allocation5 + $0x90] sm:$0xff] }
 0x71e   : > { %10758 = vmatprep.subr.bf16.mxu0 %v11725_v40 }
 0x720   : > { %10743 = vmatmul.mubr.bf16.gmra.mrb[124].mxu0 %v13825_v10 }
 0x721   : > { %10759 = vmatpush3.bf16.msra.mxu0 %v11725_v40  ;;  %10762 = vmatprep.mubr.bf16.mxu0 %v13655_v32  ;;  %v11729_v32 = vld [vmem:[%s14030_s6 + $0x150] sm:$0xff]   ;;  %v8274_v40 = vld [vmem:[#allocation5 + $0x78] sm:$0xff] }
 0x722   : > { %10760 = vmatprep.subr.bf16.mxu0 %v11726_v35  ;;  %v8285_v48 = vpack.c.bf16 %v8275_v29, %v8274_v40 }
 0x725   : > { %10761 = vmatpush3.bf16.msra.mxu0 %v11726_v35  ;;  %v8286_v35 = vpack.c.bf16 %v8277_v1, %v8276_v23 }
 0x726   : > { %10778 = vmatprep.subr.bf16.mxu0 %v11727_v14 }
 0x728   : > { %10763 = vmatmul.mubr.bf16.vlgmr.msra.gmra.mrb[112].mxu0 %v13652_v13  ;;  %v11731_v13 = vld [vmem:[%s14030_s6 + $0x160] sm:$0xff]  }
 0x729   : > { %10779 = vmatpush3.bf16.msra.mxu0 %v11727_v14  ;;  %10766 = vmatprep.mubr.bf16.mxu0 %v13671_v60  ;;  %v11732_v60 = vld [vmem:[%s14030_s6 + $0x168] sm:$0xff]   ;;  %v11757_v14 = vld [vmem:[%s14030_s6 + $0x230] sm:$0xff]  }
 0x72a   : > { %10780 = vmatprep.subr.bf16.mxu0 %v11728_v59 }
 0x72d   : > { %10781 = vmatpush3.bf16.msra.mxu0 %v11728_v59  ;;  %v11758_v59 = vld [vmem:[%s14030_s6 + $0x238] sm:$0xff]  }
 0x72e   : > { %10782 = vmatprep.subr.bf16.mxu0 %v11729_v32 }
 0x730   : > { %10767 = vmatmul.mubr.bf16.gmra.mrb[116].mxu0 %v13668_v9  ;;  %v11733_v9 = vld [vmem:[%s14030_s6 + $0x170] sm:$0xff]  }
 0x731   : > { %10783 = vmatpush3.bf16.msra.mxu0 %v11729_v32  ;;  %10770 = vmatprep.mubr.bf16.mxu0 %v13687_v7  ;;  %v11734_v7 = vld [vmem:[%s14030_s6 + $0x178] sm:$0xff]   ;;  %v8479_v32 = vld [vmem:[#allocation5 + $0x99] sm:$0xff] }
 0x732   : > { %10784 = vmatprep.subr.bf16.mxu0 %v11730_v52 }
 0x735   : > { %10785 = vmatpush3.bf16.msra.mxu0 %v11730_v52  ;;  %v8480_v52 = vld [vmem:[#allocation5 + $0xa1] sm:$0xff] }
 0x736   : > { %10786 = vmatprep.subr.bf16.mxu0 %v11731_v13 }
 0x738   : > { %10771 = vmatmul.mubr.bf16.gmra.mrb[120].mxu0 %v13684_v50  ;;  %v11735_v50 = vld [vmem:[%s14030_s6 + $0x180] sm:$0xff]  }
 0x739   : > { %10787 = vmatpush3.bf16.msra.mxu0 %v11731_v13  ;;  %10774 = vmatprep.mubr.bf16.mxu0 %v13701_v31  ;;  %v11736_v31 = vld [vmem:[%s14030_s6 + $0x188] sm:$0xff]  }
 0x73a   : > { %10788 = vmatprep.subr.bf16.mxu0 %v11732_v60 }
 0x73d   : > { %10789 = vmatpush3.bf16.msra.mxu0 %v11732_v60 }
 0x73e   : > { %10790 = vmatprep.subr.bf16.mxu0 %v11733_v9 }
 0x740   : > { %10775 = vmatmul.mubr.bf16.gmra.mrb[124].mxu0 %v13699_v11  ;;  %v11737_v11 = vld [vmem:[%s14030_s6 + $0x190] sm:$0xff]  }
 0x741   : > { %10791 = vmatpush3.bf16.msra.mxu0 %v11733_v9  ;;  %10794 = vmatprep.mubr.bf16.mxu0 %v13755_v33  ;;  %v11746_v33 = vld [vmem:[%s14030_s6 + $0x1d8] sm:$0xff]  }
 0x742   : > { %10792 = vmatprep.subr.bf16.mxu0 %v11734_v7 }
 0x745   : > { %10793 = vmatpush3.bf16.msra.mxu0 %v11734_v7 }
 0x746   : > { %10810 = vmatprep.subr.bf16.mxu0 %v11735_v50 }
 0x748   : > { %10795 = vmatmul.mubr.bf16.vlgmr.msra.gmra.mrb[112].mxu0 %v13760_v17 }
 0x749   : > { %10811 = vmatpush3.bf16.msra.mxu0 %v11735_v50  ;;  %10798 = vmatprep.mubr.bf16.mxu0 %v13767_v26 }
 0x74a   : > { %10812 = vmatprep.subr.bf16.mxu0 %v11736_v31 }
 0x74d   : > { %10813 = vmatpush3.bf16.msra.mxu0 %v11736_v31 }
 0x74e   : > { %10814 = vmatprep.subr.bf16.mxu0 %v11737_v11 }
 0x750   : > { %10799 = vmatmul.mubr.bf16.gmra.mrb[116].mxu0 %v13772_v28 }
 0x751   : > { %10815 = vmatpush3.bf16.msra.mxu0 %v11737_v11  ;;  %10802 = vmatprep.mubr.bf16.mxu0 %v13779_v27 }
 0x752   : > { %10816 = vmatprep.subr.bf16.mxu0 %v11738_v46 }
 0x755   : > { %10817 = vmatpush3.bf16.msra.mxu0 %v11738_v46 }
 0x756   : > { %10818 = vmatprep.subr.bf16.mxu0 %v11739_v39 }
 0x758   : > { %10803 = vmatmul.mubr.bf16.gmra.mrb[120].mxu0 %v13784_v49 }
 0x759   : > { %10819 = vmatpush3.bf16.msra.mxu0 %v11739_v39  ;;  %10806 = vmatprep.mubr.bf16.mxu0 %v13791_v22  ;;  %v9309_v39 = vld [vmem:[%s14031_s7] ss:$0 sm:$0xff] }
 0x75a   : > { %10820 = vmatprep.subr.bf16.mxu0 %v11740_v20 }
 0x75d   : > { %10821 = vmatpush3.bf16.msra.mxu0 %v11740_v20 }
 0x75e   : > { %10822 = vmatprep.subr.bf16.mxu0 %v11741_v25 }
 0x760   : > { %10807 = vmatmul.mubr.bf16.gmra.mrb[124].mxu0 %v13891_v0 }
 0x761   : > { %10823 = vmatpush3.bf16.msra.mxu0 %v11741_v25  ;;  %10826 = vmatprep.mubr.bf16.mxu0 %v13715_v12  ;;  %v11745_v12 = vld [vmem:[%s14030_s6 + $0x1d0] sm:$0xff]  }
 0x762   : > { %10824 = vmatprep.subr.bf16.mxu0 %v11742_v62 }
 0x765   : > { %10825 = vmatpush3.bf16.msra.mxu0 %v11742_v62 }
 0x766   : > { %10842 = vmatprep.subr.bf16.mxu0 %v11743_v5 }
 0x768   : > { %10827 = vmatmul.mubr.bf16.vlgmr.msra.gmra.mrb[112].mxu0 %v13722_v24  ;;  %v11747_v24 = vld [vmem:[%s14030_s6 + $0x1e0] sm:$0xff]  }
 0x769   : > { %10843 = vmatpush3.bf16.msra.mxu0 %v11743_v5  ;;  %10830 = vmatprep.mubr.bf16.mxu0 %v13727_v44  ;;  %v11748_v44 = vld [vmem:[%s14030_s6 + $0x1e8] sm:$0xff]  }
 0x76a   : > { %10844 = vmatprep.subr.bf16.mxu0 %v11744_v6 }
 0x76d   : > { %10845 = vmatpush3.bf16.msra.mxu0 %v11744_v6 }
 0x76e   : > { %10846 = vmatprep.subr.bf16.mxu0 %v11745_v12 }
 0x770   : > { %10831 = vmatmul.mubr.bf16.gmra.mrb[116].mxu0 %v13734_v8  ;;  %v11749_v8 = vld [vmem:[%s14030_s6 + $0x1f0] sm:$0xff]  }
 0x771   : > { %10847 = vmatpush3.bf16.msra.mxu0 %v11745_v12  ;;  %10834 = vmatprep.mubr.bf16.mxu0 %v13739_v38  ;;  %v8077_v38 = vld [vmem:[#allocation5 + $0x97] sm:$0xff] }
 0x772   : > { %10848 = vmatprep.subr.bf16.mxu0 %v11746_v33  ;;  %v8086_v54 = vpack.c.bf16 %v8078_v37, %v8077_v38 }
 0x775   : > { %10849 = vmatpush3.bf16.msra.mxu0 %v11746_v33 }
 0x776   : > { %10850 = vmatprep.subr.bf16.mxu0 %v11747_v24 }
 0x778   : > { %10835 = vmatmul.mubr.bf16.gmra.mrb[120].mxu0 %v13746_v56  ;;  %v8280_v56 = vpack.c.bf16 %v8265_v61, %v8264_v45 }
 0x779   : > { %10851 = vmatpush3.bf16.msra.mxu0 %v11747_v24  ;;  %10838 = vmatprep.mubr.bf16.mxu0 %v13825_v10  ;;  %v11756_v10 = vld [vmem:[%s14030_s6 + $0x228] sm:$0xff]  }
 0x77a   : > { %10852 = vmatprep.subr.bf16.mxu0 %v11748_v44 }
 0x77d   : > { %10853 = vmatpush3.bf16.msra.mxu0 %v11748_v44 }
 0x77e   : > { %10854 = vmatprep.subr.bf16.mxu0 %v11749_v8 }
 0x780   : > { %10839 = vmatmul.mubr.bf16.gmra.mrb[124].mxu0 %v8086_v54 }
 0x781   : > { %10855 = vmatpush3.bf16.msra.mxu0 %v11749_v8  ;;  %10858 = vmatprep.mubr.bf16.mxu0 %v8280_v56 }
 0x782   : > { %10856 = vmatprep.subr.bf16.mxu0 %v11750_v63 }
 0x785   : > { %10857 = vmatpush3.bf16.msra.mxu0 %v11750_v63 }
 0x786   : > { %10874 = vmatprep.subr.bf16.mxu0 %v11751_v53 }
 0x788   : > { %10859 = vmatmul.mubr.bf16.vlgmr.msra.gmra.mrb[112].mxu0 %v8281_v2 }
 0x789   : > { %10875 = vmatpush3.bf16.msra.mxu0 %v11751_v53  ;;  %10862 = vmatprep.mubr.bf16.mxu0 %v8282_v57 }
 0x78a   : > { %10876 = vmatprep.subr.bf16.mxu0 %v11752_v30 }
 0x78d   : > { %10877 = vmatpush3.bf16.msra.mxu0 %v11752_v30 }
 0x78e   : > { %10878 = vmatprep.subr.bf16.mxu0 %v11753_v19 }
 0x790   : > { %10863 = vmatmul.mubr.bf16.gmra.mrb[116].mxu0 %v8283_v15 }
 0x791   : > { %10879 = vmatpush3.bf16.msra.mxu0 %v11753_v19  ;;  %10866 = vmatprep.mubr.bf16.mxu0 %v8284_v36 }
 0x792   : > { %10880 = vmatprep.subr.bf16.mxu0 %v11754_v47 }
 0x795   : > { %10881 = vmatpush3.bf16.msra.mxu0 %v11754_v47 }
 0x796   : > { %10882 = vmatprep.subr.bf16.mxu0 %v11755_v34 }
 0x798   : > { %10867 = vmatmul.mubr.bf16.gmra.mrb[120].mxu0 %v8285_v48 }
 0x799   : > { %10883 = vmatpush3.bf16.msra.mxu0 %v11755_v34  ;;  %10870 = vmatprep.mubr.bf16.mxu0 %v8286_v35 }
 0x79a   : > { %10884 = vmatprep.subr.bf16.mxu0 %v11756_v10 }
 0x79d   : > { %10885 = vmatpush3.bf16.msra.mxu0 %v11756_v10 }
 0x79e   : > { %10886 = vmatprep.subr.bf16.mxu0 %v11757_v14 }
 0x7a0   : > { %10871 = vmatmul.mubr.bf16.gmra.mrb[124].mxu0 %v13636_v42  ;;  %v8488_v42 = vpack.c.bf16 %v8480_v52, %v8479_v32 }
 0x7a1   : > { %10887 = vmatpush3.bf16.msra.mxu0 %v11757_v14  ;;  %10890 = vmatprep.mubr.bf16.mxu0 %v13760_v17 }
 0x7a2   : > { %10888 = vmatprep.subr.bf16.mxu0 %v11758_v59 }
 0x7a5   : > { %10889 = vmatpush3.bf16.msra.mxu0 %v11758_v59 }
 0x7a8   : > { %10891 = vmatmul.mubr.bf16.vlgmr.msra.gmra.mrb[112].mxu0 %v13767_v26 }
 0x7a9   : > { %10894 = vmatprep.mubr.bf16.mxu0 %v13772_v28 }
 0x7b0   : > { %10895 = vmatmul.mubr.bf16.gmra.mrb[116].mxu0 %v13779_v27 }
 0x7b1   : > { %10898 = vmatprep.mubr.bf16.mxu0 %v13784_v49 }
 0x7b8   : > { %10899 = vmatmul.mubr.bf16.gmra.mrb[120].mxu0 %v13791_v22 }
 0x7b9   : > { %10902 = vmatprep.mubr.bf16.mxu0 %v13891_v0 }
 0x7c0   : > { %10903 = vmatmul.mubr.bf16.gmra.mrb[124].mxu0 %v8488_v42 }
 0x87b   : > { %v10892_v17 = vpop.f32.mrb[112].mxu0 }
 0x87c   : > { %8668 = vst [vmem:[#allocation6 + $0x10] sm:$0xff] %v10892_v17  ;;  %v8587_v13 = vpop.f32.mrb[113].mxu0 }
 0x87d   : > { %8666 = vst [vmem:[#allocation6] sm:$0xff] %v8587_v13  ;;  %v10893_v26 = vpop.f32.mrb[114].mxu0 }
 0x87e   : > { %v8590_v28 = vpop.f32.mrb[115].mxu0 }
 0x883   : > { %v10896_v60 = vpop.f32.mrb[116].mxu0  ;;  %v8687_v27 = vld [vmem:[#allocation6 + $0x10] ss:$2 sm:$0xf] }
 0x884   : > { %8672 = vst [vmem:[#allocation6 + $0x30] sm:$0xff] %v10896_v60  ;;  %v8603_v49 = vpop.f32.mrb[117].mxu0  ;;  %v8682_v9 = vld [vmem:[#allocation6] ss:$2 sm:$0xf] }
 0x885   : > { %8670 = vst [vmem:[#allocation6 + $0x20] sm:$0xff] %v8603_v49  ;;  %v10897_v22 = vpop.f32.mrb[118].mxu0  ;;  %v8684_v7 = vld [vmem:[#allocation6 + $0x1] ss:$2 sm:$0xf] }
 0x886   : > { %v8606_v50 = vpop.f32.mrb[119].mxu0  ;;  %v8685_v31 = vmax.f32 %v8682_v9, %v8684_v7  ;;  %v8689_v11 = vld [vmem:[#allocation6 + $0x11] ss:$2 sm:$0xf] }
 0x887   : > { %v8690_v46 = vmax.f32 %v8687_v27, %v8689_v11 }
 0x889   : > { %v8691_v20 = vmax.f32 %v8685_v31, %v8690_v46 }
 0x88b   : > { %v10900_v25 = vpop.f32.mrb[120].mxu0  ;;  %v8698_v41 = vadd.f32 %v9309_v39, %v8691_v20  ;;  %v8707_v18 = vld [vmem:[#allocation6 + $0x30] ss:$2 sm:$0xf] }
 0x88c   : > { %8676 = vst [vmem:[#allocation6 + $0x50] sm:$0xff] %v10900_v25  ;;  %v8619_v0 = vpop.f32.mrb[121].mxu0  ;;  %v8702_v62 = vld [vmem:[#allocation6 + $0x20] ss:$2 sm:$0xf] }
 0x88d   : > { %8674 = vst [vmem:[#allocation6 + $0x40] sm:$0xff] %v8619_v0  ;;  %v10901_v5 = vpop.f32.mrb[122].mxu0  ;;  %v8699_v6 = vmax.f32 %v8698_v41, 0.0  ;;  %v8704_v12 = vld [vmem:[#allocation6 + $0x21] ss:$2 sm:$0xf] }
 0x88e   : > { %v8622_v33 = vpop.f32.mrb[123].mxu0  ;;  %v8705_v24 = vmax.f32 %v8702_v62, %v8704_v12  ;;  %v8709_v44 = vld [vmem:[#allocation6 + $0x31] ss:$2 sm:$0xf] }
 0x88f   : > { %8700 = vst [vmem:[%s13966_s23] sm:$0xf] %v8699_v6  ;;  %v8710_v8 = vmax.f32 %v8707_v18, %v8709_v44 }
 0x891   : > { %v8711_v38 = vmax.f32 %v8705_v24, %v8710_v8 }
 0x893   : > { %v10904_v37 = vpop.f32.mrb[124].mxu0  ;;  %v8712_v61 = vadd.f32 %v9309_v39, %v8711_v38  ;;  %v8721_v54 = vld [vmem:[#allocation6 + $0x50] ss:$2 sm:$0xf] }
 0x894   : > { %8680 = vst [vmem:[#allocation6 + $0x70] sm:$0xff] %v10904_v37  ;;  %v8635_v45 = vpop.f32.mrb[125].mxu0  ;;  %v8716_v63 = vld [vmem:[#allocation6 + $0x40] ss:$2 sm:$0xf] }
 0x895   : > { %8678 = vst [vmem:[#allocation6 + $0x60] sm:$0xff] %v8635_v45  ;;  %v10905_v56 = vpop.f32.mrb[126].mxu0  ;;  %v8713_v53 = vmax.f32 %v8712_v61, 0.0  ;;  %v8718_v55 = vld [vmem:[#allocation6 + $0x41] ss:$2 sm:$0xf] }
 0x896   : > { %v8638_v16 = vpop.f32.mrb[127].mxu0  ;;  %v8719_v3 = vmax.f32 %v8716_v63, %v8718_v55  ;;  %v8723_v2 = vld [vmem:[#allocation6 + $0x51] ss:$2 sm:$0xf] }
 0x897   : > { %8714 = vst [vmem:[%s13966_s23 + $0x4] sm:$0xf] %v8713_v53  ;;  %v8724_v51 = vmax.f32 %v8721_v54, %v8723_v2 }
 0x899   : > { %v8725_v30 = vmax.f32 %v8719_v3, %v8724_v51 }
 0x89b   : > { %v8726_v57 = vadd.f32 %v9309_v39, %v8725_v30  ;;  %v8735_v19 = vld [vmem:[#allocation6 + $0x70] ss:$2 sm:$0xf]  ;;  %v8737_v43 = vld [vmem:[#allocation6 + $0x71] ss:$2 sm:$0xf] }
 0x89c   : > { %v8730_v21 = vld [vmem:[#allocation6 + $0x60] ss:$2 sm:$0xf]  ;;  %v8732_v58 = vld [vmem:[#allocation6 + $0x61] ss:$2 sm:$0xf]  ;;  %v8738_v15 = vmax.f32 %v8735_v19, %v8737_v43 }
 0x89d   : > { %v8727_v4 = vmax.f32 %v8726_v57, 0.0  ;;  %v8733_v47 = vmax.f32 %v8730_v21, %v8732_v58 }
 0x89f   : > { %8728 = vst [vmem:[%s13966_s23 + $0x8] sm:$0xf] %v8727_v4  ;;  %v8739_v36 = vmax.f32 %v8733_v47, %v8738_v15 }
 0x8a1   : > { %v8740_v34 = vadd.f32 %v9309_v39, %v8739_v36 }
 0x8a3   : > { %v8741_v29 = vmax.f32 %v8740_v34, 0.0 }
 0x8a5   : > { %8742 = vst [vmem:[%s13966_s23 + $0xc] sm:$0xf] %v8741_v29 }
 0x8a6   : > { %11777 = shalt.err (!%p11774_p3)
}
 0x8a7   : > { %s11778_s19 = scalar_lea.hbm %s13976_s12, 256  ;;  %s11782_s23 = scalar_lea.hbm %s14032_s8, 512 }
 0x8a8   : > { %p11779_p4 = scmp.ne.s32.totalorder %s13976_s12, %s11778_s19  ;;  %p11783_p9 = scmp.lt.u32.totalorder %s13976_s12, %s14032_s8 }
 0x8a9   : > { %p11784_p10 = scmp.lt.u32.totalorder %s11782_s23, %s11778_s19  ;;  %p11786_p12 = scmp.lt.u32.totalorder %s11778_s19, %s13976_s12 }
 0x8aa   : > { %p11780_p7 = pnand %p11779_p4, %p11915_p5 }
 0x8ab   : > { %p11785_p11 = por %p11784_p10, %p11783_p9 }
 0x8ac   : > { %p11781_p8 = pneg %p11780_p7 }
 0x8ad   : > { %p11787_p13 = por %p11786_p12, %p11785_p11 }
 0x8af   : > { %p11788_p0 = pnand %p11787_p13, %p11781_p8 }
 0x8b1   : > { %11791 = shalt.err (!%p11788_p0)
}
 0x8b2   : > { %s11830_s10 = smov 128   ;;  %s11831_s17 = smov 8  }
 0x8b3   : > { %11547 = dma.vmem_to_hbm [thread:$0]  (%p11915_p5), %s13978_s25, 256, %s13976_s12, %s13983_s13, %s11830_s10, %s11830_s10, %s11831_s17  }
 0x8b4 PF: > { %p11553_p1 = scmp.ge.s32.totalorder %s11826_s30, 2  ;;  %s8772_s9 = sand.u32 1, %s11814_s27  }
 0x8b5   : > { %s8773_s18 = scalar_lea.sflag [#allocation8], %s8772_s9 }
 0x8b6   : > { %p11550_p2 = pnand %p11553_p1, %p11919_p6 }
 0x8b8   : > { %11809 = dma.done.wait (!%p11550_p2), %s8773_s18, 256  }
 0x8b9   : > { %11811 = vsyncadd (!%p11550_p2), %s8773_s18, 4294967040  ;;  %p18_p3 = scmp.ge.s32.totalorder %s11902_s11, 4   ;;  %s14446_s27 = smov %s11818_s28 }
 0x8ba   : > { %s14447_s28 = smov %s11822_s29  ;;  %s14448_s29 = smov %s11913_s14 }
 0x8bb   : > { %s14449_s30 = smov %s11902_s11  ;;  %20 = sbr.rel (!%p18_p3) target bundleno = 3 (0x3), region = 133 }
 0x8c2   :  { %8778 = vsyncpa [#allocation8], 1 }
 0x8c3   :  { %8780 = vsyncpa [#allocation8 + $0x1], 1 }

</bundles_post_ra>
